<compile_context>
chip_gen: v6e
topology: v6e:2x2x1
jax: 0.10.0
libtpu: 0.0.40
codegen_flags: <defaults>
</compile_context>

<pallas_src>
import functools

import jax
import jax.numpy as jnp
from jax.experimental import pallas as pl
from jax.experimental.pallas import tpu as pltpu


# ----------------------------- math helpers --------------------------------

def _softplus(x):
    # matches torch.nn.Softplus(beta=1, threshold=20)
    return jnp.where(x > 20.0, x, jnp.log1p(jnp.exp(jnp.minimum(x, 20.0))))


def _round_up(x, m):
    return ((x + m - 1) // m) * m


def _lstm_step(gates, c, w):
    """PyTorch LSTM cell gate math on vreg-aligned gate slabs of width w."""
    i = jax.nn.sigmoid(gates[:, 0 * w:1 * w])
    f = jax.nn.sigmoid(gates[:, 1 * w:2 * w])
    g = jnp.tanh(gates[:, 2 * w:3 * w])
    o = jax.nn.sigmoid(gates[:, 3 * w:4 * w])
    c_new = f * c + i * g
    return o * jnp.tanh(c_new), c_new


# ------------------------------ fused kernel --------------------------------

def vae_fused_kernel(
    # activations
    xt_ref, eps_ref, gx0_ref,
    # fused encoder (enc_c | enc_b block-diagonal, padded to 128 lanes)
    wee_ref, bee_ref, weih_ref, wehh_ref, bel_ref,
    # latent (mixer + fused mu|log_var head padded to 128 lanes)
    wmix_ref, bmix_ref, wmulv_ref, bmulv_ref,
    # decoder (padded to 128 lanes; alpha|beta|bernoulli heads fused)
    wde_ref, bde_ref, wexp_ref, bexp_ref,
    wdih_ref, wdhh_ref, bdl_ref, whead_ref, bhead_ref,
    # outputs (lane-dense slabs)
    mulv_ref, dec_ref,
    *, T, B, ic):
    f32 = jnp.float32
    Sp = wee_ref.shape[1]     # fused encoder state width (128)
    Dp = wde_ref.shape[1]     # padded decoder hidden width (128)
    L = wmix_ref.shape[1]     # latent size

    xt = xt_ref[...]          # (T*B, 2*(ic+ib)) time-major combined input

    # -------- fused encoders: hoisted whole-sequence matmuls ----------------
    emb_e = jnp.maximum(
        jnp.dot(xt, wee_ref[...], preferred_element_type=f32) + bee_ref[...], 0.0)
    gx_e = jnp.dot(emb_e, weih_ref[...], preferred_element_type=f32) + bel_ref[...]
    w_ehh = wehh_ref[...]

    # -------- fused encoder recurrence (one matmul per step for BOTH) -------
    s = jnp.zeros((B, Sp), f32)
    ce = jnp.zeros((B, Sp), f32)
    for t in range(T):  # static, fully unrolled
        gates = gx_e[t * B:(t + 1) * B, :] + jnp.dot(
            s, w_ehh, preferred_element_type=f32)
        s, ce = _lstm_step(gates, ce, Sp)
    # s = [h_c | h_b | 0] packed along lanes

    # -------- latent heads + reparametrization ------------------------------
    mixed = jnp.maximum(
        jnp.dot(s, wmix_ref[...], preferred_element_type=f32) + bmix_ref[...], 0.0)
    mulv = jnp.dot(mixed, wmulv_ref[...], preferred_element_type=f32) + bmulv_ref[...]
    mulv_ref[...] = mulv                       # lane-dense (B, 128) store
    mu = mulv[:, 0:L]
    lv = mulv[:, L:2 * L]
    z = mu + jnp.exp(0.5 * lv) * eps_ref[...]

    # -------- decoder: hoisted whole-sequence matmuls ------------------------
    # (no ReLU on the decoder embedding in the reference module)
    emb_d = jnp.dot(xt, wde_ref[...], preferred_element_type=f32) + bde_ref[...]
    gx_d = jnp.dot(emb_d, wdih_ref[...], preferred_element_type=f32) + bdl_ref[...]
    w_dhh = wdhh_ref[...]
    gx0 = gx0_ref[...]                         # precomputed zero-row gate input

    h = jnp.dot(z, wexp_ref[...], preferred_element_type=f32) + bexp_ref[...]
    cd = jnp.zeros((B, Dp), f32)
    hs = [None] * T
    for step in range(T):  # static, fully unrolled; recurrence over flipped time
        if step == 0:
            gates_x = gx0                      # (1, 4*Dp), broadcasts over B
        else:
            u = T - step                       # original time index at this step
            gates_x = gx_d[u * B:(u + 1) * B, :]
        gates = gates_x + jnp.dot(h, w_dhh, preferred_element_type=f32)
        h, cd = _lstm_step(gates, cd, Dp)
        hs[T - 1 - step] = h                   # already flipped-back output order

    # single fused head matmul + single lane-dense output store
    h_all = jnp.concatenate(hs, axis=0)        # (T*B, Dp), register-resident states
    heads = jnp.dot(h_all, whead_ref[...], preferred_element_type=f32) + bhead_ref[...]
    lane = jax.lax.broadcasted_iota(jnp.int32, heads.shape, 1)
    dec_ref[...] = jnp.where(lane < 2 * ic, _softplus(heads), heads)


# ------------------------------ parameters ----------------------------------

def _linear_params(key, fan_in, fan_out):
    k = 1.0 / jnp.sqrt(jnp.float32(fan_in))
    wk, bk = jax.random.split(key)
    w = jax.random.uniform(wk, (fan_in, fan_out), jnp.float32, -k, k)
    b = jax.random.uniform(bk, (1, fan_out), jnp.float32, -k, k)
    return w, b


def _lstm_params(key, in_size, hidden):
    # weights stored transposed for x @ W; bias = b_ih + b_hh combined
    k = 1.0 / jnp.sqrt(jnp.float32(hidden))
    k1, k2, k3 = jax.random.split(key, 3)
    w_ih = jax.random.uniform(k1, (in_size, 4 * hidden), jnp.float32, -k, k)
    w_hh = jax.random.uniform(k2, (hidden, 4 * hidden), jnp.float32, -k, k)
    b = jax.random.uniform(k3, (1, 4 * hidden), jnp.float32, -k, k)
    return w_ih, w_hh, b


def init_vae_params(key, input_size_c, input_size_b, hidden_size_c,
                    hidden_size_b, hidden_size_d, latent_size):
    keys = jax.random.split(key, 16)
    params = {}

    w_emb, b_emb = _linear_params(keys[0], input_size_c * 2, hidden_size_c)
    w_ih, w_hh, b_lstm = _lstm_params(keys[1], hidden_size_c, hidden_size_c)
    params['enc_c'] = dict(w_emb=w_emb, b_emb=b_emb, w_ih=w_ih, w_hh=w_hh, b_lstm=b_lstm)

    w_emb, b_emb = _linear_params(keys[2], input_size_b * 2, hidden_size_b)
    w_ih, w_hh, b_lstm = _lstm_params(keys[3], hidden_size_b, hidden_size_b)
    params['enc_b'] = dict(w_emb=w_emb, b_emb=b_emb, w_ih=w_ih, w_hh=w_hh, b_lstm=b_lstm)

    w_mix, b_mix = _linear_params(keys[4], hidden_size_c + hidden_size_b, latent_size)
    w_mu, b_mu = _linear_params(keys[5], latent_size, latent_size)
    w_lv, b_lv = _linear_params(keys[6], latent_size, latent_size)
    params['latent'] = dict(w_mix=w_mix, b_mix=b_mix, w_mu=w_mu, b_mu=b_mu,
                            w_lv=w_lv, b_lv=b_lv)

    w_emb, b_emb = _linear_params(keys[7], (input_size_c + input_size_b) * 2, hidden_size_d)
    w_exp, b_exp = _linear_params(keys[8], latent_size, hidden_size_d)
    w_ih, w_hh, b_lstm = _lstm_params(keys[9], hidden_size_d, hidden_size_d)
    w_a, b_a = _linear_params(keys[10], hidden_size_d, input_size_c)
    w_b, b_b = _linear_params(keys[11], hidden_size_d, input_size_c)
    w_ber, b_ber = _linear_params(keys[12], hidden_size_d, input_size_b)
    params['dec'] = dict(w_emb=w_emb, b_emb=b_emb, w_exp=w_exp, b_exp=b_exp,
                         w_ih=w_ih, w_hh=w_hh, b_lstm=b_lstm,
                         w_a=w_a, b_a=b_a, w_b=w_b, b_b=b_b,
                         w_ber=w_ber, b_ber=b_ber)
    return params


def prepare_fused_params(params, input_size_c, input_size_b):
    """One-time weight fusion / permutation / vreg-padding (done outside the
    hot path so vae_forward issues no per-call concats)."""
    f32 = jnp.float32
    ic, ib = input_size_c, input_size_b
    ec, eb, lt, dc = params['enc_c'], params['enc_b'], params['latent'], params['dec']
    Hc = ec['w_emb'].shape[1]
    Hb = eb['w_emb'].shape[1]
    Hd = dc['w_exp'].shape[1]
    L = lt['w_mix'].shape[1]
    Fin = 2 * (ic + ib)
    Sp = _round_up(Hc + Hb, 128)                     # fused encoder state width
    Dp = _round_up(Hd, 128)                          # padded decoder hidden width
    OW = _round_up(max(2 * L, 2 * ic + ib), 128)     # lane-dense output slab width

    # combined input column order is [x_c | m_c | x_b | m_b]
    # ---- fused encoder embedding ----
    w_ee = jnp.zeros((Fin, Sp), f32)
    w_ee = w_ee.at[0:2 * ic, 0:Hc].set(ec['w_emb'])
    w_ee = w_ee.at[2 * ic:Fin, Hc:Hc + Hb].set(eb['w_emb'])
    b_ee = jnp.zeros((1, Sp), f32)
    b_ee = b_ee.at[:, 0:Hc].set(ec['b_emb']).at[:, Hc:Hc + Hb].set(eb['b_emb'])

    # ---- fused encoder LSTM weights: 4 gates x Sp lanes, block-diagonal ----
    def fuse_enc_mat(wc, wb):
        m = jnp.zeros((Sp, 4 * Sp), f32)
        for k in range(4):
            m = m.at[0:Hc, k * Sp:k * Sp + Hc].set(wc[:, k * Hc:(k + 1) * Hc])
            m = m.at[Hc:Hc + Hb, k * Sp + Hc:k * Sp + Hc + Hb].set(wb[:, k * Hb:(k + 1) * Hb])
        return m

    w_eih = fuse_enc_mat(ec['w_ih'], eb['w_ih'])
    w_ehh = fuse_enc_mat(ec['w_hh'], eb['w_hh'])
    b_el = jnp.zeros((1, 4 * Sp), f32)
    for k in range(4):
        b_el = b_el.at[:, k * Sp:k * Sp + Hc].set(ec['b_lstm'][:, k * Hc:(k + 1) * Hc])
        b_el = b_el.at[:, k * Sp + Hc:k * Sp + Hc + Hb].set(eb['b_lstm'][:, k * Hb:(k + 1) * Hb])

    # ---- latent (mixer rows match fused [h_c | h_b] layout; mu|lv fused) ----
    w_mix = jnp.zeros((Sp, L), f32).at[0:Hc + Hb, :].set(lt['w_mix'])
    b_mix = lt['b_mix']
    w_mulv = jnp.zeros((L, OW), f32).at[:, 0:L].set(lt['w_mu']).at[:, L:2 * L].set(lt['w_lv'])
    b_mulv = jnp.zeros((1, OW), f32).at[:, 0:L].set(lt['b_mu']).at[:, L:2 * L].set(lt['b_lv'])

    # ---- decoder embedding: permute rows from [x_c, x_b, m_c, m_b] (module
    #      order) to the combined column order [x_c, m_c, x_b, m_b], pad ----
    wd = dc['w_emb']
    wd_perm = jnp.concatenate(
        [wd[0:ic], wd[ic + ib:2 * ic + ib], wd[ic:ic + ib], wd[2 * ic + ib:Fin]], axis=0)
    w_de = jnp.zeros((Fin, Dp), f32).at[:, 0:Hd].set(wd_perm)
    b_de = jnp.zeros((1, Dp), f32).at[:, 0:Hd].set(dc['b_emb'])
    w_exp = jnp.zeros((L, Dp), f32).at[:, 0:Hd].set(dc['w_exp'])
    b_exp = jnp.zeros((1, Dp), f32).at[:, 0:Hd].set(dc['b_exp'])

    # ---- padded decoder LSTM weights (vreg-aligned gates) ----
    def pad_dec_mat(w):
        m = jnp.zeros((Dp, 4 * Dp), f32)
        for k in range(4):
            m = m.at[0:Hd, k * Dp:k * Dp + Hd].set(w[:, k * Hd:(k + 1) * Hd])
        return m

    w_dih = pad_dec_mat(dc['w_ih'])
    w_dhh = pad_dec_mat(dc['w_hh'])
    b_dl = jnp.zeros((1, 4 * Dp), f32)
    for k in range(4):
        b_dl = b_dl.at[:, k * Dp:k * Dp + Hd].set(dc['b_lstm'][:, k * Hd:(k + 1) * Hd])

    # gate-x contribution of the all-zero shift row (embedding(0) = bias, no relu)
    gx0 = jnp.dot(b_de, w_dih) + b_dl            # (1, 4*Dp)

    # ---- fused + lane-padded output heads (alpha | beta | bernoulli) ----
    w_head = jnp.zeros((Dp, OW), f32)
    w_head = w_head.at[0:Hd, 0:ic].set(dc['w_a'])
    w_head = w_head.at[0:Hd, ic:2 * ic].set(dc['w_b'])
    w_head = w_head.at[0:Hd, 2 * ic:2 * ic + ib].set(dc['w_ber'])
    b_head = jnp.zeros((1, OW), f32)
    b_head = b_head.at[:, 0:ic].set(dc['b_a'])
    b_head = b_head.at[:, ic:2 * ic].set(dc['b_b'])
    b_head = b_head.at[:, 2 * ic:2 * ic + ib].set(dc['b_ber'])

    return dict(gx0=gx0,
                w_ee=w_ee, b_ee=b_ee, w_eih=w_eih, w_ehh=w_ehh, b_el=b_el,
                w_mix=w_mix, b_mix=b_mix, w_mulv=w_mulv, b_mulv=b_mulv,
                w_de=w_de, b_de=b_de, w_exp=w_exp, b_exp=b_exp,
                w_dih=w_dih, w_dhh=w_dhh, b_dl=b_dl,
                w_head=w_head, b_head=b_head)


# ------------------------------ forward pass ---------------------------------

def vae_forward(fused, x_c, m_c, x_b, m_b, eps):
    """x_*/m_* are batch-first (B, T, F) float32, like the PyTorch module.
    eps plays the role of torch.randn_like(std) in reparametrize."""
    B, T, ic = x_c.shape
    ib = x_b.shape[-1]
    L = fused['w_mix'].shape[1]
    OW = fused['w_mulv'].shape[1]

    # single lane-concat + time-major flatten: row t*B + b = inputs[b, t]
    xt = jnp.concatenate([x_c, m_c, x_b, m_b], axis=-1)          # (B, T, Fin)
    xt = jnp.transpose(xt, (1, 0, 2)).reshape(T * B, 2 * (ic + ib))

    operands = (xt, eps, fused['gx0'],
                fused['w_ee'], fused['b_ee'], fused['w_eih'], fused['w_ehh'], fused['b_el'],
                fused['w_mix'], fused['b_mix'], fused['w_mulv'], fused['b_mulv'],
                fused['w_de'], fused['b_de'], fused['w_exp'], fused['b_exp'],
                fused['w_dih'], fused['w_dhh'], fused['b_dl'],
                fused['w_head'], fused['b_head'])

    vmem = pl.BlockSpec(memory_space=pltpu.MemorySpace.VMEM)
    kernel = functools.partial(vae_fused_kernel, T=T, B=B, ic=ic)

    mulv, dec_flat = pl.pallas_call(
        kernel,
        out_shape=(jax.ShapeDtypeStruct((B, OW), jnp.float32),
                   jax.ShapeDtypeStruct((T * B, OW), jnp.float32)),
        in_specs=[vmem] * len(operands),
        out_specs=(vmem, vmem),
    )(*operands)

    mu = mulv[:, :L]
    log_var = mulv[:, L:2 * L]
    dec = jnp.transpose(dec_flat.reshape(T, B, OW), (1, 0, 2))    # (B, T, OW)
    decoder_output = {'alpha': dec[..., :ic],
                      'beta': dec[..., ic:2 * ic],
                      'bernoulli': dec[..., 2 * ic:2 * ic + ib]}
    return mu, log_var, decoder_output


# ---------------------------------- main -------------------------------------

if __name__ == "__main__":
    B, T = 2, 8
    input_size_c, input_size_b = 4, 3
    hidden_size_c, hidden_size_b, hidden_size_d = 32, 32, 32
    latent_size = 16
    num_layers = 1  # required by the reference Decoder (h0 has a single layer)

    key = jax.random.PRNGKey(0)
    kparam, kdata, keps = jax.random.split(key, 3)
    params = init_vae_params(kparam, input_size_c, input_size_b, hidden_size_c,
                             hidden_size_b, hidden_size_d, latent_size)
    fused = prepare_fused_params(params, input_size_c, input_size_b)

    k1, k2, k3, k4 = jax.random.split(kdata, 4)
    x_c = jax.random.normal(k1, (B, T, input_size_c), jnp.float32)
    m_c = (jax.random.uniform(k2, (B, T, input_size_c)) > 0.5).astype(jnp.float32)
    x_b = (jax.random.uniform(k3, (B, T, input_size_b)) > 0.5).astype(jnp.float32)
    m_b = (jax.random.uniform(k4, (B, T, input_size_b)) > 0.5).astype(jnp.float32)
    eps = jax.random.normal(keps, (B, latent_size), jnp.float32)

    fwd = jax.jit(vae_forward)
    mu, log_var, dec_out = fwd(fused, x_c, m_c, x_b, m_b, eps)
    jax.block_until_ready((mu, log_var, dec_out))

    assert mu.shape == (B, latent_size)
    assert log_var.shape == (B, latent_size)
    assert dec_out['alpha'].shape == (B, T, input_size_c)
    assert dec_out['beta'].shape == (B, T, input_size_c)
    assert dec_out['bernoulli'].shape == (B, T, input_size_b)
    assert bool(jnp.all(jnp.isfinite(mu))) and bool(jnp.all(jnp.isfinite(log_var)))
    assert bool(jnp.all(dec_out['alpha'] > 0.0)) and bool(jnp.all(dec_out['beta'] > 0.0))
    assert bool(jnp.all(jnp.isfinite(dec_out['bernoulli'])))
    print("KERNEL_OK")
</pallas_src>

<mosaic_0001>
module attributes {stable_mosaic.version = 11 : i64} {
  func.func @vae_fused_kernel(%arg0: memref<16x14xf32, #tpu.memory_space<vmem>>, %arg1: memref<2x16xf32, #tpu.memory_space<vmem>>, %arg2: memref<1x512xf32, #tpu.memory_space<vmem>>, %arg3: memref<14x128xf32, #tpu.memory_space<vmem>>, %arg4: memref<1x128xf32, #tpu.memory_space<vmem>>, %arg5: memref<128x512xf32, #tpu.memory_space<vmem>>, %arg6: memref<128x512xf32, #tpu.memory_space<vmem>>, %arg7: memref<1x512xf32, #tpu.memory_space<vmem>>, %arg8: memref<128x16xf32, #tpu.memory_space<vmem>>, %arg9: memref<1x16xf32, #tpu.memory_space<vmem>>, %arg10: memref<16x128xf32, #tpu.memory_space<vmem>>, %arg11: memref<1x128xf32, #tpu.memory_space<vmem>>, %arg12: memref<14x128xf32, #tpu.memory_space<vmem>>, %arg13: memref<1x128xf32, #tpu.memory_space<vmem>>, %arg14: memref<16x128xf32, #tpu.memory_space<vmem>>, %arg15: memref<1x128xf32, #tpu.memory_space<vmem>>, %arg16: memref<128x512xf32, #tpu.memory_space<vmem>>, %arg17: memref<128x512xf32, #tpu.memory_space<vmem>>, %arg18: memref<1x512xf32, #tpu.memory_space<vmem>>, %arg19: memref<128x128xf32, #tpu.memory_space<vmem>>, %arg20: memref<1x128xf32, #tpu.memory_space<vmem>>, %arg21: memref<2x128xf32, #tpu.memory_space<vmem>>, %arg22: memref<16x128xf32, #tpu.memory_space<vmem>>) attributes {dimension_semantics = [], scalar_prefetch = 0 : i64, scratch_operands = 0 : i64, tpu.core_type = #tpu.core_type<tc>} {
    %c0 = arith.constant 0 : index
    %c0_0 = arith.constant 0 : index
    %0 = vector.load %arg0[%c0, %c0_0] : memref<16x14xf32, #tpu.memory_space<vmem>>, vector<16x14xf32>
    %c0_1 = arith.constant 0 : index
    %c0_2 = arith.constant 0 : index
    %1 = vector.load %arg3[%c0_1, %c0_2] : memref<14x128xf32, #tpu.memory_space<vmem>>, vector<14x128xf32>
    %cst = arith.constant dense<0.000000e+00> : vector<16x128xf32>
    %2 = tpu.matmul %0, %1, %cst {dimension_numbers = #tpu.dot_dimension_numbers<[1], [0], [0], [1], [0, 0, 1, 1], [], []>} : vector<16x14xf32>, vector<14x128xf32>, vector<16x128xf32> -> vector<16x128xf32>
    %c0_3 = arith.constant 0 : index
    %c0_4 = arith.constant 0 : index
    %3 = vector.load %arg4[%c0_3, %c0_4] : memref<1x128xf32, #tpu.memory_space<vmem>>, vector<1x128xf32>
    %4 = vector.broadcast %3 : vector<1x128xf32> to vector<16x128xf32>
    %5 = arith.addf %2, %4 : vector<16x128xf32>
    %cst_5 = arith.constant 0.000000e+00 : f32
    %6 = vector.broadcast %cst_5 : f32 to vector<16x128xf32>
    %7 = arith.maximumf %5, %6 : vector<16x128xf32>
    %c0_6 = arith.constant 0 : index
    %c0_7 = arith.constant 0 : index
    %8 = vector.load %arg5[%c0_6, %c0_7] : memref<128x512xf32, #tpu.memory_space<vmem>>, vector<128x512xf32>
    %cst_8 = arith.constant dense<0.000000e+00> : vector<16x512xf32>
    %9 = tpu.matmul %7, %8, %cst_8 {dimension_numbers = #tpu.dot_dimension_numbers<[1], [0], [0], [1], [0, 0, 1, 1], [], []>} : vector<16x128xf32>, vector<128x512xf32>, vector<16x512xf32> -> vector<16x512xf32>
    %c0_9 = arith.constant 0 : index
    %c0_10 = arith.constant 0 : index
    %10 = vector.load %arg7[%c0_9, %c0_10] : memref<1x512xf32, #tpu.memory_space<vmem>>, vector<1x512xf32>
    %11 = vector.broadcast %10 : vector<1x512xf32> to vector<16x512xf32>
    %12 = arith.addf %9, %11 : vector<16x512xf32>
    %c0_11 = arith.constant 0 : index
    %c0_12 = arith.constant 0 : index
    %13 = vector.load %arg6[%c0_11, %c0_12] : memref<128x512xf32, #tpu.memory_space<vmem>>, vector<128x512xf32>
    %cst_13 = arith.constant 0.000000e+00 : f32
    %14 = vector.broadcast %cst_13 : f32 to vector<2x128xf32>
    %cst_14 = arith.constant 0.000000e+00 : f32
    %15 = vector.broadcast %cst_14 : f32 to vector<2x128xf32>
    %16 = vector.extract_strided_slice %12 {offsets = [0, 0], sizes = [2, 512], strides = [1, 1]} : vector<16x512xf32> to vector<2x512xf32>
    %cst_15 = arith.constant dense<0.000000e+00> : vector<2x512xf32>
    %17 = tpu.matmul %14, %13, %cst_15 {dimension_numbers = #tpu.dot_dimension_numbers<[1], [0], [0], [1], [0, 0, 1, 1], [], []>} : vector<2x128xf32>, vector<128x512xf32>, vector<2x512xf32> -> vector<2x512xf32>
    %18 = arith.addf %16, %17 : vector<2x512xf32>
    %19 = vector.extract_strided_slice %18 {offsets = [0, 0], sizes = [2, 128], strides = [1, 1]} : vector<2x512xf32> to vector<2x128xf32>
    %20 = arith.negf %19 : vector<2x128xf32>
    %21 = math.exp %20 : vector<2x128xf32>
    %cst_16 = arith.constant 1.000000e+00 : f32
    %22 = vector.broadcast %cst_16 : f32 to vector<2x128xf32>
    %23 = arith.addf %22, %21 : vector<2x128xf32>
    %24 = arith.divf %22, %23 : vector<2x128xf32>
    %25 = vector.extract_strided_slice %18 {offsets = [0, 128], sizes = [2, 128], strides = [1, 1]} : vector<2x512xf32> to vector<2x128xf32>
    %26 = arith.negf %25 : vector<2x128xf32>
    %27 = math.exp %26 : vector<2x128xf32>
    %cst_17 = arith.constant 1.000000e+00 : f32
    %28 = vector.broadcast %cst_17 : f32 to vector<2x128xf32>
    %29 = arith.addf %28, %27 : vector<2x128xf32>
    %30 = arith.divf %28, %29 : vector<2x128xf32>
    %31 = vector.extract_strided_slice %18 {offsets = [0, 256], sizes = [2, 128], strides = [1, 1]} : vector<2x512xf32> to vector<2x128xf32>
    %32 = math.tanh %31 : vector<2x128xf32>
    %33 = vector.extract_strided_slice %18 {offsets = [0, 384], sizes = [2, 128], strides = [1, 1]} : vector<2x512xf32> to vector<2x128xf32>
    %34 = arith.negf %33 : vector<2x128xf32>
    %35 = math.exp %34 : vector<2x128xf32>
    %cst_18 = arith.constant 1.000000e+00 : f32
    %36 = vector.broadcast %cst_18 : f32 to vector<2x128xf32>
    %37 = arith.addf %36, %35 : vector<2x128xf32>
    %38 = arith.divf %36, %37 : vector<2x128xf32>
    %39 = arith.mulf %30, %15 : vector<2x128xf32>
    %40 = arith.mulf %24, %32 : vector<2x128xf32>
    %41 = arith.addf %39, %40 : vector<2x128xf32>
    %42 = math.tanh %41 : vector<2x128xf32>
    %43 = arith.mulf %38, %42 : vector<2x128xf32>
    %44 = vector.extract_strided_slice %12 {offsets = [2, 0], sizes = [2, 512], strides = [1, 1]} : vector<16x512xf32> to vector<2x512xf32>
    %cst_19 = arith.constant dense<0.000000e+00> : vector<2x512xf32>
    %45 = tpu.matmul %43, %13, %cst_19 {dimension_numbers = #tpu.dot_dimension_numbers<[1], [0], [0], [1], [0, 0, 1, 1], [], []>} : vector<2x128xf32>, vector<128x512xf32>, vector<2x512xf32> -> vector<2x512xf32>
    %46 = arith.addf %44, %45 : vector<2x512xf32>
    %47 = vector.extract_strided_slice %46 {offsets = [0, 0], sizes = [2, 128], strides = [1, 1]} : vector<2x512xf32> to vector<2x128xf32>
    %48 = arith.negf %47 : vector<2x128xf32>
    %49 = math.exp %48 : vector<2x128xf32>
    %cst_20 = arith.constant 1.000000e+00 : f32
    %50 = vector.broadcast %cst_20 : f32 to vector<2x128xf32>
    %51 = arith.addf %50, %49 : vector<2x128xf32>
    %52 = arith.divf %50, %51 : vector<2x128xf32>
    %53 = vector.extract_strided_slice %46 {offsets = [0, 128], sizes = [2, 128], strides = [1, 1]} : vector<2x512xf32> to vector<2x128xf32>
    %54 = arith.negf %53 : vector<2x128xf32>
    %55 = math.exp %54 : vector<2x128xf32>
    %cst_21 = arith.constant 1.000000e+00 : f32
    %56 = vector.broadcast %cst_21 : f32 to vector<2x128xf32>
    %57 = arith.addf %56, %55 : vector<2x128xf32>
    %58 = arith.divf %56, %57 : vector<2x128xf32>
    %59 = vector.extract_strided_slice %46 {offsets = [0, 256], sizes = [2, 128], strides = [1, 1]} : vector<2x512xf32> to vector<2x128xf32>
    %60 = math.tanh %59 : vector<2x128xf32>
    %61 = vector.extract_strided_slice %46 {offsets = [0, 384], sizes = [2, 128], strides = [1, 1]} : vector<2x512xf32> to vector<2x128xf32>
    %62 = arith.negf %61 : vector<2x128xf32>
    %63 = math.exp %62 : vector<2x128xf32>
    %cst_22 = arith.constant 1.000000e+00 : f32
    %64 = vector.broadcast %cst_22 : f32 to vector<2x128xf32>
    %65 = arith.addf %64, %63 : vector<2x128xf32>
    %66 = arith.divf %64, %65 : vector<2x128xf32>
    %67 = arith.mulf %58, %41 : vector<2x128xf32>
    %68 = arith.mulf %52, %60 : vector<2x128xf32>
    %69 = arith.addf %67, %68 : vector<2x128xf32>
    %70 = math.tanh %69 : vector<2x128xf32>
    %71 = arith.mulf %66, %70 : vector<2x128xf32>
    %72 = vector.extract_strided_slice %12 {offsets = [4, 0], sizes = [2, 512], strides = [1, 1]} : vector<16x512xf32> to vector<2x512xf32>
    %cst_23 = arith.constant dense<0.000000e+00> : vector<2x512xf32>
    %73 = tpu.matmul %71, %13, %cst_23 {dimension_numbers = #tpu.dot_dimension_numbers<[1], [0], [0], [1], [0, 0, 1, 1], [], []>} : vector<2x128xf32>, vector<128x512xf32>, vector<2x512xf32> -> vector<2x512xf32>
    %74 = arith.addf %72, %73 : vector<2x512xf32>
    %75 = vector.extract_strided_slice %74 {offsets = [0, 0], sizes = [2, 128], strides = [1, 1]} : vector<2x512xf32> to vector<2x128xf32>
    %76 = arith.negf %75 : vector<2x128xf32>
    %77 = math.exp %76 : vector<2x128xf32>
    %cst_24 = arith.constant 1.000000e+00 : f32
    %78 = vector.broadcast %cst_24 : f32 to vector<2x128xf32>
    %79 = arith.addf %78, %77 : vector<2x128xf32>
    %80 = arith.divf %78, %79 : vector<2x128xf32>
    %81 = vector.extract_strided_slice %74 {offsets = [0, 128], sizes = [2, 128], strides = [1, 1]} : vector<2x512xf32> to vector<2x128xf32>
    %82 = arith.negf %81 : vector<2x128xf32>
    %83 = math.exp %82 : vector<2x128xf32>
    %cst_25 = arith.constant 1.000000e+00 : f32
    %84 = vector.broadcast %cst_25 : f32 to vector<2x128xf32>
    %85 = arith.addf %84, %83 : vector<2x128xf32>
    %86 = arith.divf %84, %85 : vector<2x128xf32>
    %87 = vector.extract_strided_slice %74 {offsets = [0, 256], sizes = [2, 128], strides = [1, 1]} : vector<2x512xf32> to vector<2x128xf32>
    %88 = math.tanh %87 : vector<2x128xf32>
    %89 = vector.extract_strided_slice %74 {offsets = [0, 384], sizes = [2, 128], strides = [1, 1]} : vector<2x512xf32> to vector<2x128xf32>
    %90 = arith.negf %89 : vector<2x128xf32>
    %91 = math.exp %90 : vector<2x128xf32>
    %cst_26 = arith.constant 1.000000e+00 : f32
    %92 = vector.broadcast %cst_26 : f32 to vector<2x128xf32>
    %93 = arith.addf %92, %91 : vector<2x128xf32>
    %94 = arith.divf %92, %93 : vector<2x128xf32>
    %95 = arith.mulf %86, %69 : vector<2x128xf32>
    %96 = arith.mulf %80, %88 : vector<2x128xf32>
    %97 = arith.addf %95, %96 : vector<2x128xf32>
    %98 = math.tanh %97 : vector<2x128xf32>
    %99 = arith.mulf %94, %98 : vector<2x128xf32>
    %100 = vector.extract_strided_slice %12 {offsets = [6, 0], sizes = [2, 512], strides = [1, 1]} : vector<16x512xf32> to vector<2x512xf32>
    %cst_27 = arith.constant dense<0.000000e+00> : vector<2x512xf32>
    %101 = tpu.matmul %99, %13, %cst_27 {dimension_numbers = #tpu.dot_dimension_numbers<[1], [0], [0], [1], [0, 0, 1, 1], [], []>} : vector<2x128xf32>, vector<128x512xf32>, vector<2x512xf32> -> vector<2x512xf32>
    %102 = arith.addf %100, %101 : vector<2x512xf32>
    %103 = vector.extract_strided_slice %102 {offsets = [0, 0], sizes = [2, 128], strides = [1, 1]} : vector<2x512xf32> to vector<2x128xf32>
    %104 = arith.negf %103 : vector<2x128xf32>
    %105 = math.exp %104 : vector<2x128xf32>
    %cst_28 = arith.constant 1.000000e+00 : f32
    %106 = vector.broadcast %cst_28 : f32 to vector<2x128xf32>
    %107 = arith.addf %106, %105 : vector<2x128xf32>
    %108 = arith.divf %106, %107 : vector<2x128xf32>
    %109 = vector.extract_strided_slice %102 {offsets = [0, 128], sizes = [2, 128], strides = [1, 1]} : vector<2x512xf32> to vector<2x128xf32>
    %110 = arith.negf %109 : vector<2x128xf32>
    %111 = math.exp %110 : vector<2x128xf32>
    %cst_29 = arith.constant 1.000000e+00 : f32
    %112 = vector.broadcast %cst_29 : f32 to vector<2x128xf32>
    %113 = arith.addf %112, %111 : vector<2x128xf32>
    %114 = arith.divf %112, %113 : vector<2x128xf32>
    %115 = vector.extract_strided_slice %102 {offsets = [0, 256], sizes = [2, 128], strides = [1, 1]} : vector<2x512xf32> to vector<2x128xf32>
    %116 = math.tanh %115 : vector<2x128xf32>
    %117 = vector.extract_strided_slice %102 {offsets = [0, 384], sizes = [2, 128], strides = [1, 1]} : vector<2x512xf32> to vector<2x128xf32>
    %118 = arith.negf %117 : vector<2x128xf32>
    %119 = math.exp %118 : vector<2x128xf32>
    %cst_30 = arith.constant 1.000000e+00 : f32
    %120 = vector.broadcast %cst_30 : f32 to vector<2x128xf32>
    %121 = arith.addf %120, %119 : vector<2x128xf32>
    %122 = arith.divf %120, %121 : vector<2x128xf32>
    %123 = arith.mulf %114, %97 : vector<2x128xf32>
    %124 = arith.mulf %108, %116 : vector<2x128xf32>
    %125 = arith.addf %123, %124 : vector<2x128xf32>
    %126 = math.tanh %125 : vector<2x128xf32>
    %127 = arith.mulf %122, %126 : vector<2x128xf32>
    %128 = vector.extract_strided_slice %12 {offsets = [8, 0], sizes = [2, 512], strides = [1, 1]} : vector<16x512xf32> to vector<2x512xf32>
    %cst_31 = arith.constant dense<0.000000e+00> : vector<2x512xf32>
    %129 = tpu.matmul %127, %13, %cst_31 {dimension_numbers = #tpu.dot_dimension_numbers<[1], [0], [0], [1], [0, 0, 1, 1], [], []>} : vector<2x128xf32>, vector<128x512xf32>, vector<2x512xf32> -> vector<2x512xf32>
    %130 = arith.addf %128, %129 : vector<2x512xf32>
    %131 = vector.extract_strided_slice %130 {offsets = [0, 0], sizes = [2, 128], strides = [1, 1]} : vector<2x512xf32> to vector<2x128xf32>
    %132 = arith.negf %131 : vector<2x128xf32>
    %133 = math.exp %132 : vector<2x128xf32>
    %cst_32 = arith.constant 1.000000e+00 : f32
    %134 = vector.broadcast %cst_32 : f32 to vector<2x128xf32>
    %135 = arith.addf %134, %133 : vector<2x128xf32>
    %136 = arith.divf %134, %135 : vector<2x128xf32>
    %137 = vector.extract_strided_slice %130 {offsets = [0, 128], sizes = [2, 128], strides = [1, 1]} : vector<2x512xf32> to vector<2x128xf32>
    %138 = arith.negf %137 : vector<2x128xf32>
    %139 = math.exp %138 : vector<2x128xf32>
    %cst_33 = arith.constant 1.000000e+00 : f32
    %140 = vector.broadcast %cst_33 : f32 to vector<2x128xf32>
    %141 = arith.addf %140, %139 : vector<2x128xf32>
    %142 = arith.divf %140, %141 : vector<2x128xf32>
    %143 = vector.extract_strided_slice %130 {offsets = [0, 256], sizes = [2, 128], strides = [1, 1]} : vector<2x512xf32> to vector<2x128xf32>
    %144 = math.tanh %143 : vector<2x128xf32>
    %145 = vector.extract_strided_slice %130 {offsets = [0, 384], sizes = [2, 128], strides = [1, 1]} : vector<2x512xf32> to vector<2x128xf32>
    %146 = arith.negf %145 : vector<2x128xf32>
    %147 = math.exp %146 : vector<2x128xf32>
    %cst_34 = arith.constant 1.000000e+00 : f32
    %148 = vector.broadcast %cst_34 : f32 to vector<2x128xf32>
    %149 = arith.addf %148, %147 : vector<2x128xf32>
    %150 = arith.divf %148, %149 : vector<2x128xf32>
    %151 = arith.mulf %142, %125 : vector<2x128xf32>
    %152 = arith.mulf %136, %144 : vector<2x128xf32>
    %153 = arith.addf %151, %152 : vector<2x128xf32>
    %154 = math.tanh %153 : vector<2x128xf32>
    %155 = arith.mulf %150, %154 : vector<2x128xf32>
    %156 = vector.extract_strided_slice %12 {offsets = [10, 0], sizes = [2, 512], strides = [1, 1]} : vector<16x512xf32> to vector<2x512xf32>
    %cst_35 = arith.constant dense<0.000000e+00> : vector<2x512xf32>
    %157 = tpu.matmul %155, %13, %cst_35 {dimension_numbers = #tpu.dot_dimension_numbers<[1], [0], [0], [1], [0, 0, 1, 1], [], []>} : vector<2x128xf32>, vector<128x512xf32>, vector<2x512xf32> -> vector<2x512xf32>
    %158 = arith.addf %156, %157 : vector<2x512xf32>
    %159 = vector.extract_strided_slice %158 {offsets = [0, 0], sizes = [2, 128], strides = [1, 1]} : vector<2x512xf32> to vector<2x128xf32>
    %160 = arith.negf %159 : vector<2x128xf32>
    %161 = math.exp %160 : vector<2x128xf32>
    %cst_36 = arith.constant 1.000000e+00 : f32
    %162 = vector.broadcast %cst_36 : f32 to vector<2x128xf32>
    %163 = arith.addf %162, %161 : vector<2x128xf32>
    %164 = arith.divf %162, %163 : vector<2x128xf32>
    %165 = vector.extract_strided_slice %158 {offsets = [0, 128], sizes = [2, 128], strides = [1, 1]} : vector<2x512xf32> to vector<2x128xf32>
    %166 = arith.negf %165 : vector<2x128xf32>
    %167 = math.exp %166 : vector<2x128xf32>
    %cst_37 = arith.constant 1.000000e+00 : f32
    %168 = vector.broadcast %cst_37 : f32 to vector<2x128xf32>
    %169 = arith.addf %168, %167 : vector<2x128xf32>
    %170 = arith.divf %168, %169 : vector<2x128xf32>
    %171 = vector.extract_strided_slice %158 {offsets = [0, 256], sizes = [2, 128], strides = [1, 1]} : vector<2x512xf32> to vector<2x128xf32>
    %172 = math.tanh %171 : vector<2x128xf32>
    %173 = vector.extract_strided_slice %158 {offsets = [0, 384], sizes = [2, 128], strides = [1, 1]} : vector<2x512xf32> to vector<2x128xf32>
    %174 = arith.negf %173 : vector<2x128xf32>
    %175 = math.exp %174 : vector<2x128xf32>
    %cst_38 = arith.constant 1.000000e+00 : f32
    %176 = vector.broadcast %cst_38 : f32 to vector<2x128xf32>
    %177 = arith.addf %176, %175 : vector<2x128xf32>
    %178 = arith.divf %176, %177 : vector<2x128xf32>
    %179 = arith.mulf %170, %153 : vector<2x128xf32>
    %180 = arith.mulf %164, %172 : vector<2x128xf32>
    %181 = arith.addf %179, %180 : vector<2x128xf32>
    %182 = math.tanh %181 : vector<2x128xf32>
    %183 = arith.mulf %178, %182 : vector<2x128xf32>
    %184 = vector.extract_strided_slice %12 {offsets = [12, 0], sizes = [2, 512], strides = [1, 1]} : vector<16x512xf32> to vector<2x512xf32>
    %cst_39 = arith.constant dense<0.000000e+00> : vector<2x512xf32>
    %185 = tpu.matmul %183, %13, %cst_39 {dimension_numbers = #tpu.dot_dimension_numbers<[1], [0], [0], [1], [0, 0, 1, 1], [], []>} : vector<2x128xf32>, vector<128x512xf32>, vector<2x512xf32> -> vector<2x512xf32>
    %186 = arith.addf %184, %185 : vector<2x512xf32>
    %187 = vector.extract_strided_slice %186 {offsets = [0, 0], sizes = [2, 128], strides = [1, 1]} : vector<2x512xf32> to vector<2x128xf32>
    %188 = arith.negf %187 : vector<2x128xf32>
    %189 = math.exp %188 : vector<2x128xf32>
    %cst_40 = arith.constant 1.000000e+00 : f32
    %190 = vector.broadcast %cst_40 : f32 to vector<2x128xf32>
    %191 = arith.addf %190, %189 : vector<2x128xf32>
    %192 = arith.divf %190, %191 : vector<2x128xf32>
    %193 = vector.extract_strided_slice %186 {offsets = [0, 128], sizes = [2, 128], strides = [1, 1]} : vector<2x512xf32> to vector<2x128xf32>
    %194 = arith.negf %193 : vector<2x128xf32>
    %195 = math.exp %194 : vector<2x128xf32>
    %cst_41 = arith.constant 1.000000e+00 : f32
    %196 = vector.broadcast %cst_41 : f32 to vector<2x128xf32>
    %197 = arith.addf %196, %195 : vector<2x128xf32>
    %198 = arith.divf %196, %197 : vector<2x128xf32>
    %199 = vector.extract_strided_slice %186 {offsets = [0, 256], sizes = [2, 128], strides = [1, 1]} : vector<2x512xf32> to vector<2x128xf32>
    %200 = math.tanh %199 : vector<2x128xf32>
    %201 = vector.extract_strided_slice %186 {offsets = [0, 384], sizes = [2, 128], strides = [1, 1]} : vector<2x512xf32> to vector<2x128xf32>
    %202 = arith.negf %201 : vector<2x128xf32>
    %203 = math.exp %202 : vector<2x128xf32>
    %cst_42 = arith.constant 1.000000e+00 : f32
    %204 = vector.broadcast %cst_42 : f32 to vector<2x128xf32>
    %205 = arith.addf %204, %203 : vector<2x128xf32>
    %206 = arith.divf %204, %205 : vector<2x128xf32>
    %207 = arith.mulf %198, %181 : vector<2x128xf32>
    %208 = arith.mulf %192, %200 : vector<2x128xf32>
    %209 = arith.addf %207, %208 : vector<2x128xf32>
    %210 = math.tanh %209 : vector<2x128xf32>
    %211 = arith.mulf %206, %210 : vector<2x128xf32>
    %212 = vector.extract_strided_slice %12 {offsets = [14, 0], sizes = [2, 512], strides = [1, 1]} : vector<16x512xf32> to vector<2x512xf32>
    %cst_43 = arith.constant dense<0.000000e+00> : vector<2x512xf32>
    %213 = tpu.matmul %211, %13, %cst_43 {dimension_numbers = #tpu.dot_dimension_numbers<[1], [0], [0], [1], [0, 0, 1, 1], [], []>} : vector<2x128xf32>, vector<128x512xf32>, vector<2x512xf32> -> vector<2x512xf32>
    %214 = arith.addf %212, %213 : vector<2x512xf32>
    %215 = vector.extract_strided_slice %214 {offsets = [0, 0], sizes = [2, 128], strides = [1, 1]} : vector<2x512xf32> to vector<2x128xf32>
    %216 = arith.negf %215 : vector<2x128xf32>
    %217 = math.exp %216 : vector<2x128xf32>
    %cst_44 = arith.constant 1.000000e+00 : f32
    %218 = vector.broadcast %cst_44 : f32 to vector<2x128xf32>
    %219 = arith.addf %218, %217 : vector<2x128xf32>
    %220 = arith.divf %218, %219 : vector<2x128xf32>
    %221 = vector.extract_strided_slice %214 {offsets = [0, 128], sizes = [2, 128], strides = [1, 1]} : vector<2x512xf32> to vector<2x128xf32>
    %222 = arith.negf %221 : vector<2x128xf32>
    %223 = math.exp %222 : vector<2x128xf32>
    %cst_45 = arith.constant 1.000000e+00 : f32
    %224 = vector.broadcast %cst_45 : f32 to vector<2x128xf32>
    %225 = arith.addf %224, %223 : vector<2x128xf32>
    %226 = arith.divf %224, %225 : vector<2x128xf32>
    %227 = vector.extract_strided_slice %214 {offsets = [0, 256], sizes = [2, 128], strides = [1, 1]} : vector<2x512xf32> to vector<2x128xf32>
    %228 = math.tanh %227 : vector<2x128xf32>
    %229 = vector.extract_strided_slice %214 {offsets = [0, 384], sizes = [2, 128], strides = [1, 1]} : vector<2x512xf32> to vector<2x128xf32>
    %230 = arith.negf %229 : vector<2x128xf32>
    %231 = math.exp %230 : vector<2x128xf32>
    %cst_46 = arith.constant 1.000000e+00 : f32
    %232 = vector.broadcast %cst_46 : f32 to vector<2x128xf32>
    %233 = arith.addf %232, %231 : vector<2x128xf32>
    %234 = arith.divf %232, %233 : vector<2x128xf32>
    %235 = arith.mulf %226, %209 : vector<2x128xf32>
    %236 = arith.mulf %220, %228 : vector<2x128xf32>
    %237 = arith.addf %235, %236 : vector<2x128xf32>
    %238 = math.tanh %237 : vector<2x128xf32>
    %239 = arith.mulf %234, %238 : vector<2x128xf32>
    %c0_47 = arith.constant 0 : index
    %c0_48 = arith.constant 0 : index
    %240 = vector.load %arg8[%c0_47, %c0_48] : memref<128x16xf32, #tpu.memory_space<vmem>>, vector<128x16xf32>
    %cst_49 = arith.constant dense<0.000000e+00> : vector<2x16xf32>
    %241 = tpu.matmul %239, %240, %cst_49 {dimension_numbers = #tpu.dot_dimension_numbers<[1], [0], [0], [1], [0, 0, 1, 1], [], []>} : vector<2x128xf32>, vector<128x16xf32>, vector<2x16xf32> -> vector<2x16xf32>
    %c0_50 = arith.constant 0 : index
    %c0_51 = arith.constant 0 : index
    %242 = vector.load %arg9[%c0_50, %c0_51] : memref<1x16xf32, #tpu.memory_space<vmem>>, vector<1x16xf32>
    %243 = vector.broadcast %242 : vector<1x16xf32> to vector<2x16xf32>
    %244 = arith.addf %241, %243 : vector<2x16xf32>
    %cst_52 = arith.constant 0.000000e+00 : f32
    %245 = vector.broadcast %cst_52 : f32 to vector<2x16xf32>
    %246 = arith.maximumf %244, %245 : vector<2x16xf32>
    %c0_53 = arith.constant 0 : index
    %c0_54 = arith.constant 0 : index
    %247 = vector.load %arg10[%c0_53, %c0_54] : memref<16x128xf32, #tpu.memory_space<vmem>>, vector<16x128xf32>
    %cst_55 = arith.constant dense<0.000000e+00> : vector<2x128xf32>
    %248 = tpu.matmul %246, %247, %cst_55 {dimension_numbers = #tpu.dot_dimension_numbers<[1], [0], [0], [1], [0, 0, 1, 1], [], []>} : vector<2x16xf32>, vector<16x128xf32>, vector<2x128xf32> -> vector<2x128xf32>
    %c0_56 = arith.constant 0 : index
    %c0_57 = arith.constant 0 : index
    %249 = vector.load %arg11[%c0_56, %c0_57] : memref<1x128xf32, #tpu.memory_space<vmem>>, vector<1x128xf32>
    %250 = vector.broadcast %249 : vector<1x128xf32> to vector<2x128xf32>
    %251 = arith.addf %248, %250 : vector<2x128xf32>
    %c0_58 = arith.constant 0 : index
    %c0_59 = arith.constant 0 : index
    %252 = vector.load %arg21[%c0_58, %c0_59] : memref<2x128xf32, #tpu.memory_space<vmem>>, vector<2x128xf32>
    tpu.vector_store %arg21[%c0_58, %c0_59], %251 {strides = array<i32>} : memref<2x128xf32, #tpu.memory_space<vmem>>, vector<2x128xf32>,
    %253 = vector.extract_strided_slice %251 {offsets = [0, 0], sizes = [2, 16], strides = [1, 1]} : vector<2x128xf32> to vector<2x16xf32>
    %254 = vector.extract_strided_slice %251 {offsets = [0, 16], sizes = [2, 16], strides = [1, 1]} : vector<2x128xf32> to vector<2x16xf32>
    %cst_60 = arith.constant 5.000000e-01 : f32
    %255 = vector.broadcast %cst_60 : f32 to vector<2x16xf32>
    %256 = arith.mulf %255, %254 : vector<2x16xf32>
    %257 = math.exp %256 : vector<2x16xf32>
    %c0_61 = arith.constant 0 : index
    %c0_62 = arith.constant 0 : index
    %258 = vector.load %arg1[%c0_61, %c0_62] : memref<2x16xf32, #tpu.memory_space<vmem>>, vector<2x16xf32>
    %259 = arith.mulf %257, %258 : vector<2x16xf32>
    %260 = arith.addf %253, %259 : vector<2x16xf32>
    %c0_63 = arith.constant 0 : index
    %c0_64 = arith.constant 0 : index
    %261 = vector.load %arg12[%c0_63, %c0_64] : memref<14x128xf32, #tpu.memory_space<vmem>>, vector<14x128xf32>
    %cst_65 = arith.constant dense<0.000000e+00> : vector<16x128xf32>
    %262 = tpu.matmul %0, %261, %cst_65 {dimension_numbers = #tpu.dot_dimension_numbers<[1], [0], [0], [1], [0, 0, 1, 1], [], []>} : vector<16x14xf32>, vector<14x128xf32>, vector<16x128xf32> -> vector<16x128xf32>
    %c0_66 = arith.constant 0 : index
    %c0_67 = arith.constant 0 : index
    %263 = vector.load %arg13[%c0_66, %c0_67] : memref<1x128xf32, #tpu.memory_space<vmem>>, vector<1x128xf32>
    %264 = vector.broadcast %263 : vector<1x128xf32> to vector<16x128xf32>
    %265 = arith.addf %262, %264 : vector<16x128xf32>
    %c0_68 = arith.constant 0 : index
    %c0_69 = arith.constant 0 : index
    %266 = vector.load %arg16[%c0_68, %c0_69] : memref<128x512xf32, #tpu.memory_space<vmem>>, vector<128x512xf32>
    %cst_70 = arith.constant dense<0.000000e+00> : vector<16x512xf32>
    %267 = tpu.matmul %265, %266, %cst_70 {dimension_numbers = #tpu.dot_dimension_numbers<[1], [0], [0], [1], [0, 0, 1, 1], [], []>} : vector<16x128xf32>, vector<128x512xf32>, vector<16x512xf32> -> vector<16x512xf32>
    %c0_71 = arith.constant 0 : index
    %c0_72 = arith.constant 0 : index
    %268 = vector.load %arg18[%c0_71, %c0_72] : memref<1x512xf32, #tpu.memory_space<vmem>>, vector<1x512xf32>
    %269 = vector.broadcast %268 : vector<1x512xf32> to vector<16x512xf32>
    %270 = arith.addf %267, %269 : vector<16x512xf32>
    %c0_73 = arith.constant 0 : index
    %c0_74 = arith.constant 0 : index
    %271 = vector.load %arg17[%c0_73, %c0_74] : memref<128x512xf32, #tpu.memory_space<vmem>>, vector<128x512xf32>
    %c0_75 = arith.constant 0 : index
    %c0_76 = arith.constant 0 : index
    %272 = vector.load %arg2[%c0_75, %c0_76] : memref<1x512xf32, #tpu.memory_space<vmem>>, vector<1x512xf32>
    %c0_77 = arith.constant 0 : index
    %c0_78 = arith.constant 0 : index
    %273 = vector.load %arg14[%c0_77, %c0_78] : memref<16x128xf32, #tpu.memory_space<vmem>>, vector<16x128xf32>
    %cst_79 = arith.constant dense<0.000000e+00> : vector<2x128xf32>
    %274 = tpu.matmul %260, %273, %cst_79 {dimension_numbers = #tpu.dot_dimension_numbers<[1], [0], [0], [1], [0, 0, 1, 1], [], []>} : vector<2x16xf32>, vector<16x128xf32>, vector<2x128xf32> -> vector<2x128xf32>
    %c0_80 = arith.constant 0 : index
    %c0_81 = arith.constant 0 : index
    %275 = vector.load %arg15[%c0_80, %c0_81] : memref<1x128xf32, #tpu.memory_space<vmem>>, vector<1x128xf32>
    %276 = vector.broadcast %275 : vector<1x128xf32> to vector<2x128xf32>
    %277 = arith.addf %274, %276 : vector<2x128xf32>
    %cst_82 = arith.constant 0.000000e+00 : f32
    %278 = vector.broadcast %cst_82 : f32 to vector<2x128xf32>
    %cst_83 = arith.constant dense<0.000000e+00> : vector<2x512xf32>
    %279 = tpu.matmul %277, %271, %cst_83 {dimension_numbers = #tpu.dot_dimension_numbers<[1], [0], [0], [1], [0, 0, 1, 1], [], []>} : vector<2x128xf32>, vector<128x512xf32>, vector<2x512xf32> -> vector<2x512xf32>
    %280 = vector.broadcast %272 : vector<1x512xf32> to vector<2x512xf32>
    %281 = arith.addf %280, %279 : vector<2x512xf32>
    %282 = vector.extract_strided_slice %281 {offsets = [0, 0], sizes = [2, 128], strides = [1, 1]} : vector<2x512xf32> to vector<2x128xf32>
    %283 = arith.negf %282 : vector<2x128xf32>
    %284 = math.exp %283 : vector<2x128xf32>
    %cst_84 = arith.constant 1.000000e+00 : f32
    %285 = vector.broadcast %cst_84 : f32 to vector<2x128xf32>
    %286 = arith.addf %285, %284 : vector<2x128xf32>
    %287 = arith.divf %285, %286 : vector<2x128xf32>
    %288 = vector.extract_strided_slice %281 {offsets = [0, 128], sizes = [2, 128], strides = [1, 1]} : vector<2x512xf32> to vector<2x128xf32>
    %289 = arith.negf %288 : vector<2x128xf32>
    %290 = math.exp %289 : vector<2x128xf32>
    %cst_85 = arith.constant 1.000000e+00 : f32
    %291 = vector.broadcast %cst_85 : f32 to vector<2x128xf32>
    %292 = arith.addf %291, %290 : vector<2x128xf32>
    %293 = arith.divf %291, %292 : vector<2x128xf32>
    %294 = vector.extract_strided_slice %281 {offsets = [0, 256], sizes = [2, 128], strides = [1, 1]} : vector<2x512xf32> to vector<2x128xf32>
    %295 = math.tanh %294 : vector<2x128xf32>
    %296 = vector.extract_strided_slice %281 {offsets = [0, 384], sizes = [2, 128], strides = [1, 1]} : vector<2x512xf32> to vector<2x128xf32>
    %297 = arith.negf %296 : vector<2x128xf32>
    %298 = math.exp %297 : vector<2x128xf32>
    %cst_86 = arith.constant 1.000000e+00 : f32
    %299 = vector.broadcast %cst_86 : f32 to vector<2x128xf32>
    %300 = arith.addf %299, %298 : vector<2x128xf32>
    %301 = arith.divf %299, %300 : vector<2x128xf32>
    %302 = arith.mulf %293, %278 : vector<2x128xf32>
    %303 = arith.mulf %287, %295 : vector<2x128xf32>
    %304 = arith.addf %302, %303 : vector<2x128xf32>
    %305 = math.tanh %304 : vector<2x128xf32>
    %306 = arith.mulf %301, %305 : vector<2x128xf32>
    %307 = vector.extract_strided_slice %270 {offsets = [14, 0], sizes = [2, 512], strides = [1, 1]} : vector<16x512xf32> to vector<2x512xf32>
    %cst_87 = arith.constant dense<0.000000e+00> : vector<2x512xf32>
    %308 = tpu.matmul %306, %271, %cst_87 {dimension_numbers = #tpu.dot_dimension_numbers<[1], [0], [0], [1], [0, 0, 1, 1], [], []>} : vector<2x128xf32>, vector<128x512xf32>, vector<2x512xf32> -> vector<2x512xf32>
    %309 = arith.addf %307, %308 : vector<2x512xf32>
    %310 = vector.extract_strided_slice %309 {offsets = [0, 0], sizes = [2, 128], strides = [1, 1]} : vector<2x512xf32> to vector<2x128xf32>
    %311 = arith.negf %310 : vector<2x128xf32>
    %312 = math.exp %311 : vector<2x128xf32>
    %cst_88 = arith.constant 1.000000e+00 : f32
    %313 = vector.broadcast %cst_88 : f32 to vector<2x128xf32>
    %314 = arith.addf %313, %312 : vector<2x128xf32>
    %315 = arith.divf %313, %314 : vector<2x128xf32>
    %316 = vector.extract_strided_slice %309 {offsets = [0, 128], sizes = [2, 128], strides = [1, 1]} : vector<2x512xf32> to vector<2x128xf32>
    %317 = arith.negf %316 : vector<2x128xf32>
    %318 = math.exp %317 : vector<2x128xf32>
    %cst_89 = arith.constant 1.000000e+00 : f32
    %319 = vector.broadcast %cst_89 : f32 to vector<2x128xf32>
    %320 = arith.addf %319, %318 : vector<2x128xf32>
    %321 = arith.divf %319, %320 : vector<2x128xf32>
    %322 = vector.extract_strided_slice %309 {offsets = [0, 256], sizes = [2, 128], strides = [1, 1]} : vector<2x512xf32> to vector<2x128xf32>
    %323 = math.tanh %322 : vector<2x128xf32>
    %324 = vector.extract_strided_slice %309 {offsets = [0, 384], sizes = [2, 128], strides = [1, 1]} : vector<2x512xf32> to vector<2x128xf32>
    %325 = arith.negf %324 : vector<2x128xf32>
    %326 = math.exp %325 : vector<2x128xf32>
    %cst_90 = arith.constant 1.000000e+00 : f32
    %327 = vector.broadcast %cst_90 : f32 to vector<2x128xf32>
    %328 = arith.addf %327, %326 : vector<2x128xf32>
    %329 = arith.divf %327, %328 : vector<2x128xf32>
    %330 = arith.mulf %321, %304 : vector<2x128xf32>
    %331 = arith.mulf %315, %323 : vector<2x128xf32>
    %332 = arith.addf %330, %331 : vector<2x128xf32>
    %333 = math.tanh %332 : vector<2x128xf32>
    %334 = arith.mulf %329, %333 : vector<2x128xf32>
    %335 = vector.extract_strided_slice %270 {offsets = [12, 0], sizes = [2, 512], strides = [1, 1]} : vector<16x512xf32> to vector<2x512xf32>
    %cst_91 = arith.constant dense<0.000000e+00> : vector<2x512xf32>
    %336 = tpu.matmul %334, %271, %cst_91 {dimension_numbers = #tpu.dot_dimension_numbers<[1], [0], [0], [1], [0, 0, 1, 1], [], []>} : vector<2x128xf32>, vector<128x512xf32>, vector<2x512xf32> -> vector<2x512xf32>
    %337 = arith.addf %335, %336 : vector<2x512xf32>
    %338 = vector.extract_strided_slice %337 {offsets = [0, 0], sizes = [2, 128], strides = [1, 1]} : vector<2x512xf32> to vector<2x128xf32>
    %339 = arith.negf %338 : vector<2x128xf32>
    %340 = math.exp %339 : vector<2x128xf32>
    %cst_92 = arith.constant 1.000000e+00 : f32
    %341 = vector.broadcast %cst_92 : f32 to vector<2x128xf32>
    %342 = arith.addf %341, %340 : vector<2x128xf32>
    %343 = arith.divf %341, %342 : vector<2x128xf32>
    %344 = vector.extract_strided_slice %337 {offsets = [0, 128], sizes = [2, 128], strides = [1, 1]} : vector<2x512xf32> to vector<2x128xf32>
    %345 = arith.negf %344 : vector<2x128xf32>
    %346 = math.exp %345 : vector<2x128xf32>
    %cst_93 = arith.constant 1.000000e+00 : f32
    %347 = vector.broadcast %cst_93 : f32 to vector<2x128xf32>
    %348 = arith.addf %347, %346 : vector<2x128xf32>
    %349 = arith.divf %347, %348 : vector<2x128xf32>
    %350 = vector.extract_strided_slice %337 {offsets = [0, 256], sizes = [2, 128], strides = [1, 1]} : vector<2x512xf32> to vector<2x128xf32>
    %351 = math.tanh %350 : vector<2x128xf32>
    %352 = vector.extract_strided_slice %337 {offsets = [0, 384], sizes = [2, 128], strides = [1, 1]} : vector<2x512xf32> to vector<2x128xf32>
    %353 = arith.negf %352 : vector<2x128xf32>
    %354 = math.exp %353 : vector<2x128xf32>
    %cst_94 = arith.constant 1.000000e+00 : f32
    %355 = vector.broadcast %cst_94 : f32 to vector<2x128xf32>
    %356 = arith.addf %355, %354 : vector<2x128xf32>
    %357 = arith.divf %355, %356 : vector<2x128xf32>
    %358 = arith.mulf %349, %332 : vector<2x128xf32>
    %359 = arith.mulf %343, %351 : vector<2x128xf32>
    %360 = arith.addf %358, %359 : vector<2x128xf32>
    %361 = math.tanh %360 : vector<2x128xf32>
    %362 = arith.mulf %357, %361 : vector<2x128xf32>
    %363 = vector.extract_strided_slice %270 {offsets = [10, 0], sizes = [2, 512], strides = [1, 1]} : vector<16x512xf32> to vector<2x512xf32>
    %cst_95 = arith.constant dense<0.000000e+00> : vector<2x512xf32>
    %364 = tpu.matmul %362, %271, %cst_95 {dimension_numbers = #tpu.dot_dimension_numbers<[1], [0], [0], [1], [0, 0, 1, 1], [], []>} : vector<2x128xf32>, vector<128x512xf32>, vector<2x512xf32> -> vector<2x512xf32>
    %365 = arith.addf %363, %364 : vector<2x512xf32>
    %366 = vector.extract_strided_slice %365 {offsets = [0, 0], sizes = [2, 128], strides = [1, 1]} : vector<2x512xf32> to vector<2x128xf32>
    %367 = arith.negf %366 : vector<2x128xf32>
    %368 = math.exp %367 : vector<2x128xf32>
    %cst_96 = arith.constant 1.000000e+00 : f32
    %369 = vector.broadcast %cst_96 : f32 to vector<2x128xf32>
    %370 = arith.addf %369, %368 : vector<2x128xf32>
    %371 = arith.divf %369, %370 : vector<2x128xf32>
    %372 = vector.extract_strided_slice %365 {offsets = [0, 128], sizes = [2, 128], strides = [1, 1]} : vector<2x512xf32> to vector<2x128xf32>
    %373 = arith.negf %372 : vector<2x128xf32>
    %374 = math.exp %373 : vector<2x128xf32>
    %cst_97 = arith.constant 1.000000e+00 : f32
    %375 = vector.broadcast %cst_97 : f32 to vector<2x128xf32>
    %376 = arith.addf %375, %374 : vector<2x128xf32>
    %377 = arith.divf %375, %376 : vector<2x128xf32>
    %378 = vector.extract_strided_slice %365 {offsets = [0, 256], sizes = [2, 128], strides = [1, 1]} : vector<2x512xf32> to vector<2x128xf32>
    %379 = math.tanh %378 : vector<2x128xf32>
    %380 = vector.extract_strided_slice %365 {offsets = [0, 384], sizes = [2, 128], strides = [1, 1]} : vector<2x512xf32> to vector<2x128xf32>
    %381 = arith.negf %380 : vector<2x128xf32>
    %382 = math.exp %381 : vector<2x128xf32>
    %cst_98 = arith.constant 1.000000e+00 : f32
    %383 = vector.broadcast %cst_98 : f32 to vector<2x128xf32>
    %384 = arith.addf %383, %382 : vector<2x128xf32>
    %385 = arith.divf %383, %384 : vector<2x128xf32>
    %386 = arith.mulf %377, %360 : vector<2x128xf32>
    %387 = arith.mulf %371, %379 : vector<2x128xf32>
    %388 = arith.addf %386, %387 : vector<2x128xf32>
    %389 = math.tanh %388 : vector<2x128xf32>
    %390 = arith.mulf %385, %389 : vector<2x128xf32>
    %391 = vector.extract_strided_slice %270 {offsets = [8, 0], sizes = [2, 512], strides = [1, 1]} : vector<16x512xf32> to vector<2x512xf32>
    %cst_99 = arith.constant dense<0.000000e+00> : vector<2x512xf32>
    %392 = tpu.matmul %390, %271, %cst_99 {dimension_numbers = #tpu.dot_dimension_numbers<[1], [0], [0], [1], [0, 0, 1, 1], [], []>} : vector<2x128xf32>, vector<128x512xf32>, vector<2x512xf32> -> vector<2x512xf32>
    %393 = arith.addf %391, %392 : vector<2x512xf32>
    %394 = vector.extract_strided_slice %393 {offsets = [0, 0], sizes = [2, 128], strides = [1, 1]} : vector<2x512xf32> to vector<2x128xf32>
    %395 = arith.negf %394 : vector<2x128xf32>
    %396 = math.exp %395 : vector<2x128xf32>
    %cst_100 = arith.constant 1.000000e+00 : f32
    %397 = vector.broadcast %cst_100 : f32 to vector<2x128xf32>
    %398 = arith.addf %397, %396 : vector<2x128xf32>
    %399 = arith.divf %397, %398 : vector<2x128xf32>
    %400 = vector.extract_strided_slice %393 {offsets = [0, 128], sizes = [2, 128], strides = [1, 1]} : vector<2x512xf32> to vector<2x128xf32>
    %401 = arith.negf %400 : vector<2x128xf32>
    %402 = math.exp %401 : vector<2x128xf32>
    %cst_101 = arith.constant 1.000000e+00 : f32
    %403 = vector.broadcast %cst_101 : f32 to vector<2x128xf32>
    %404 = arith.addf %403, %402 : vector<2x128xf32>
    %405 = arith.divf %403, %404 : vector<2x128xf32>
    %406 = vector.extract_strided_slice %393 {offsets = [0, 256], sizes = [2, 128], strides = [1, 1]} : vector<2x512xf32> to vector<2x128xf32>
    %407 = math.tanh %406 : vector<2x128xf32>
    %408 = vector.extract_strided_slice %393 {offsets = [0, 384], sizes = [2, 128], strides = [1, 1]} : vector<2x512xf32> to vector<2x128xf32>
    %409 = arith.negf %408 : vector<2x128xf32>
    %410 = math.exp %409 : vector<2x128xf32>
    %cst_102 = arith.constant 1.000000e+00 : f32
    %411 = vector.broadcast %cst_102 : f32 to vector<2x128xf32>
    %412 = arith.addf %411, %410 : vector<2x128xf32>
    %413 = arith.divf %411, %412 : vector<2x128xf32>
    %414 = arith.mulf %405, %388 : vector<2x128xf32>
    %415 = arith.mulf %399, %407 : vector<2x128xf32>
    %416 = arith.addf %414, %415 : vector<2x128xf32>
    %417 = math.tanh %416 : vector<2x128xf32>
    %418 = arith.mulf %413, %417 : vector<2x128xf32>
    %419 = vector.extract_strided_slice %270 {offsets = [6, 0], sizes = [2, 512], strides = [1, 1]} : vector<16x512xf32> to vector<2x512xf32>
    %cst_103 = arith.constant dense<0.000000e+00> : vector<2x512xf32>
    %420 = tpu.matmul %418, %271, %cst_103 {dimension_numbers = #tpu.dot_dimension_numbers<[1], [0], [0], [1], [0, 0, 1, 1], [], []>} : vector<2x128xf32>, vector<128x512xf32>, vector<2x512xf32> -> vector<2x512xf32>
    %421 = arith.addf %419, %420 : vector<2x512xf32>
    %422 = vector.extract_strided_slice %421 {offsets = [0, 0], sizes = [2, 128], strides = [1, 1]} : vector<2x512xf32> to vector<2x128xf32>
    %423 = arith.negf %422 : vector<2x128xf32>
    %424 = math.exp %423 : vector<2x128xf32>
    %cst_104 = arith.constant 1.000000e+00 : f32
    %425 = vector.broadcast %cst_104 : f32 to vector<2x128xf32>
    %426 = arith.addf %425, %424 : vector<2x128xf32>
    %427 = arith.divf %425, %426 : vector<2x128xf32>
    %428 = vector.extract_strided_slice %421 {offsets = [0, 128], sizes = [2, 128], strides = [1, 1]} : vector<2x512xf32> to vector<2x128xf32>
    %429 = arith.negf %428 : vector<2x128xf32>
    %430 = math.exp %429 : vector<2x128xf32>
    %cst_105 = arith.constant 1.000000e+00 : f32
    %431 = vector.broadcast %cst_105 : f32 to vector<2x128xf32>
    %432 = arith.addf %431, %430 : vector<2x128xf32>
    %433 = arith.divf %431, %432 : vector<2x128xf32>
    %434 = vector.extract_strided_slice %421 {offsets = [0, 256], sizes = [2, 128], strides = [1, 1]} : vector<2x512xf32> to vector<2x128xf32>
    %435 = math.tanh %434 : vector<2x128xf32>
    %436 = vector.extract_strided_slice %421 {offsets = [0, 384], sizes = [2, 128], strides = [1, 1]} : vector<2x512xf32> to vector<2x128xf32>
    %437 = arith.negf %436 : vector<2x128xf32>
    %438 = math.exp %437 : vector<2x128xf32>
    %cst_106 = arith.constant 1.000000e+00 : f32
    %439 = vector.broadcast %cst_106 : f32 to vector<2x128xf32>
    %440 = arith.addf %439, %438 : vector<2x128xf32>
    %441 = arith.divf %439, %440 : vector<2x128xf32>
    %442 = arith.mulf %433, %416 : vector<2x128xf32>
    %443 = arith.mulf %427, %435 : vector<2x128xf32>
    %444 = arith.addf %442, %443 : vector<2x128xf32>
    %445 = math.tanh %444 : vector<2x128xf32>
    %446 = arith.mulf %441, %445 : vector<2x128xf32>
    %447 = vector.extract_strided_slice %270 {offsets = [4, 0], sizes = [2, 512], strides = [1, 1]} : vector<16x512xf32> to vector<2x512xf32>
    %cst_107 = arith.constant dense<0.000000e+00> : vector<2x512xf32>
    %448 = tpu.matmul %446, %271, %cst_107 {dimension_numbers = #tpu.dot_dimension_numbers<[1], [0], [0], [1], [0, 0, 1, 1], [], []>} : vector<2x128xf32>, vector<128x512xf32>, vector<2x512xf32> -> vector<2x512xf32>
    %449 = arith.addf %447, %448 : vector<2x512xf32>
    %450 = vector.extract_strided_slice %449 {offsets = [0, 0], sizes = [2, 128], strides = [1, 1]} : vector<2x512xf32> to vector<2x128xf32>
    %451 = arith.negf %450 : vector<2x128xf32>
    %452 = math.exp %451 : vector<2x128xf32>
    %cst_108 = arith.constant 1.000000e+00 : f32
    %453 = vector.broadcast %cst_108 : f32 to vector<2x128xf32>
    %454 = arith.addf %453, %452 : vector<2x128xf32>
    %455 = arith.divf %453, %454 : vector<2x128xf32>
    %456 = vector.extract_strided_slice %449 {offsets = [0, 128], sizes = [2, 128], strides = [1, 1]} : vector<2x512xf32> to vector<2x128xf32>
    %457 = arith.negf %456 : vector<2x128xf32>
    %458 = math.exp %457 : vector<2x128xf32>
    %cst_109 = arith.constant 1.000000e+00 : f32
    %459 = vector.broadcast %cst_109 : f32 to vector<2x128xf32>
    %460 = arith.addf %459, %458 : vector<2x128xf32>
    %461 = arith.divf %459, %460 : vector<2x128xf32>
    %462 = vector.extract_strided_slice %449 {offsets = [0, 256], sizes = [2, 128], strides = [1, 1]} : vector<2x512xf32> to vector<2x128xf32>
    %463 = math.tanh %462 : vector<2x128xf32>
    %464 = vector.extract_strided_slice %449 {offsets = [0, 384], sizes = [2, 128], strides = [1, 1]} : vector<2x512xf32> to vector<2x128xf32>
    %465 = arith.negf %464 : vector<2x128xf32>
    %466 = math.exp %465 : vector<2x128xf32>
    %cst_110 = arith.constant 1.000000e+00 : f32
    %467 = vector.broadcast %cst_110 : f32 to vector<2x128xf32>
    %468 = arith.addf %467, %466 : vector<2x128xf32>
    %469 = arith.divf %467, %468 : vector<2x128xf32>
    %470 = arith.mulf %461, %444 : vector<2x128xf32>
    %471 = arith.mulf %455, %463 : vector<2x128xf32>
    %472 = arith.addf %470, %471 : vector<2x128xf32>
    %473 = math.tanh %472 : vector<2x128xf32>
    %474 = arith.mulf %469, %473 : vector<2x128xf32>
    %475 = vector.extract_strided_slice %270 {offsets = [2, 0], sizes = [2, 512], strides = [1, 1]} : vector<16x512xf32> to vector<2x512xf32>
    %cst_111 = arith.constant dense<0.000000e+00> : vector<2x512xf32>
    %476 = tpu.matmul %474, %271, %cst_111 {dimension_numbers = #tpu.dot_dimension_numbers<[1], [0], [0], [1], [0, 0, 1, 1], [], []>} : vector<2x128xf32>, vector<128x512xf32>, vector<2x512xf32> -> vector<2x512xf32>
    %477 = arith.addf %475, %476 : vector<2x512xf32>
    %478 = vector.extract_strided_slice %477 {offsets = [0, 0], sizes = [2, 128], strides = [1, 1]} : vector<2x512xf32> to vector<2x128xf32>
    %479 = arith.negf %478 : vector<2x128xf32>
    %480 = math.exp %479 : vector<2x128xf32>
    %cst_112 = arith.constant 1.000000e+00 : f32
    %481 = vector.broadcast %cst_112 : f32 to vector<2x128xf32>
    %482 = arith.addf %481, %480 : vector<2x128xf32>
    %483 = arith.divf %481, %482 : vector<2x128xf32>
    %484 = vector.extract_strided_slice %477 {offsets = [0, 128], sizes = [2, 128], strides = [1, 1]} : vector<2x512xf32> to vector<2x128xf32>
    %485 = arith.negf %484 : vector<2x128xf32>
    %486 = math.exp %485 : vector<2x128xf32>
    %cst_113 = arith.constant 1.000000e+00 : f32
    %487 = vector.broadcast %cst_113 : f32 to vector<2x128xf32>
    %488 = arith.addf %487, %486 : vector<2x128xf32>
    %489 = arith.divf %487, %488 : vector<2x128xf32>
    %490 = vector.extract_strided_slice %477 {offsets = [0, 256], sizes = [2, 128], strides = [1, 1]} : vector<2x512xf32> to vector<2x128xf32>
    %491 = math.tanh %490 : vector<2x128xf32>
    %492 = vector.extract_strided_slice %477 {offsets = [0, 384], sizes = [2, 128], strides = [1, 1]} : vector<2x512xf32> to vector<2x128xf32>
    %493 = arith.negf %492 : vector<2x128xf32>
    %494 = math.exp %493 : vector<2x128xf32>
    %cst_114 = arith.constant 1.000000e+00 : f32
    %495 = vector.broadcast %cst_114 : f32 to vector<2x128xf32>
    %496 = arith.addf %495, %494 : vector<2x128xf32>
    %497 = arith.divf %495, %496 : vector<2x128xf32>
    %498 = arith.mulf %489, %472 : vector<2x128xf32>
    %499 = arith.mulf %483, %491 : vector<2x128xf32>
    %500 = arith.addf %498, %499 : vector<2x128xf32>
    %501 = math.tanh %500 : vector<2x128xf32>
    %502 = arith.mulf %497, %501 : vector<2x128xf32>
    %503 = tpu.concatenate %502, %474, %446, %418, %390, %362, %334, %306 in 0 : vector<2x128xf32>, vector<2x128xf32>, vector<2x128xf32>, vector<2x128xf32>, vector<2x128xf32>, vector<2x128xf32>, vector<2x128xf32>, vector<2x128xf32> -> vector<16x128xf32>
    %c0_115 = arith.constant 0 : index
    %c0_116 = arith.constant 0 : index
    %504 = vector.load %arg19[%c0_115, %c0_116] : memref<128x128xf32, #tpu.memory_space<vmem>>, vector<128x128xf32>
    %cst_117 = arith.constant dense<0.000000e+00> : vector<16x128xf32>
    %505 = tpu.matmul %503, %504, %cst_117 {dimension_numbers = #tpu.dot_dimension_numbers<[1], [0], [0], [1], [0, 0, 1, 1], [], []>} : vector<16x128xf32>, vector<128x128xf32>, vector<16x128xf32> -> vector<16x128xf32>
    %c0_118 = arith.constant 0 : index
    %c0_119 = arith.constant 0 : index
    %506 = vector.load %arg20[%c0_118, %c0_119] : memref<1x128xf32, #tpu.memory_space<vmem>>, vector<1x128xf32>
    %507 = vector.broadcast %506 : vector<1x128xf32> to vector<16x128xf32>
    %508 = arith.addf %505, %507 : vector<16x128xf32>
    %509 = tpu.iota {dimensions = array<i32: 1>} : vector<16x128xi32>
    %c8_i32 = arith.constant 8 : i32
    %510 = vector.broadcast %c8_i32 : i32 to vector<16x128xi32>
    %511 = arith.cmpi slt, %509, %510 : vector<16x128xi32>
    %cst_120 = arith.constant 2.000000e+01 : f32
    %512 = vector.broadcast %cst_120 : f32 to vector<16x128xf32>
    %513 = arith.cmpf ogt, %508, %512 : vector<16x128xf32>
    %cst_121 = arith.constant 2.000000e+01 : f32
    %514 = vector.broadcast %cst_121 : f32 to vector<16x128xf32>
    %515 = arith.minimumf %508, %514 : vector<16x128xf32>
    %516 = math.exp %515 : vector<16x128xf32>
    %517 = math.log1p %516 : vector<16x128xf32>
    %518 = arith.select %513, %508, %517 : vector<16x128xi1>, vector<16x128xf32>
    %519 = arith.select %511, %518, %508 : vector<16x128xi1>, vector<16x128xf32>
    %c0_122 = arith.constant 0 : index
    %c0_123 = arith.constant 0 : index
    %520 = vector.load %arg22[%c0_122, %c0_123] : memref<16x128xf32, #tpu.memory_space<vmem>>, vector<16x128xf32>
    tpu.vector_store %arg22[%c0_122, %c0_123], %519 {strides = array<i32>} : memref<16x128xf32, #tpu.memory_space<vmem>>, vector<16x128xf32>,
    return
  }
}

</mosaic_0001>

<bundles_post_ra>
// kernel: vae_forward.1
= control target key start
LH: loop header
LB: loop body
LE: loop exit
PB: predicated region body
PF: predicated region fallthrough
CT: control target
= control target key end

     0   :  { %s7196_s0 = inlined_call_operand.vmem [shape: f32[16,14], index: 0, kind: input, shape index: {}]   ;;  %s7197_s1 = inlined_call_operand.vmem [shape: f32[2,16], index: 1, kind: input, shape index: {}]   ;;  %s7198_s2 = inlined_call_operand.vmem [shape: f32[1,512], index: 2, kind: input, shape index: {}]   ;;  %s7199_s3 = inlined_call_operand.vmem [shape: f32[14,128], index: 3, kind: input, shape index: {}]   ;;  %s7200_s4 = inlined_call_operand.vmem [shape: f32[1,128], index: 4, kind: input, shape index: {}]   ;;  %s7201_s5 = inlined_call_operand.hbm [shape: f32[128,512], index: 5, kind: input, shape index: {}]   ;;  %s7202_s6 = inlined_call_operand.hbm [shape: f32[128,512], index: 6, kind: input, shape index: {}]   ;;  %s7203_s7 = inlined_call_operand.vmem [shape: f32[1,512], index: 7, kind: input, shape index: {}]   ;;  %s7204_s8 = inlined_call_operand.vmem [shape: f32[128,16], index: 8, kind: input, shape index: {}]   ;;  %s7205_s9 = inlined_call_operand.vmem [shape: f32[1,16], index: 9, kind: input, shape index: {}]   ;;  %s7206_s10 = inlined_call_operand.vmem [shape: f32[16,128], index: 10, kind: input, shape index: {}]   ;;  %s7207_s11 = inlined_call_operand.vmem [shape: f32[1,128], index: 11, kind: input, shape index: {}]   ;;  %s7208_s12 = inlined_call_operand.vmem [shape: f32[14,128], index: 12, kind: input, shape index: {}]   ;;  %s7209_s13 = inlined_call_operand.vmem [shape: f32[1,128], index: 13, kind: input, shape index: {}]   ;;  %s7210_s14 = inlined_call_operand.vmem [shape: f32[16,128], index: 14, kind: input, shape index: {}]   ;;  %s7211_s15 = inlined_call_operand.vmem [shape: f32[1,128], index: 15, kind: input, shape index: {}]   ;;  %s7212_s16 = inlined_call_operand.hbm [shape: f32[128,512], index: 16, kind: input, shape index: {}]   ;;  %s7213_s17 = inlined_call_operand.hbm [shape: f32[128,512], index: 17, kind: input, shape index: {}]   ;;  %s7214_s18 = inlined_call_operand.vmem [shape: f32[1,512], index: 18, kind: input, shape index: {}]   ;;  %s7215_s19 = inlined_call_operand.vmem [shape: f32[128,128], index: 19, kind: input, shape index: {}]   ;;  %s7216_s20 = inlined_call_operand.vmem [shape: f32[1,128], index: 20, kind: input, shape index: {}]   ;;  %s7217_s21 = inlined_call_operand.vmem [shape: f32[2,128], index: 21, kind: output, shape index: {0}]   ;;  %s7218_s22 = inlined_call_operand.vmem [shape: f32[16,128], index: 22, kind: output, shape index: {1}]  }
   0x1   :  { %7430 = sst [smem:[#allocation48_spill]] %s7196_s0 }
   0x2   :  { %7431 = sst [smem:[#allocation49_spill]] %s7197_s1 }
   0x3   :  { %7432 = sst [smem:[#allocation50_spill]] %s7198_s2 }
   0x4   :  { %7433 = sst [smem:[#allocation51_spill]] %s7199_s3 }
   0x5   :  { %7434 = sst [smem:[#allocation52_spill]] %s7200_s4 }
   0x6   :  { %7435 = sst [smem:[#allocation53_spill]] %s7201_s5 }
   0x7   :  { %7436 = sst [smem:[#allocation54_spill]] %s7202_s6 }
   0x8   :  { %28 = vsyncpa [#allocation3], 0 }
   0x9   :  { %29 = vsyncpa [#allocation5], 0 }
   0xa   :  { %30 = vsyncpa [#allocation8], 0  ;;  %s5024_s3 = smov [#allocation4]   ;;  %s5025_s29 = smov [#allocation2]  }
   0xb   :  { %s58_s28 = sshll.u32 %s5024_s3, 4  ;;  %s46_s30 = sshll.u32 %s5025_s29, 4  ;;  %s59_s28 = int_to_ptr.vmem [resolvable:$true] %s58_s28  ;;  %s47_s30 = int_to_ptr.vmem [resolvable:$true] %s46_s30 }
   0xc   :  { %s4946_s4 = scalar_lea.vmem %s59_s28, 8192  ;;  %p4951_p1 = scmp.lt.s32.totalorder %s59_s28, %s59_s28 }
   0xd   :  { %p4947_p0 = scmp.ne.s32.totalorder %s59_s28, %s4946_s4  ;;  %p4952_p2 = scmp.lt.s32.totalorder %s4946_s4, %s4946_s4 }
   0xf   :  { %p4953_p3 = por %p4952_p2, %p4951_p1 }
  0x11   :  { %p4954_p4 = pnand %p4953_p3, %p4947_p0 }
  0x13   :  { %4957 = shalt.err (!%p4954_p4)
}
  0x14   :  { %s5026_s0 = smov 512   ;;  %s5027_s23 = smov 32  }
  0x15   :  { %s7437_s24 = sld [smem:[#allocation54_spill]]  ;;  %s4966_s6 = scalar_lea.vmem %s47_s30, 8192 }
  0x16   :  { %p4967_p5 = scmp.ne.s32.totalorder %s47_s30, %s4966_s6  ;;  %p4971_p6 = scmp.lt.s32.totalorder %s47_s30, %s47_s30 }
  0x17   :  { %p4972_p7 = scmp.lt.s32.totalorder %s4966_s6, %s4966_s6 }
  0x19   :  { %p4973_p8 = por %p4972_p7, %p4971_p6 }
  0x1b   :  { %64 = dma.hbm_to_vmem [thread:$0]  %s7437_s24, 8192, %s59_s28, [#allocation5], %s5026_s0, %s5026_s0, %s5027_s23  }
  0x1c   :  { %p4974_p9 = pnand %p4973_p8, %p4967_p5 }
  0x1e   :  { %4977 = shalt.err (!%p4974_p9)
}
  0x1f   :  { %s7438_s2 = sld [smem:[#allocation53_spill]]  ;;  %s5028_s27 = smov [#allocation6]  }
  0x20   :  { %s88_s3 = sshll.u32 %s5028_s27, 4  ;;  %s5029_s29 = smov [#allocation7]   ;;  %s89_s3 = int_to_ptr.vmem [resolvable:$true] %s88_s3 }
  0x21   :  { %s100_s4 = sshll.u32 %s5029_s29, 4  ;;  %s4986_s28 = scalar_lea.vmem %s89_s3, 8192  ;;  %s101_s4 = int_to_ptr.vmem [resolvable:$true] %s100_s4 }
  0x22   :  { %p4987_p10 = scmp.ne.s32.totalorder %s89_s3, %s4986_s28  ;;  %p4991_p11 = scmp.lt.s32.totalorder %s89_s3, %s89_s3 }
  0x23   :  { %p4992_p12 = scmp.lt.s32.totalorder %s4986_s28, %s4986_s28 }
  0x25   :  { %52 = dma.hbm_to_vmem [thread:$0]  %s7438_s2, 8192, %s47_s30, [#allocation3], %s5026_s0, %s5026_s0, %s5027_s23  }
  0x26   :  { %p4993_p13 = por %p4992_p12, %p4991_p11 }
  0x28   :  { %p4994_p0 = pnand %p4993_p13, %p4987_p10 }
  0x2a   :  { %4997 = shalt.err (!%p4994_p0)
}
  0x2b   :  { %94 = dma.hbm_to_vmem [thread:$0]  %s7212_s16, 8192, %s89_s3, [#allocation5], %s5026_s0, %s5026_s0, %s5027_s23  }
  0x2c   :  { %s5006_s30 = scalar_lea.vmem %s101_s4, 8192  ;;  %p5011_p2 = scmp.lt.s32.totalorder %s101_s4, %s101_s4 }
  0x2d   :  { %p5007_p1 = scmp.ne.s32.totalorder %s101_s4, %s5006_s30  ;;  %p5012_p3 = scmp.lt.s32.totalorder %s5006_s30, %s5006_s30 }
  0x2f   :  { %p5013_p4 = por %p5012_p3, %p5011_p2 }
  0x31   :  { %p5014_p5 = pnand %p5013_p4, %p5007_p1 }
  0x33   :  { %5017 = shalt.err (!%p5014_p5)
}
  0x34   :  { %106 = dma.hbm_to_vmem [thread:$0]  %s7213_s17, 8192, %s101_s4, [#allocation8], %s5026_s0, %s5026_s0, %s5027_s23  }
  0x35   :  { %5018 = dma.done.wait [#allocation3], 8192  }
  0x36   :  { %5019 = vsyncadd [#allocation3], 4294959104 }
  0x37   :  { %5020 = dma.done.wait [#allocation5], 16384  }
  0x38   :  { %5021 = vsyncadd [#allocation5], 4294950912 }
  0x39   :  { %5022 = dma.done.wait [#allocation8], 8192  }
  0x3a   :  { %5023 = vsyncadd [#allocation8], 4294959104  ;;  %vm143_vm0 = vcmask 1045504   ;;  %vm136_vm1 = vcmask 113664   ;;  %s7439_s26 = sld [smem:[#allocation51_spill]]  ;;  %v285_v4 = vld [vmem:[#allocation2 + $0x1e8] sm:$0xff] }
  0x3b   :  { %s7440_s28 = sld [smem:[#allocation48_spill]]  ;;  %310 = vmatprep.subr.mxu1 %v285_v4  ;;  %v287_v5 = vld [vmem:[#allocation2 + $0x1f8] sm:$0xff]  ;;  %v284_v6 = vld [vmem:[#allocation2 + $0x1e0] sm:$0xff]  ;;  %v281_v7 = vld [vmem:[#allocation2 + $0x1c8] sm:$0xff]  ;;  %vm5031_vm2 = vmmov 0   ;;  %s5032_s2 = smov 16  }
  0x3c   :  { %311 = vmatpush1.msra.mxu1 %v284_v6  ;;  %v286_v8 = vld [vmem:[#allocation2 + $0x1f0] sm:$0xff]  ;;  %v280_v9 = vld [vmem:[#allocation2 + $0x1c0] sm:$0xff]  ;;  %v283_v10 = vld [vmem:[#allocation2 + $0x1d8] sm:$0xff]  ;;  %v7221_v6 = vmov 0.0   ;;  %s7443_s1 = sld [smem:[#allocation52_spill]]  ;;  %vm2102_vm3 = vcmask 130048  }
  0x3d   :  { %312 = vmatprep.subr.mxu1 %v281_v7  ;;  %v277_v11 = vld [vmem:[#allocation2 + $0x1a8] sm:$0xff]  ;;  %v282_v12 = vld [vmem:[#allocation2 + $0x1d0] sm:$0xff]  ;;  %v276_v13 = vld [vmem:[#allocation2 + $0x1a0] sm:$0xff]  ;;  %374 = vmatprep.mubr.f32.mxu1 %v7221_v6  ;;  %s7614_s16 = sld [smem:[#allocation49_spill]]  ;;  %vm4171_vm4 = vcmask 1041408   ;;  %vm4173_vm5 = vcmask 1043456  }
  0x3e   :  { %313 = vmatpush1.msra.mxu1 %v280_v9  ;;  %v279_v14 = vld [vmem:[#allocation2 + $0x1b8] sm:$0xff]  ;;  %v273_v15 = vld [vmem:[#allocation2 + $0x188] sm:$0xff]  ;;  %v278_v16 = vld [vmem:[#allocation2 + $0x1b0] sm:$0xff]  ;;  %s7662_s25 = sld [smem:[#allocation50_spill]] }
  0x3f   :  { %314 = vmatprep.subr.mxu1 %v277_v11  ;;  %v272_v17 = vld [vmem:[#allocation2 + $0x180] sm:$0xff]  ;;  %v275_v18 = vld [vmem:[#allocation2 + $0x198] sm:$0xff]  ;;  %v269_v19 = vld [vmem:[#allocation2 + $0x168] sm:$0xff] }
  0x40   :  { %v128_v0 = vld [vmem:[%s7439_s26 + $0x8] sm:$0x3f]  ;;  %v127_v1 = vld [vmem:[%s7439_s26] sm:$0xff]  ;;  %315 = vmatpush1.msra.mxu1 %v276_v13  ;;  %v274_v20 = vld [vmem:[#allocation2 + $0x190] sm:$0xff] }
  0x41   :  { %v125_v2 = vld [vmem:[%s7440_s28] sm:$0xff]  ;;  %4434 = vmatprep.subr.msk.mxu0 %vm143_vm0, %v128_v0  ;;  %v126_v3 = vld [vmem:[%s7440_s28 + $0x8] sm:$0xff]  ;;  %316 = vmatprep.subr.mxu1 %v273_v15  ;;  %v271_v22 = vld [vmem:[#allocation2 + $0x178] sm:$0xff] }
  0x42   :  { %4438 = vmatprep.mubr.msk.f32.mxu0 %vm136_vm1, %v125_v2  ;;  %4435 = vmatpush3.msk.msra.mxu0 %vm143_vm0, %v128_v0  ;;  %v268_v21 = vld [vmem:[#allocation2 + $0x160] sm:$0xff]  ;;  %v265_v23 = vld [vmem:[#allocation2 + $0x148] sm:$0xff]  ;;  %v270_v24 = vld [vmem:[#allocation2 + $0x170] sm:$0xff] }
  0x43   :  { %4436 = vmatprep.subr.mxu0 %v127_v1  ;;  %317 = vmatpush1.msra.mxu1 %v272_v17  ;;  %v264_v25 = vld [vmem:[#allocation2 + $0x140] sm:$0xff]  ;;  %v267_v26 = vld [vmem:[#allocation2 + $0x158] sm:$0xff]  ;;  %v261_v27 = vld [vmem:[#allocation2 + $0x128] sm:$0xff] }
  0x44   :  { %4437 = vmatpush3.msra.mxu0 %v127_v1  ;;  %318 = vmatprep.subr.mxu1 %v269_v19  ;;  %v266_v28 = vld [vmem:[#allocation2 + $0x150] sm:$0xff]  ;;  %v260_v29 = vld [vmem:[#allocation2 + $0x120] sm:$0xff]  ;;  %v263_v30 = vld [vmem:[#allocation2 + $0x138] sm:$0xff] }
  0x45   :  { %4439 = vmatmul.mubr.msk.f32.vlgmr.msra.gmra.mxu0 %vm136_vm1, %v126_v3  ;;  %387 = vmatprep.subr.mxu0 %v287_v5  ;;  %v257_v31 = vld [vmem:[#allocation2 + $0x108] sm:$0xff]  ;;  %v262_v32 = vld [vmem:[#allocation2 + $0x130] sm:$0xff]  ;;  %v256_v33 = vld [vmem:[#allocation2 + $0x100] sm:$0xff] }
  0x46   :  { %388 = vmatpush1.msra.mxu0 %v286_v8  ;;  %319 = vmatpush1.msra.mxu1 %v268_v21  ;;  %v259_v34 = vld [vmem:[#allocation2 + $0x118] sm:$0xff]  ;;  %v253_v35 = vld [vmem:[#allocation2 + $0xe8] sm:$0xff]  ;;  %v258_v36 = vld [vmem:[#allocation2 + $0x110] sm:$0xff] }
  0x47   :  { %389 = vmatprep.subr.mxu0 %v283_v10  ;;  %320 = vmatprep.subr.mxu1 %v265_v23  ;;  %v252_v37 = vld [vmem:[#allocation2 + $0xe0] sm:$0xff]  ;;  %v255_v38 = vld [vmem:[#allocation2 + $0xf8] sm:$0xff]  ;;  %v249_v39 = vld [vmem:[#allocation2 + $0xc8] sm:$0xff] }
  0x48   :  { %390 = vmatpush1.msra.mxu0 %v282_v12  ;;  %321 = vmatpush1.msra.mxu1 %v264_v25  ;;  %v254_v40 = vld [vmem:[#allocation2 + $0xf0] sm:$0xff]  ;;  %v248_v41 = vld [vmem:[#allocation2 + $0xc0] sm:$0xff]  ;;  %v251_v42 = vld [vmem:[#allocation2 + $0xd8] sm:$0xff] }
  0x49   :  { %391 = vmatprep.subr.mxu0 %v279_v14  ;;  %322 = vmatprep.subr.mxu1 %v261_v27  ;;  %v245_v43 = vld [vmem:[#allocation2 + $0xa8] sm:$0xff]  ;;  %v250_v44 = vld [vmem:[#allocation2 + $0xd0] sm:$0xff]  ;;  %v244_v45 = vld [vmem:[#allocation2 + $0xa0] sm:$0xff] }
  0x4a   :  { %392 = vmatpush1.msra.mxu0 %v278_v16  ;;  %323 = vmatpush1.msra.mxu1 %v260_v29  ;;  %v247_v46 = vld [vmem:[#allocation2 + $0xb8] sm:$0xff]  ;;  %v241_v47 = vld [vmem:[#allocation2 + $0x88] sm:$0xff]  ;;  %v246_v48 = vld [vmem:[#allocation2 + $0xb0] sm:$0xff] }
  0x4b   :  { %393 = vmatprep.subr.mxu0 %v275_v18  ;;  %324 = vmatprep.subr.mxu1 %v257_v31  ;;  %v240_v49 = vld [vmem:[#allocation2 + $0x80] sm:$0xff]  ;;  %v243_v50 = vld [vmem:[#allocation2 + $0x98] sm:$0xff]  ;;  %v237_v51 = vld [vmem:[#allocation2 + $0x68] sm:$0xff] }
  0x4c   :  { %394 = vmatpush1.msra.mxu0 %v274_v20  ;;  %325 = vmatpush1.msra.mxu1 %v256_v33  ;;  %v242_v52 = vld [vmem:[#allocation2 + $0x90] sm:$0xff]  ;;  %v236_v53 = vld [vmem:[#allocation2 + $0x60] sm:$0xff]  ;;  %v239_v54 = vld [vmem:[#allocation2 + $0x78] sm:$0xff] }
  0x4d   :  { %395 = vmatprep.subr.mxu0 %v271_v22  ;;  %326 = vmatprep.subr.mxu1 %v253_v35  ;;  %v238_v55 = vld [vmem:[#allocation2 + $0x70] sm:$0xff]  ;;  %v233_v56 = vld [vmem:[#allocation2 + $0x48] sm:$0xff]  ;;  %v235_v57 = vld [vmem:[#allocation2 + $0x58] sm:$0xff] }
  0x4e   :  { %396 = vmatpush1.msra.mxu0 %v270_v24  ;;  %327 = vmatpush1.msra.mxu1 %v252_v37  ;;  %v232_v58 = vld [vmem:[#allocation2 + $0x40] sm:$0xff]  ;;  %v234_v59 = vld [vmem:[#allocation2 + $0x50] sm:$0xff]  ;;  %v229_v60 = vld [vmem:[#allocation2 + $0x28] sm:$0xff] }
  0x4f   :  { %397 = vmatprep.subr.mxu0 %v267_v26  ;;  %328 = vmatprep.subr.mxu1 %v249_v39  ;;  %v231_v61 = vld [vmem:[#allocation2 + $0x38] sm:$0xff]  ;;  %v228_v62 = vld [vmem:[#allocation2 + $0x20] sm:$0xff]  ;;  %v230_v63 = vld [vmem:[#allocation2 + $0x30] sm:$0xff] }
  0x50   :  { %398 = vmatpush1.msra.mxu0 %v266_v28  ;;  %329 = vmatpush1.msra.mxu1 %v248_v41  ;;  %v225_v0 = vld [vmem:[#allocation2 + $0x8] sm:$0xff]  ;;  %v227_v1 = vld [vmem:[#allocation2 + $0x18] sm:$0xff]  ;;  %v224_v2 = vld [vmem:[#allocation2] sm:$0xff] }
  0x51   :  { %399 = vmatprep.subr.mxu0 %v263_v30  ;;  %330 = vmatprep.subr.mxu1 %v245_v43  ;;  %v226_v3 = vld [vmem:[#allocation2 + $0x10] sm:$0xff]  ;;  %v5189_v4 = vld [vmem:[#allocation4 + $0x1e8] sm:$0xff]  ;;  %v5191_v5 = vld [vmem:[#allocation4 + $0x1f8] sm:$0xff] }
  0x52   :  { %400 = vmatpush1.msra.mxu0 %v262_v32  ;;  %331 = vmatpush1.msra.mxu1 %v244_v45  ;;  %7441 = vst [vmem:[#allocation12_spill] sm:$0xff] %v5189_v4  ;;  %7442 = vst [vmem:[#allocation13_spill] sm:$0xff] %v5191_v5  ;;  %v4323_v8 = vld [vmem:[%s7443_s1] ss:$0 sm:$0xff]  ;;  %v5202_v13 = vld [vmem:[#allocation4 + $0x1f0] sm:$0xff] }
  0x53   :  { %401 = vmatprep.subr.mxu0 %v259_v34  ;;  %332 = vmatprep.subr.mxu1 %v241_v47  ;;  %v5200_v12 = vld [vmem:[#allocation4 + $0x1e0] sm:$0xff]  ;;  %v5204_v14 = vld [vmem:[#allocation4 + $0x1c8] sm:$0xff]  ;;  %v5206_v15 = vld [vmem:[#allocation4 + $0x1d8] sm:$0xff] }
  0x54   :  { %402 = vmatpush1.msra.mxu0 %v258_v36  ;;  %333 = vmatpush1.msra.mxu1 %v240_v49  ;;  %v5208_v17 = vld [vmem:[#allocation4 + $0x1c0] sm:$0xff]  ;;  %v5210_v18 = vld [vmem:[#allocation4 + $0x1d0] sm:$0xff]  ;;  %v5216_v19 = vld [vmem:[#allocation4 + $0x1a8] sm:$0xff] }
  0x55   :  { %403 = vmatprep.subr.mxu0 %v255_v38  ;;  %334 = vmatprep.subr.mxu1 %v237_v51  ;;  %v5218_v20 = vld [vmem:[#allocation4 + $0x1b8] sm:$0xff]  ;;  %v5224_v22 = vld [vmem:[#allocation4 + $0x1a0] sm:$0xff]  ;;  %v5226_v23 = vld [vmem:[#allocation4 + $0x1b0] sm:$0xff] }
  0x56   :  { %404 = vmatpush1.msra.mxu0 %v254_v40  ;;  %335 = vmatpush1.msra.mxu1 %v236_v53  ;;  %v5230_v24 = vld [vmem:[#allocation4 + $0x188] sm:$0xff]  ;;  %v5232_v25 = vld [vmem:[#allocation4 + $0x198] sm:$0xff]  ;;  %v5234_v26 = vld [vmem:[#allocation4 + $0x180] sm:$0xff] }
  0x57   :  { %405 = vmatprep.subr.mxu0 %v251_v42  ;;  %336 = vmatprep.subr.mxu1 %v233_v56  ;;  %v5236_v27 = vld [vmem:[#allocation4 + $0x190] sm:$0xff]  ;;  %v5240_v28 = vld [vmem:[#allocation4 + $0x168] sm:$0xff]  ;;  %v5242_v29 = vld [vmem:[#allocation4 + $0x178] sm:$0xff] }
  0x58   :  { %406 = vmatpush1.msra.mxu0 %v250_v44  ;;  %337 = vmatpush1.msra.mxu1 %v232_v58  ;;  %v5246_v30 = vld [vmem:[#allocation4 + $0x160] sm:$0xff]  ;;  %v5248_v31 = vld [vmem:[#allocation4 + $0x170] sm:$0xff]  ;;  %v5252_v32 = vld [vmem:[#allocation4 + $0x148] sm:$0xff] }
  0x59   :  { %407 = vmatprep.subr.mxu0 %v247_v46  ;;  %338 = vmatprep.subr.mxu1 %v229_v60  ;;  %v5254_v33 = vld [vmem:[#allocation4 + $0x158] sm:$0xff]  ;;  %v5258_v34 = vld [vmem:[#allocation4 + $0x140] sm:$0xff]  ;;  %v5260_v35 = vld [vmem:[#allocation4 + $0x150] sm:$0xff] }
  0x5a   :  { %408 = vmatpush1.msra.mxu0 %v246_v48  ;;  %339 = vmatpush1.msra.mxu1 %v228_v62  ;;  %v5264_v36 = vld [vmem:[#allocation4 + $0x128] sm:$0xff]  ;;  %v5266_v37 = vld [vmem:[#allocation4 + $0x138] sm:$0xff]  ;;  %v5270_v38 = vld [vmem:[#allocation4 + $0x120] sm:$0xff] }
  0x5b   :  { %409 = vmatprep.subr.mxu0 %v243_v50  ;;  %340 = vmatprep.subr.mxu1 %v225_v0  ;;  %v5272_v39 = vld [vmem:[#allocation4 + $0x130] sm:$0xff]  ;;  %v5276_v40 = vld [vmem:[#allocation4 + $0x108] sm:$0xff]  ;;  %v5278_v41 = vld [vmem:[#allocation4 + $0x118] sm:$0xff] }
  0x5c   :  { %410 = vmatpush1.msra.mxu0 %v242_v52  ;;  %341 = vmatpush1.msra.mxu1 %v224_v2  ;;  %v5282_v42 = vld [vmem:[#allocation4 + $0x100] sm:$0xff]  ;;  %v5284_v43 = vld [vmem:[#allocation4 + $0x110] sm:$0xff]  ;;  %v5288_v44 = vld [vmem:[#allocation4 + $0xe8] sm:$0xff] }
  0x5d   :  { %411 = vmatprep.subr.mxu0 %v239_v54  ;;  %451 = vmatprep.mubr.f32.mxu0 %v7221_v6  ;;  %v5290_v45 = vld [vmem:[#allocation4 + $0xf8] sm:$0xff]  ;;  %v5294_v46 = vld [vmem:[#allocation4 + $0xe0] sm:$0xff]  ;;  %v5296_v47 = vld [vmem:[#allocation4 + $0xf0] sm:$0xff] }
  0x5e   :  { %412 = vmatpush1.msra.mxu0 %v238_v55  ;;  %528 = vmatprep.subr.mxu1 %v5189_v4  ;;  %v5300_v48 = vld [vmem:[#allocation4 + $0xc8] sm:$0xff]  ;;  %v5302_v49 = vld [vmem:[#allocation4 + $0xd8] sm:$0xff]  ;;  %v5306_v50 = vld [vmem:[#allocation4 + $0xc0] sm:$0xff] }
  0x5f   :  { %413 = vmatprep.subr.mxu0 %v235_v57  ;;  %v5308_v51 = vld [vmem:[#allocation4 + $0xd0] sm:$0xff]  ;;  %v5312_v52 = vld [vmem:[#allocation4 + $0xa8] sm:$0xff]  ;;  %v5314_v53 = vld [vmem:[#allocation4 + $0xb8] sm:$0xff] }
  0x60   :  { %414 = vmatpush1.msra.mxu0 %v234_v59  ;;  %v5318_v54 = vld [vmem:[#allocation4 + $0xa0] sm:$0xff]  ;;  %v5320_v55 = vld [vmem:[#allocation4 + $0xb0] sm:$0xff]  ;;  %v5324_v56 = vld [vmem:[#allocation4 + $0x88] sm:$0xff] }
  0x61   :  { %415 = vmatprep.subr.mxu0 %v231_v61  ;;  %7444 = vst [vmem:[#allocation14_spill] sm:$0xff] %v5318_v54  ;;  %7445 = vst [vmem:[#allocation15_spill] sm:$0xff] %v5320_v55  ;;  %v5326_v57 = vld [vmem:[#allocation4 + $0x98] sm:$0xff]  ;;  %v5330_v58 = vld [vmem:[#allocation4 + $0x80] sm:$0xff] }
  0x62   :  { %416 = vmatpush1.msra.mxu0 %v230_v63  ;;  %7446 = vst [vmem:[#allocation16_spill] sm:$0xff] %v5324_v56  ;;  %7447 = vst [vmem:[#allocation17_spill] sm:$0xff] %v5326_v57  ;;  %v5332_v59 = vld [vmem:[#allocation4 + $0x90] sm:$0xff]  ;;  %v5336_v60 = vld [vmem:[#allocation4 + $0x68] sm:$0xff] }
  0x63   :  { %417 = vmatprep.subr.mxu0 %v227_v1  ;;  %7448 = vst [vmem:[#allocation18_spill] sm:$0xff] %v5330_v58  ;;  %7449 = vst [vmem:[#allocation19_spill] sm:$0xff] %v5332_v59  ;;  %v5338_v61 = vld [vmem:[#allocation4 + $0x78] sm:$0xff]  ;;  %v5342_v62 = vld [vmem:[#allocation4 + $0x60] sm:$0xff] }
  0x64   :  { %418 = vmatpush1.msra.mxu0 %v226_v3  ;;  %7450 = vst [vmem:[#allocation20_spill] sm:$0xff] %v5336_v60  ;;  %7451 = vst [vmem:[#allocation21_spill] sm:$0xff] %v5338_v61  ;;  %v5344_v63 = vld [vmem:[#allocation4 + $0x70] sm:$0xff]  ;;  %v5348_v0 = vld [vmem:[#allocation4 + $0x48] sm:$0xff] }
  0x65   :  { %599 = vmatprep.subr.mxu0 %v5191_v5  ;;  %7452 = vst [vmem:[#allocation22_spill] sm:$0xff] %v5342_v62  ;;  %7453 = vst [vmem:[#allocation23_spill] sm:$0xff] %v5344_v63  ;;  %v5350_v1 = vld [vmem:[#allocation4 + $0x58] sm:$0xff]  ;;  %v5354_v2 = vld [vmem:[#allocation4 + $0x40] sm:$0xff] }
  0x66   :  { %7454 = vst [vmem:[#allocation24_spill] sm:$0xff] %v5348_v0  ;;  %7455 = vst [vmem:[#allocation25_spill] sm:$0xff] %v5350_v1  ;;  %v5356_v3 = vld [vmem:[#allocation4 + $0x50] sm:$0xff] }
  0x67   :  { %7456 = vst [vmem:[#allocation26_spill] sm:$0xff] %v5354_v2  ;;  %7457 = vst [vmem:[#allocation27_spill] sm:$0xff] %v5356_v3 }
 0x105   :  { %v4440_v7 = vpop.f32.mrf.mxu0 }
 0x106   :  { %v219_v16 = vadd.f32 %v4440_v7, %v4323_v8  ;;  %v5360_v7 = vld [vmem:[#allocation4 + $0x28] sm:$0xff] }
 0x107   :  { %v213_v9 = vpop.f32.mrf.mxu0  ;;  %7458 = vst [vmem:[#allocation28_spill] sm:$0xff] %v5360_v7 }
 0x108   :  { %v214_v10 = vadd.f32 %v4323_v8, %v213_v9  ;;  %v223_v21 = vmax.f32 %v219_v16, 0.0  ;;  %v5362_v8 = vld [vmem:[#allocation4 + $0x38] sm:$0xff]  ;;  %v5366_v9 = vld [vmem:[#allocation4 + $0x20] sm:$0xff] }
 0x109   :  { %7459 = vst [vmem:[#allocation29_spill] sm:$0xff] %v5362_v8  ;;  %7460 = vst [vmem:[#allocation30_spill] sm:$0xff] %v5366_v9  ;;  %v5374_v16 = vld [vmem:[#allocation4 + $0x18] sm:$0xff] }
 0x10a   :  { %v222_v11 = vmax.f32 %v214_v10, 0.0  ;;  %v5368_v10 = vld [vmem:[#allocation4 + $0x30] sm:$0xff]  ;;  %7463 = vst [vmem:[#allocation33_spill] sm:$0xff] %v5374_v16 }
 0x10b   :  { %7461 = vst [vmem:[#allocation31_spill] sm:$0xff] %v5368_v10 }
 0x10c   :  { %375 = vmatmul.mubr.f32.vlgmr.msra.gmra.mxu1 %v222_v11  ;;  %452 = vmatmul.mubr.f32.vlgmr.msra.gmra.mxu0 %v222_v11  ;;  %v5372_v11 = vld [vmem:[#allocation4 + $0x8] sm:$0xff] }
 0x10d   :  { %529 = vmatpush1.msra.mxu1 %v5200_v12  ;;  %600 = vmatpush1.msra.mxu0 %v5202_v13  ;;  %7462 = vst [vmem:[#allocation32_spill] sm:$0xff] %v5372_v11 }
 0x10e   :  { %530 = vmatprep.subr.mxu1 %v5204_v14  ;;  %601 = vmatprep.subr.mxu0 %v5206_v15 }
 0x10f   :  { %531 = vmatpush1.msra.mxu1 %v5208_v17  ;;  %602 = vmatpush1.msra.mxu0 %v5210_v18 }
 0x110   :  { %380 = vmatprep.mubr.f32.mxu1 %v7221_v6  ;;  %457 = vmatprep.mubr.f32.mxu0 %v7221_v6  ;;  %v5382_v6 = vld [vmem:[#allocation4 + $0x10] sm:$0xff] }
 0x111   :  { %532 = vmatprep.subr.mxu1 %v5216_v19  ;;  %603 = vmatprep.subr.mxu0 %v5218_v20  ;;  %7465 = vst [vmem:[#allocation35_spill] sm:$0xff] %v5382_v6 }
 0x112   :  { %381 = vmatmul.mubr.f32.gmra.mxu1 %v223_v21  ;;  %458 = vmatmul.mubr.f32.gmra.mxu0 %v223_v21  ;;  %v5378_v21 = vld [vmem:[#allocation4] sm:$0xff] }
 0x113   :  { %533 = vmatpush1.msra.mxu1 %v5224_v22  ;;  %604 = vmatpush1.msra.mxu0 %v5226_v23  ;;  %7464 = vst [vmem:[#allocation34_spill] sm:$0xff] %v5378_v21 }
 0x114   :  { %534 = vmatprep.subr.mxu1 %v5230_v24  ;;  %605 = vmatprep.subr.mxu0 %v5232_v25 }
 0x115   :  { %535 = vmatpush1.msra.mxu1 %v5234_v26  ;;  %606 = vmatpush1.msra.mxu0 %v5236_v27 }
 0x116   :  { %536 = vmatprep.subr.mxu1 %v5240_v28  ;;  %607 = vmatprep.subr.mxu0 %v5242_v29 }
 0x117   :  { %537 = vmatpush1.msra.mxu1 %v5246_v30  ;;  %608 = vmatpush1.msra.mxu0 %v5248_v31 }
 0x118   :  { %538 = vmatprep.subr.mxu1 %v5252_v32  ;;  %609 = vmatprep.subr.mxu0 %v5254_v33 }
 0x119   :  { %539 = vmatpush1.msra.mxu1 %v5258_v34  ;;  %610 = vmatpush1.msra.mxu0 %v5260_v35 }
 0x11a   :  { %540 = vmatprep.subr.mxu1 %v5264_v36  ;;  %611 = vmatprep.subr.mxu0 %v5266_v37 }
 0x11b   :  { %541 = vmatpush1.msra.mxu1 %v5270_v38  ;;  %612 = vmatpush1.msra.mxu0 %v5272_v39 }
 0x11c   :  { %542 = vmatprep.subr.mxu1 %v5276_v40  ;;  %613 = vmatprep.subr.mxu0 %v5278_v41 }
 0x11d   :  { %543 = vmatpush1.msra.mxu1 %v5282_v42  ;;  %614 = vmatpush1.msra.mxu0 %v5284_v43 }
 0x11e   :  { %544 = vmatprep.subr.mxu1 %v5288_v44  ;;  %615 = vmatprep.subr.mxu0 %v5290_v45 }
 0x11f   :  { %545 = vmatpush1.msra.mxu1 %v5294_v46  ;;  %616 = vmatpush1.msra.mxu0 %v5296_v47 }
 0x120   :  { %546 = vmatprep.subr.mxu1 %v5300_v48  ;;  %617 = vmatprep.subr.mxu0 %v5302_v49 }
 0x121   :  { %547 = vmatpush1.msra.mxu1 %v5306_v50  ;;  %618 = vmatpush1.msra.mxu0 %v5308_v51 }
 0x122   :  { %548 = vmatprep.subr.mxu1 %v5312_v52  ;;  %619 = vmatprep.subr.mxu0 %v5314_v53 }
 0x123   :  { %549 = vmatpush1.msra.mxu1 %v5318_v54  ;;  %620 = vmatpush1.msra.mxu0 %v5320_v55 }
 0x124   :  { %550 = vmatprep.subr.mxu1 %v5324_v56  ;;  %621 = vmatprep.subr.mxu0 %v5326_v57 }
 0x125   :  { %551 = vmatpush1.msra.mxu1 %v5330_v58  ;;  %622 = vmatpush1.msra.mxu0 %v5332_v59 }
 0x126   :  { %552 = vmatprep.subr.mxu1 %v5336_v60  ;;  %623 = vmatprep.subr.mxu0 %v5338_v61 }
 0x127   :  { %553 = vmatpush1.msra.mxu1 %v5342_v62  ;;  %624 = vmatpush1.msra.mxu0 %v5344_v63 }
 0x128   :  { %554 = vmatprep.subr.mxu1 %v5348_v0  ;;  %625 = vmatprep.subr.mxu0 %v5350_v1 }
 0x129   :  { %555 = vmatpush1.msra.mxu1 %v5354_v2  ;;  %626 = vmatpush1.msra.mxu0 %v5356_v3  ;;  %v7466_v3 = vmov 0.0  }
 0x12a   :  { %556 = vmatprep.subr.mxu1 %v5360_v7  ;;  %627 = vmatprep.subr.mxu0 %v5362_v8 }
 0x12b   :  { %557 = vmatpush1.msra.mxu1 %v5366_v9  ;;  %628 = vmatpush1.msra.mxu0 %v5368_v10 }
 0x12c   :  { %558 = vmatprep.subr.mxu1 %v5372_v11  ;;  %629 = vmatprep.subr.mxu0 %v5374_v16 }
 0x12d   :  { %559 = vmatpush1.msra.mxu1 %v5378_v21  ;;  %592 = vmatprep.mubr.f32.mxu1 %v7466_v3 }
 0x12e   :  { %630 = vmatpush1.msra.mxu0 %v5382_v6  ;;  %663 = vmatprep.mubr.f32.mxu0 %v7466_v3 }
 0x12f   :  { %593 = vmatmul.mubr.f32.vlgmr.msra.gmra.mxu1 %v7466_v3  ;;  %664 = vmatmul.mubr.f32.vlgmr.msra.gmra.mxu0 %v7466_v3 }
 0x130   :  { %698 = vmatprep.subr.mxu1 %v5189_v4  ;;  %769 = vmatprep.subr.mxu0 %v5191_v5 }
 0x131   :  { %699 = vmatpush1.msra.mxu1 %v5200_v12  ;;  %770 = vmatpush1.msra.mxu0 %v5202_v13 }
 0x132   :  { %700 = vmatprep.subr.mxu1 %v5204_v14  ;;  %771 = vmatprep.subr.mxu0 %v5206_v15 }
 0x133   :  { %701 = vmatpush1.msra.mxu1 %v5208_v17  ;;  %772 = vmatpush1.msra.mxu0 %v5210_v18 }
 0x134   :  { %702 = vmatprep.subr.mxu1 %v5216_v19  ;;  %773 = vmatprep.subr.mxu0 %v5218_v20 }
 0x135   :  { %703 = vmatpush1.msra.mxu1 %v5224_v22  ;;  %774 = vmatpush1.msra.mxu0 %v5226_v23 }
 0x136   :  { %704 = vmatprep.subr.mxu1 %v5230_v24  ;;  %775 = vmatprep.subr.mxu0 %v5232_v25 }
 0x137   :  { %705 = vmatpush1.msra.mxu1 %v5234_v26  ;;  %776 = vmatpush1.msra.mxu0 %v5236_v27 }
 0x138   :  { %706 = vmatprep.subr.mxu1 %v5240_v28  ;;  %777 = vmatprep.subr.mxu0 %v5242_v29 }
 0x139   :  { %707 = vmatpush1.msra.mxu1 %v5246_v30  ;;  %778 = vmatpush1.msra.mxu0 %v5248_v31 }
 0x13a   :  { %708 = vmatprep.subr.mxu1 %v5252_v32  ;;  %779 = vmatprep.subr.mxu0 %v5254_v33 }
 0x13b   :  { %709 = vmatpush1.msra.mxu1 %v5258_v34  ;;  %780 = vmatpush1.msra.mxu0 %v5260_v35 }
 0x13c   :  { %710 = vmatprep.subr.mxu1 %v5264_v36  ;;  %781 = vmatprep.subr.mxu0 %v5266_v37 }
 0x13d   :  { %711 = vmatpush1.msra.mxu1 %v5270_v38  ;;  %782 = vmatpush1.msra.mxu0 %v5272_v39 }
 0x13e   :  { %712 = vmatprep.subr.mxu1 %v5276_v40  ;;  %783 = vmatprep.subr.mxu0 %v5278_v41 }
 0x13f   :  { %713 = vmatpush1.msra.mxu1 %v5282_v42  ;;  %784 = vmatpush1.msra.mxu0 %v5284_v43 }
 0x140   :  { %714 = vmatprep.subr.mxu1 %v5288_v44  ;;  %785 = vmatprep.subr.mxu0 %v5290_v45 }
 0x141   :  { %715 = vmatpush1.msra.mxu1 %v5294_v46  ;;  %786 = vmatpush1.msra.mxu0 %v5296_v47 }
 0x142   :  { %716 = vmatprep.subr.mxu1 %v5300_v48  ;;  %787 = vmatprep.subr.mxu0 %v5302_v49 }
 0x143   :  { %717 = vmatpush1.msra.mxu1 %v5306_v50  ;;  %788 = vmatpush1.msra.mxu0 %v5308_v51 }
 0x144   :  { %718 = vmatprep.subr.mxu1 %v5312_v52  ;;  %789 = vmatprep.subr.mxu0 %v5314_v53 }
 0x145   :  { %719 = vmatpush1.msra.mxu1 %v5318_v54  ;;  %790 = vmatpush1.msra.mxu0 %v5320_v55 }
 0x146   :  { %720 = vmatprep.subr.mxu1 %v5324_v56  ;;  %791 = vmatprep.subr.mxu0 %v5326_v57  ;;  %v7467_v56 = vld [vmem:[#allocation27_spill] sm:$0xff] }
 0x147   :  { %721 = vmatpush1.msra.mxu1 %v5330_v58  ;;  %792 = vmatpush1.msra.mxu0 %v5332_v59 }
 0x148   :  { %722 = vmatprep.subr.mxu1 %v5336_v60  ;;  %793 = vmatprep.subr.mxu0 %v5338_v61 }
 0x149   :  { %723 = vmatpush1.msra.mxu1 %v5342_v62  ;;  %794 = vmatpush1.msra.mxu0 %v5344_v63 }
 0x14a   :  { %724 = vmatprep.subr.mxu1 %v5348_v0  ;;  %795 = vmatprep.subr.mxu0 %v5350_v1 }
 0x14b   :  { %725 = vmatpush1.msra.mxu1 %v5354_v2  ;;  %796 = vmatpush1.msra.mxu0 %v7467_v56 }
 0x14c   :  { %726 = vmatprep.subr.mxu1 %v5360_v7  ;;  %797 = vmatprep.subr.mxu0 %v5362_v8  ;;  %v7248_v8 = vlaneseq }
 0x14d   :  { %727 = vmatpush1.msra.mxu1 %v5366_v9  ;;  %798 = vmatpush1.msra.mxu0 %v5368_v10 }
 0x14e   :  { %728 = vmatprep.subr.mxu1 %v5372_v11  ;;  %799 = vmatprep.subr.mxu0 %v5374_v16  ;;  %v291_v9 = vshrl.u32 %v7248_v8, 7 }
 0x14f   :  { %729 = vmatpush1.msra.mxu1 %v5378_v21  ;;  %762 = vmatprep.mubr.f32.mxu1 %v7466_v3  ;;  %v288_v21 = vld [vmem:[%s7203_s7] sm:$0xf] }
 0x150   :  { %800 = vmatpush1.msra.mxu0 %v5382_v6  ;;  %833 = vmatprep.mubr.f32.mxu0 %v7466_v3  ;;  %v5461_v11 = vsub.s32 0, %v291_v9  ;;  %v5463_v16 = vsub.s32 2, %v291_v9  ;;  %v5468_v3 = vsub.s32 1, %v291_v9 }
 0x151   :  { %886 = vmatprep.subr.mxu1 %v5189_v4  ;;  %957 = vmatprep.subr.mxu0 %v5191_v5  ;;  %v5470_v4 = vsub.s32 3, %v291_v9 }
 0x152   :  { %7468 = vst [vmem:[#allocation36_spill] sm:$0xff] %v5461_v11  ;;  %7469 = vst [vmem:[#allocation37_spill] sm:$0xff] %v5463_v16  ;;  %v293_v5 = vrot.slane %v288_v21, %v5461_v11  ;;  %v301_v8 = vrot.slane %v288_v21, %v5463_v16  ;;  %v297_v0 = vrot.slane %v288_v21, %v5468_v3 }
 0x153   :  { %7470 = vst [vmem:[#allocation38_spill] sm:$0xff] %v5468_v3  ;;  %7471 = vst [vmem:[#allocation39_spill] sm:$0xff] %v5470_v4  ;;  %v305_v63 = vrot.slane %v288_v21, %v5470_v4 }
 0x1cc   :  { %v376_v10 = vpop.f32.mrf.mxu1  ;;  %v453_v7 = vpop.f32.mrf.mxu0 }
 0x1cd   :  { %v5484_v57 = vadd.f32 %v376_v10, %v293_v5 }
 0x1ce   :  { %v378_v6 = vpop.f32.mrf.mxu1  ;;  %v455_v56 = vpop.f32.mrf.mxu0 }
 0x1cf   :  { %v5486_v16 = vadd.f32 %v378_v6, %v297_v0 }
 0x1d2   :  { %v382_v2 = vpop.f32.mrf.mxu1  ;;  %v459_v1 = vpop.f32.mrf.mxu0 }
 0x1d3   :  { %v5476_v62 = vadd.f32 %v382_v2, %v293_v5  ;;  %v5478_v61 = vadd.f32 %v459_v1, %v301_v8  ;;  %v5493_v5 = vadd.f32 %v453_v7, %v301_v8 }
 0x1d4   :  { %v384_v60 = vpop.f32.mrf.mxu1  ;;  %v461_v59 = vpop.f32.mrf.mxu0 }
 0x1d5   :  { %7472 = vst [vmem:[#allocation40_spill] sm:$0xff] %v5476_v62  ;;  %7473 = vst [vmem:[#allocation41_spill] sm:$0xff] %v5478_v61  ;;  %v5480_v58 = vadd.f32 %v384_v60, %v297_v0  ;;  %v5482_v9 = vadd.f32 %v461_v59, %v305_v63  ;;  %v5490_v60 = vadd.f32 %v455_v56, %v305_v63  ;;  %v7494_v62 = vld [vmem:[#allocation32_spill] sm:$0xff] }
 0x1d7   :  { %7474 = vst [vmem:[#allocation42_spill] sm:$0xff] %v5480_v58  ;;  %7475 = vst [vmem:[#allocation43_spill] sm:$0xff] %v5482_v9  ;;  %v7492_v9 = vld [vmem:[#allocation30_spill] sm:$0xff]  ;;  %v7493_v58 = vld [vmem:[#allocation31_spill] sm:$0xff] }
 0x1ef   :  { %v594_v11 = vpop.f32.mrf.mxu1  ;;  %v665_v1 = vpop.f32.mrf.mxu0 }
 0x1f0   :  { %v670_v55 = vadd.f32 %v594_v11, %v5484_v57  ;;  %v672_v0 = vadd.f32 %v665_v1, %v5493_v5 }
 0x1f1   :  { %v596_v3 = vpop.f32.mrf.mxu1  ;;  %v667_v4 = vpop.f32.mrf.mxu0 }
 0x1f2   :  { %v4327_v54 = vmul.f32 -1.442695, %v670_v55  ;;  %v671_v2 = vadd.f32 %v596_v3, %v5486_v16  ;;  %v673_v59 = vadd.f32 %v667_v4, %v5490_v60 }
 0x1f4   :  { %4542 = vpow2.f32 %v4327_v54  ;;  %v4328_v21 = vmul.f32 -1.442695, %v671_v2  ;;  %v4329_v10 = vmul.f32 -1.442695, %v673_v59 }
 0x1f6   :  { %4544 = vpow2.f32 %v4328_v21 }
 0x1f7   :  { %4546 = vpow2.f32 %v4329_v10  ;;  %v7477_v10 = vld [vmem:[#allocation15_spill] sm:$0xff] }
 0x201   :  { %v4543_v6 = vpop.eup %4542 }
 0x202   :  { %v677_v11 = vadd.f32 1.0, %v4543_v6  ;;  %v7478_v6 = vld [vmem:[#allocation16_spill] sm:$0xff] }
 0x203   :  { %v4545_v61 = vpop.eup %4544 }
 0x204   :  { %4548 = vrcp.f32 %v677_v11  ;;  %v683_v55 = vadd.f32 1.0, %v4545_v61  ;;  %v4547_v54 = vpop.eup %4546  ;;  %v7476_v61 = vld [vmem:[#allocation14_spill] sm:$0xff] }
 0x205   :  { %4550 = vtanh.f32 %v672_v0  ;;  %v690_v63 = vadd.f32 1.0, %v4547_v54  ;;  %v7479_v0 = vld [vmem:[#allocation17_spill] sm:$0xff]  ;;  %v7480_v11 = vld [vmem:[#allocation18_spill] sm:$0xff]  ;;  %v7482_v54 = vld [vmem:[#allocation20_spill] sm:$0xff] }
 0x206   :  { %4552 = vrcp.f32 %v683_v55  ;;  %v7481_v55 = vld [vmem:[#allocation19_spill] sm:$0xff] }
 0x207   :  { %4554 = vrcp.f32 %v690_v63  ;;  %v7486_v63 = vld [vmem:[#allocation24_spill] sm:$0xff] }
 0x211   :  { %v4549_v3 = vpop.eup %4548 }
 0x212   :  { %v4551_v2 = vpop.eup %4550 }
 0x213   :  { %v4553_v56 = vpop.eup %4552  ;;  %v694_v4 = vmul.f32 %v4551_v2, %v4549_v3  ;;  %v7483_v3 = vld [vmem:[#allocation21_spill] sm:$0xff]  ;;  %v7484_v2 = vld [vmem:[#allocation22_spill] sm:$0xff] }
 0x214   :  { %v693_v21 = vmul.f32 0.0, %v4553_v56  ;;  %v4555_v8 = vpop.eup %4554  ;;  %v7485_v56 = vld [vmem:[#allocation23_spill] sm:$0xff] }
 0x216   :  { %v5496_v7 = vadd.f32 %v694_v4, %v693_v21  ;;  %v7487_v21 = vld [vmem:[#allocation25_spill] sm:$0xff]  ;;  %v7488_v4 = vld [vmem:[#allocation26_spill] sm:$0xff] }
 0x218   :  { %4556 = vtanh.f32 %v5496_v7 }
 0x225   :  { %v4557_v1 = vpop.eup %4556 }
 0x226   :  { %v697_v59 = vmul.f32 %v4557_v1, %v4555_v8  ;;  %v7489_v8 = vld [vmem:[#allocation27_spill] sm:$0xff]  ;;  %v7490_v1 = vld [vmem:[#allocation28_spill] sm:$0xff] }
 0x228   :  { %763 = vmatmul.mubr.f32.vlgmr.msra.gmra.mxu1 %v697_v59  ;;  %834 = vmatmul.mubr.f32.vlgmr.msra.gmra.mxu0 %v697_v59  ;;  %v7491_v59 = vld [vmem:[#allocation29_spill] sm:$0xff] }
 0x229   :  { %887 = vmatpush1.msra.mxu1 %v5200_v12  ;;  %958 = vmatpush1.msra.mxu0 %v5202_v13 }
 0x22a   :  { %888 = vmatprep.subr.mxu1 %v5204_v14  ;;  %959 = vmatprep.subr.mxu0 %v5206_v15 }
 0x22b   :  { %889 = vmatpush1.msra.mxu1 %v5208_v17  ;;  %960 = vmatpush1.msra.mxu0 %v5210_v18 }
 0x22c   :  { %890 = vmatprep.subr.mxu1 %v5216_v19  ;;  %961 = vmatprep.subr.mxu0 %v5218_v20 }
 0x22d   :  { %891 = vmatpush1.msra.mxu1 %v5224_v22  ;;  %962 = vmatpush1.msra.mxu0 %v5226_v23 }
 0x22e   :  { %892 = vmatprep.subr.mxu1 %v5230_v24  ;;  %963 = vmatprep.subr.mxu0 %v5232_v25 }
 0x22f   :  { %893 = vmatpush1.msra.mxu1 %v5234_v26  ;;  %964 = vmatpush1.msra.mxu0 %v5236_v27 }
 0x230   :  { %894 = vmatprep.subr.mxu1 %v5240_v28  ;;  %965 = vmatprep.subr.mxu0 %v5242_v29 }
 0x231   :  { %895 = vmatpush1.msra.mxu1 %v5246_v30  ;;  %966 = vmatpush1.msra.mxu0 %v5248_v31 }
 0x232   :  { %896 = vmatprep.subr.mxu1 %v5252_v32  ;;  %967 = vmatprep.subr.mxu0 %v5254_v33 }
 0x233   :  { %897 = vmatpush1.msra.mxu1 %v5258_v34  ;;  %968 = vmatpush1.msra.mxu0 %v5260_v35 }
 0x234   :  { %898 = vmatprep.subr.mxu1 %v5264_v36  ;;  %969 = vmatprep.subr.mxu0 %v5266_v37 }
 0x235   :  { %899 = vmatpush1.msra.mxu1 %v5270_v38  ;;  %970 = vmatpush1.msra.mxu0 %v5272_v39 }
 0x236   :  { %900 = vmatprep.subr.mxu1 %v5276_v40  ;;  %971 = vmatprep.subr.mxu0 %v5278_v41 }
 0x237   :  { %901 = vmatpush1.msra.mxu1 %v5282_v42  ;;  %972 = vmatpush1.msra.mxu0 %v5284_v43 }
 0x238   :  { %902 = vmatprep.subr.mxu1 %v5288_v44  ;;  %973 = vmatprep.subr.mxu0 %v5290_v45 }
 0x239   :  { %903 = vmatpush1.msra.mxu1 %v5294_v46  ;;  %974 = vmatpush1.msra.mxu0 %v5296_v47 }
 0x23a   :  { %904 = vmatprep.subr.mxu1 %v5300_v48  ;;  %975 = vmatprep.subr.mxu0 %v5302_v49 }
 0x23b   :  { %905 = vmatpush1.msra.mxu1 %v5306_v50  ;;  %976 = vmatpush1.msra.mxu0 %v5308_v51 }
 0x23c   :  { %906 = vmatprep.subr.mxu1 %v5312_v52  ;;  %977 = vmatprep.subr.mxu0 %v5314_v53 }
 0x23d   :  { %907 = vmatpush1.msra.mxu1 %v7476_v61  ;;  %978 = vmatpush1.msra.mxu0 %v7477_v10 }
 0x23e   :  { %908 = vmatprep.subr.mxu1 %v7478_v6  ;;  %979 = vmatprep.subr.mxu0 %v7479_v0 }
 0x23f   :  { %909 = vmatpush1.msra.mxu1 %v7480_v11  ;;  %980 = vmatpush1.msra.mxu0 %v7481_v55 }
 0x240   :  { %910 = vmatprep.subr.mxu1 %v7482_v54  ;;  %981 = vmatprep.subr.mxu0 %v7483_v3 }
 0x241   :  { %911 = vmatpush1.msra.mxu1 %v7484_v2  ;;  %982 = vmatpush1.msra.mxu0 %v7485_v56  ;;  %v7495_v2 = vld [vmem:[#allocation33_spill] sm:$0xff]  ;;  %v7496_v56 = vld [vmem:[#allocation34_spill] sm:$0xff] }
 0x242   :  { %912 = vmatprep.subr.mxu1 %v7486_v63  ;;  %983 = vmatprep.subr.mxu0 %v7487_v21  ;;  %v7497_v63 = vmov 0.0   ;;  %v7498_v21 = vld [vmem:[#allocation35_spill] sm:$0xff] }
 0x243   :  { %913 = vmatpush1.msra.mxu1 %v7488_v4  ;;  %984 = vmatpush1.msra.mxu0 %v7489_v8  ;;  %v7499_v8 = vld [vmem:[#allocation12_spill] sm:$0xff] }
 0x244   :  { %914 = vmatprep.subr.mxu1 %v7490_v1  ;;  %985 = vmatprep.subr.mxu0 %v7491_v59  ;;  %v7500_v1 = vld [vmem:[#allocation13_spill] sm:$0xff] }
 0x245   :  { %915 = vmatpush1.msra.mxu1 %v7492_v9  ;;  %986 = vmatpush1.msra.mxu0 %v7493_v58 }
 0x246   :  { %916 = vmatprep.subr.mxu1 %v7494_v62  ;;  %987 = vmatprep.subr.mxu0 %v7495_v2 }
 0x247   :  { %917 = vmatpush1.msra.mxu1 %v7496_v56  ;;  %950 = vmatprep.mubr.f32.mxu1 %v7497_v63 }
 0x248   :  { %988 = vmatpush1.msra.mxu0 %v7498_v21  ;;  %1021 = vmatprep.mubr.f32.mxu0 %v7497_v63 }
 0x249   :  { %1074 = vmatprep.subr.mxu1 %v7499_v8  ;;  %1145 = vmatprep.subr.mxu0 %v7500_v1 }
 0x2e8   :  { %v764_v59 = vpop.f32.mrf.mxu1  ;;  %v835_v62 = vpop.f32.mrf.mxu0 }
 0x2e9   :  { %v844_v9 = vrot.slane %v764_v59, 6  ;;  %v846_v8 = vrot.slane %v835_v62, 6 }
 0x2ea   :  { %v766_v4 = vpop.f32.mrf.mxu1  ;;  %v837_v55 = vpop.f32.mrf.mxu0 }
 0x2eb   :  { %v852_v58 = vadd.f32 %v844_v9, %v5484_v57  ;;  %v845_v3 = vrot.slane %v766_v4, 6  ;;  %v847_v21 = vrot.slane %v837_v55, 6  ;;  %v854_v59 = vadd.f32 %v846_v8, %v5493_v5  ;;  %v7502_v8 = vld [vmem:[#allocation17_spill] sm:$0xff] }
 0x2ed   :  { %v4330_v2 = vmul.f32 -1.442695, %v852_v58  ;;  %v853_v56 = vadd.f32 %v845_v3, %v5486_v16  ;;  %v855_v63 = vadd.f32 %v847_v21, %v5490_v60 }
 0x2ef   :  { %4558 = vpow2.f32 %v4330_v2  ;;  %v4331_v54 = vmul.f32 -1.442695, %v853_v56  ;;  %v4332_v11 = vmul.f32 -1.442695, %v855_v63 }
 0x2f1   :  { %4560 = vpow2.f32 %v4331_v54  ;;  %v876_v54 = vrot.slane %v5496_v7, 6  ;;  %v7501_v7 = vld [vmem:[#allocation16_spill] sm:$0xff] }
 0x2f2   :  { %4562 = vpow2.f32 %v4332_v11 }
 0x2fc   :  { %v4559_v1 = vpop.eup %4558 }
 0x2fd   :  { %v859_v0 = vadd.f32 1.0, %v4559_v1  ;;  %v7503_v1 = vld [vmem:[#allocation18_spill] sm:$0xff] }
 0x2fe   :  { %v4561_v6 = vpop.eup %4560 }
 0x2ff   :  { %4564 = vrcp.f32 %v859_v0  ;;  %v865_v9 = vadd.f32 1.0, %v4561_v6  ;;  %v4563_v58 = vpop.eup %4562 }
 0x300   :  { %4566 = vtanh.f32 %v854_v59  ;;  %v872_v56 = vadd.f32 1.0, %v4563_v58  ;;  %v7504_v59 = vld [vmem:[#allocation19_spill] sm:$0xff]  ;;  %v7506_v58 = vld [vmem:[#allocation21_spill] sm:$0xff] }
 0x301   :  { %4568 = vrcp.f32 %v865_v9  ;;  %v7505_v9 = vld [vmem:[#allocation20_spill] sm:$0xff] }
 0x302   :  { %4570 = vrcp.f32 %v872_v56  ;;  %v7511_v56 = vld [vmem:[#allocation26_spill] sm:$0xff] }
 0x30c   :  { %v4565_v3 = vpop.eup %4564 }
 0x30d   :  { %v4567_v2 = vpop.eup %4566 }
 0x30e   :  { %v4569_v55 = vpop.eup %4568  ;;  %v879_v21 = vmul.f32 %v4567_v2, %v4565_v3  ;;  %v7507_v3 = vld [vmem:[#allocation22_spill] sm:$0xff]  ;;  %v7508_v2 = vld [vmem:[#allocation23_spill] sm:$0xff] }
 0x30f   :  { %v878_v62 = vmul.f32 %v4569_v55, %v876_v54  ;;  %v4571_v4 = vpop.eup %4570  ;;  %v7509_v54 = vld [vmem:[#allocation24_spill] sm:$0xff]  ;;  %v7510_v55 = vld [vmem:[#allocation25_spill] sm:$0xff] }
 0x311   :  { %v5570_v63 = vadd.f32 %v879_v21, %v878_v62  ;;  %v7512_v21 = vld [vmem:[#allocation27_spill] sm:$0xff]  ;;  %v7513_v62 = vld [vmem:[#allocation28_spill] sm:$0xff] }
 0x313   :  { %4572 = vtanh.f32 %v5570_v63 }
 0x320   :  { %v4573_v11 = vpop.eup %4572 }
 0x321   :  { %v882_v0 = vmul.f32 %v4573_v11, %v4571_v4  ;;  %v7514_v4 = vld [vmem:[#allocation29_spill] sm:$0xff]  ;;  %v7515_v11 = vld [vmem:[#allocation30_spill] sm:$0xff] }
 0x323   :  { %v884_v6 = vrot.slane %v882_v0, 2  ;;  %v7516_v0 = vld [vmem:[#allocation31_spill] sm:$0xff] }
 0x325   :  { %951 = vmatmul.mubr.f32.vlgmr.msra.gmra.mxu1 %v884_v6  ;;  %1022 = vmatmul.mubr.f32.vlgmr.msra.gmra.mxu0 %v884_v6  ;;  %v7517_v6 = vld [vmem:[#allocation32_spill] sm:$0xff] }
 0x326   :  { %1075 = vmatpush1.msra.mxu1 %v5200_v12  ;;  %1146 = vmatpush1.msra.mxu0 %v5202_v13 }
 0x327   :  { %1076 = vmatprep.subr.mxu1 %v5204_v14  ;;  %1147 = vmatprep.subr.mxu0 %v5206_v15 }
 0x328   :  { %1077 = vmatpush1.msra.mxu1 %v5208_v17  ;;  %1148 = vmatpush1.msra.mxu0 %v5210_v18 }
 0x329   :  { %1078 = vmatprep.subr.mxu1 %v5216_v19  ;;  %1149 = vmatprep.subr.mxu0 %v5218_v20 }
 0x32a   :  { %1079 = vmatpush1.msra.mxu1 %v5224_v22  ;;  %1150 = vmatpush1.msra.mxu0 %v5226_v23 }
 0x32b   :  { %1080 = vmatprep.subr.mxu1 %v5230_v24  ;;  %1151 = vmatprep.subr.mxu0 %v5232_v25 }
 0x32c   :  { %1081 = vmatpush1.msra.mxu1 %v5234_v26  ;;  %1152 = vmatpush1.msra.mxu0 %v5236_v27 }
 0x32d   :  { %1082 = vmatprep.subr.mxu1 %v5240_v28  ;;  %1153 = vmatprep.subr.mxu0 %v5242_v29 }
 0x32e   :  { %1083 = vmatpush1.msra.mxu1 %v5246_v30  ;;  %1154 = vmatpush1.msra.mxu0 %v5248_v31 }
 0x32f   :  { %1084 = vmatprep.subr.mxu1 %v5252_v32  ;;  %1155 = vmatprep.subr.mxu0 %v5254_v33 }
 0x330   :  { %1085 = vmatpush1.msra.mxu1 %v5258_v34  ;;  %1156 = vmatpush1.msra.mxu0 %v5260_v35 }
 0x331   :  { %1086 = vmatprep.subr.mxu1 %v5264_v36  ;;  %1157 = vmatprep.subr.mxu0 %v5266_v37 }
 0x332   :  { %1087 = vmatpush1.msra.mxu1 %v5270_v38  ;;  %1158 = vmatpush1.msra.mxu0 %v5272_v39 }
 0x333   :  { %1088 = vmatprep.subr.mxu1 %v5276_v40  ;;  %1159 = vmatprep.subr.mxu0 %v5278_v41 }
 0x334   :  { %1089 = vmatpush1.msra.mxu1 %v5282_v42  ;;  %1160 = vmatpush1.msra.mxu0 %v5284_v43 }
 0x335   :  { %1090 = vmatprep.subr.mxu1 %v5288_v44  ;;  %1161 = vmatprep.subr.mxu0 %v5290_v45 }
 0x336   :  { %1091 = vmatpush1.msra.mxu1 %v5294_v46  ;;  %1162 = vmatpush1.msra.mxu0 %v5296_v47 }
 0x337   :  { %1092 = vmatprep.subr.mxu1 %v5300_v48  ;;  %1163 = vmatprep.subr.mxu0 %v5302_v49 }
 0x338   :  { %1093 = vmatpush1.msra.mxu1 %v5306_v50  ;;  %1164 = vmatpush1.msra.mxu0 %v5308_v51 }
 0x339   :  { %1094 = vmatprep.subr.mxu1 %v5312_v52  ;;  %1165 = vmatprep.subr.mxu0 %v5314_v53 }
 0x33a   :  { %1095 = vmatpush1.msra.mxu1 %v7476_v61  ;;  %1166 = vmatpush1.msra.mxu0 %v7477_v10 }
 0x33b   :  { %1096 = vmatprep.subr.mxu1 %v7501_v7  ;;  %1167 = vmatprep.subr.mxu0 %v7502_v8 }
 0x33c   :  { %1097 = vmatpush1.msra.mxu1 %v7503_v1  ;;  %1168 = vmatpush1.msra.mxu0 %v7504_v59 }
 0x33d   :  { %1098 = vmatprep.subr.mxu1 %v7505_v9  ;;  %1169 = vmatprep.subr.mxu0 %v7506_v58 }
 0x33e   :  { %1099 = vmatpush1.msra.mxu1 %v7507_v3  ;;  %1170 = vmatpush1.msra.mxu0 %v7508_v2  ;;  %v7518_v3 = vld [vmem:[#allocation33_spill] sm:$0xff]  ;;  %v7519_v2 = vld [vmem:[#allocation34_spill] sm:$0xff] }
 0x33f   :  { %1100 = vmatprep.subr.mxu1 %v7509_v54  ;;  %1171 = vmatprep.subr.mxu0 %v7510_v55  ;;  %v7520_v54 = vmov 0.0   ;;  %v7521_v55 = vld [vmem:[#allocation35_spill] sm:$0xff] }
 0x340   :  { %1101 = vmatpush1.msra.mxu1 %v7511_v56  ;;  %1172 = vmatpush1.msra.mxu0 %v7512_v21  ;;  %v7522_v21 = vld [vmem:[#allocation12_spill] sm:$0xff] }
 0x341   :  { %1102 = vmatprep.subr.mxu1 %v7513_v62  ;;  %1173 = vmatprep.subr.mxu0 %v7514_v4  ;;  %v7523_v62 = vld [vmem:[#allocation13_spill] sm:$0xff] }
 0x342   :  { %1103 = vmatpush1.msra.mxu1 %v7515_v11  ;;  %1174 = vmatpush1.msra.mxu0 %v7516_v0 }
 0x343   :  { %1104 = vmatprep.subr.mxu1 %v7517_v6  ;;  %1175 = vmatprep.subr.mxu0 %v7518_v3 }
 0x344   :  { %1105 = vmatpush1.msra.mxu1 %v7519_v2  ;;  %1138 = vmatprep.mubr.f32.mxu1 %v7520_v54 }
 0x345   :  { %1176 = vmatpush1.msra.mxu0 %v7521_v55  ;;  %1209 = vmatprep.mubr.f32.mxu0 %v7520_v54 }
 0x346   :  { %1262 = vmatprep.subr.mxu1 %v7522_v21  ;;  %1333 = vmatprep.subr.mxu0 %v7523_v62 }
 0x3e5   :  { %v952_v4 = vpop.f32.mrf.mxu1  ;;  %v1023_v6 = vpop.f32.mrf.mxu0 }
 0x3e6   :  { %v1032_v11 = vrot.slane %v952_v4, 4  ;;  %v1034_v21 = vrot.slane %v1023_v6, 4 }
 0x3e7   :  { %v954_v56 = vpop.f32.mrf.mxu1  ;;  %v1025_v59 = vpop.f32.mrf.mxu0 }
 0x3e8   :  { %v1040_v0 = vadd.f32 %v1032_v11, %v5484_v57  ;;  %v1033_v58 = vrot.slane %v954_v56, 4  ;;  %v1035_v55 = vrot.slane %v1025_v59, 4  ;;  %v1042_v4 = vadd.f32 %v1034_v21, %v5493_v5 }
 0x3ea   :  { %v4333_v3 = vmul.f32 -1.442695, %v1040_v0  ;;  %v1041_v2 = vadd.f32 %v1033_v58, %v5486_v16  ;;  %v1043_v54 = vadd.f32 %v1035_v55, %v5490_v60 }
 0x3ec   :  { %4574 = vpow2.f32 %v4333_v3  ;;  %v4334_v9 = vmul.f32 -1.442695, %v1041_v2  ;;  %v4335_v1 = vmul.f32 -1.442695, %v1043_v54 }
 0x3ee   :  { %4576 = vpow2.f32 %v4334_v9  ;;  %v1064_v9 = vrot.slane %v5570_v63, 6 }
 0x3ef   :  { %4578 = vpow2.f32 %v4335_v1 }
 0x3f9   :  { %v4575_v62 = vpop.eup %4574 }
 0x3fa   :  { %v1047_v8 = vadd.f32 1.0, %v4575_v62 }
 0x3fb   :  { %v4577_v7 = vpop.eup %4576 }
 0x3fc   :  { %4580 = vrcp.f32 %v1047_v8  ;;  %v1053_v56 = vadd.f32 1.0, %v4577_v7  ;;  %v4579_v58 = vpop.eup %4578 }
 0x3fd   :  { %4582 = vtanh.f32 %v1042_v4  ;;  %v1060_v11 = vadd.f32 1.0, %v4579_v58 }
 0x3fe   :  { %4584 = vrcp.f32 %v1053_v56 }
 0x3ff   :  { %4586 = vrcp.f32 %v1060_v11  ;;  %v5728_v11 = vld [vmem:[#allocation4 + $0x1f0] sm:$0xff] }
 0x409   :  { %v4581_v3 = vpop.eup %4580 }
 0x40a   :  { %v4583_v2 = vpop.eup %4582 }
 0x40b   :  { %v4585_v59 = vpop.eup %4584  ;;  %v1067_v55 = vmul.f32 %v4583_v2, %v4581_v3 }
 0x40c   :  { %v1066_v0 = vmul.f32 %v4585_v59, %v1064_v9  ;;  %v4587_v6 = vpop.eup %4586  ;;  %v5725_v59 = vld [vmem:[#allocation4 + $0x1e0] sm:$0xff] }
 0x40e   :  { %v5644_v54 = vadd.f32 %v1067_v55, %v1066_v0  ;;  %v5731_v55 = vld [vmem:[#allocation4 + $0x1c8] sm:$0xff]  ;;  %v5734_v0 = vld [vmem:[#allocation4 + $0x1d8] sm:$0xff] }
 0x410   :  { %4588 = vtanh.f32 %v5644_v54  ;;  %v1252_v21 = vrot.slane %v5644_v54, 6  ;;  %v5737_v54 = vld [vmem:[#allocation4 + $0x1c0] sm:$0xff] }
 0x41d   :  { %v4589_v1 = vpop.eup %4588 }
 0x41e   :  { %v1070_v8 = vmul.f32 %v4589_v1, %v4587_v6  ;;  %v5740_v6 = vld [vmem:[#allocation4 + $0x1d0] sm:$0xff]  ;;  %v5743_v1 = vld [vmem:[#allocation4 + $0x1a8] sm:$0xff] }
 0x420   :  { %v1072_v7 = vrot.slane %v1070_v8, 4  ;;  %v5746_v8 = vld [vmem:[#allocation4 + $0x1b8] sm:$0xff] }
 0x422   :  { %1139 = vmatmul.mubr.f32.vlgmr.msra.gmra.mxu1 %v1072_v7  ;;  %1210 = vmatmul.mubr.f32.vlgmr.msra.gmra.mxu0 %v1072_v7  ;;  %v5749_v7 = vld [vmem:[#allocation4 + $0x1a0] sm:$0xff] }
 0x423   :  { %1263 = vmatpush1.msra.mxu1 %v5200_v12  ;;  %1334 = vmatpush1.msra.mxu0 %v5202_v13  ;;  %v7524_v12 = vld [vmem:[#allocation16_spill] sm:$0xff]  ;;  %v7525_v13 = vld [vmem:[#allocation17_spill] sm:$0xff] }
 0x424   :  { %1264 = vmatprep.subr.mxu1 %v5204_v14  ;;  %1335 = vmatprep.subr.mxu0 %v5206_v15  ;;  %v7526_v14 = vld [vmem:[#allocation18_spill] sm:$0xff]  ;;  %v7527_v15 = vld [vmem:[#allocation19_spill] sm:$0xff] }
 0x425   :  { %1265 = vmatpush1.msra.mxu1 %v5208_v17  ;;  %1336 = vmatpush1.msra.mxu0 %v5210_v18  ;;  %v7528_v17 = vld [vmem:[#allocation20_spill] sm:$0xff]  ;;  %v7529_v18 = vld [vmem:[#allocation21_spill] sm:$0xff] }
 0x426   :  { %1266 = vmatprep.subr.mxu1 %v5216_v19  ;;  %1337 = vmatprep.subr.mxu0 %v5218_v20  ;;  %v7530_v19 = vld [vmem:[#allocation22_spill] sm:$0xff]  ;;  %v7531_v20 = vld [vmem:[#allocation23_spill] sm:$0xff] }
 0x427   :  { %1267 = vmatpush1.msra.mxu1 %v5224_v22  ;;  %1338 = vmatpush1.msra.mxu0 %v5226_v23  ;;  %v7532_v22 = vld [vmem:[#allocation24_spill] sm:$0xff]  ;;  %v7533_v23 = vld [vmem:[#allocation25_spill] sm:$0xff] }
 0x428   :  { %1268 = vmatprep.subr.mxu1 %v5230_v24  ;;  %1339 = vmatprep.subr.mxu0 %v5232_v25  ;;  %v7534_v24 = vld [vmem:[#allocation26_spill] sm:$0xff]  ;;  %v7535_v25 = vld [vmem:[#allocation27_spill] sm:$0xff] }
 0x429   :  { %1269 = vmatpush1.msra.mxu1 %v5234_v26  ;;  %1340 = vmatpush1.msra.mxu0 %v5236_v27  ;;  %v7536_v26 = vld [vmem:[#allocation28_spill] sm:$0xff]  ;;  %v7537_v27 = vld [vmem:[#allocation29_spill] sm:$0xff] }
 0x42a   :  { %1270 = vmatprep.subr.mxu1 %v5240_v28  ;;  %1341 = vmatprep.subr.mxu0 %v5242_v29  ;;  %v7538_v28 = vld [vmem:[#allocation30_spill] sm:$0xff]  ;;  %v7539_v29 = vld [vmem:[#allocation31_spill] sm:$0xff] }
 0x42b   :  { %1271 = vmatpush1.msra.mxu1 %v5246_v30  ;;  %1342 = vmatpush1.msra.mxu0 %v5248_v31  ;;  %v7540_v30 = vld [vmem:[#allocation32_spill] sm:$0xff]  ;;  %v7541_v31 = vld [vmem:[#allocation33_spill] sm:$0xff] }
 0x42c   :  { %1272 = vmatprep.subr.mxu1 %v5252_v32  ;;  %1343 = vmatprep.subr.mxu0 %v5254_v33  ;;  %v7542_v32 = vld [vmem:[#allocation34_spill] sm:$0xff]  ;;  %v7543_v33 = vmov 0.0  }
 0x42d   :  { %1273 = vmatpush1.msra.mxu1 %v5258_v34  ;;  %1344 = vmatpush1.msra.mxu0 %v5260_v35  ;;  %v7544_v34 = vld [vmem:[#allocation35_spill] sm:$0xff]  ;;  %v5711_v35 = vld [vmem:[#allocation4 + $0x1e8] sm:$0xff] }
 0x42e   :  { %1274 = vmatprep.subr.mxu1 %v5264_v36  ;;  %1345 = vmatprep.subr.mxu0 %v5266_v37  ;;  %7545 = vst [vmem:[#allocation14_spill] sm:$0xff] %v5711_v35  ;;  %v5714_v36 = vld [vmem:[#allocation4 + $0x1f8] sm:$0xff] }
 0x42f   :  { %1275 = vmatpush1.msra.mxu1 %v5270_v38  ;;  %1346 = vmatpush1.msra.mxu0 %v5272_v39  ;;  %7546 = vst [vmem:[#allocation15_spill] sm:$0xff] %v5714_v36 }
 0x430   :  { %1276 = vmatprep.subr.mxu1 %v5276_v40  ;;  %1347 = vmatprep.subr.mxu0 %v5278_v41 }
 0x431   :  { %1277 = vmatpush1.msra.mxu1 %v5282_v42  ;;  %1348 = vmatpush1.msra.mxu0 %v5284_v43 }
 0x432   :  { %1278 = vmatprep.subr.mxu1 %v5288_v44  ;;  %1349 = vmatprep.subr.mxu0 %v5290_v45 }
 0x433   :  { %1279 = vmatpush1.msra.mxu1 %v5294_v46  ;;  %1350 = vmatpush1.msra.mxu0 %v5296_v47 }
 0x434   :  { %1280 = vmatprep.subr.mxu1 %v5300_v48  ;;  %1351 = vmatprep.subr.mxu0 %v5302_v49 }
 0x435   :  { %1281 = vmatpush1.msra.mxu1 %v5306_v50  ;;  %1352 = vmatpush1.msra.mxu0 %v5308_v51 }
 0x436   :  { %1282 = vmatprep.subr.mxu1 %v5312_v52  ;;  %1353 = vmatprep.subr.mxu0 %v5314_v53 }
 0x437   :  { %1283 = vmatpush1.msra.mxu1 %v7476_v61  ;;  %1354 = vmatpush1.msra.mxu0 %v7477_v10 }
 0x438   :  { %1284 = vmatprep.subr.mxu1 %v7524_v12  ;;  %1355 = vmatprep.subr.mxu0 %v7525_v13  ;;  %v5752_v12 = vld [vmem:[#allocation4 + $0x1b0] sm:$0xff]  ;;  %v5755_v13 = vld [vmem:[#allocation4 + $0x188] sm:$0xff] }
 0x439   :  { %1285 = vmatpush1.msra.mxu1 %v7526_v14  ;;  %1356 = vmatpush1.msra.mxu0 %v7527_v15  ;;  %v5758_v14 = vld [vmem:[#allocation4 + $0x198] sm:$0xff]  ;;  %v5761_v15 = vld [vmem:[#allocation4 + $0x180] sm:$0xff] }
 0x43a   :  { %1286 = vmatprep.subr.mxu1 %v7528_v17  ;;  %1357 = vmatprep.subr.mxu0 %v7529_v18  ;;  %v5764_v17 = vld [vmem:[#allocation4 + $0x190] sm:$0xff]  ;;  %v5767_v18 = vld [vmem:[#allocation4 + $0x168] sm:$0xff] }
 0x43b   :  { %1287 = vmatpush1.msra.mxu1 %v7530_v19  ;;  %1358 = vmatpush1.msra.mxu0 %v7531_v20  ;;  %v5770_v19 = vld [vmem:[#allocation4 + $0x178] sm:$0xff]  ;;  %v5773_v20 = vld [vmem:[#allocation4 + $0x160] sm:$0xff] }
 0x43c   :  { %1288 = vmatprep.subr.mxu1 %v7532_v22  ;;  %1359 = vmatprep.subr.mxu0 %v7533_v23  ;;  %v5776_v22 = vld [vmem:[#allocation4 + $0x170] sm:$0xff]  ;;  %v5779_v23 = vld [vmem:[#allocation4 + $0x148] sm:$0xff] }
 0x43d   :  { %1289 = vmatpush1.msra.mxu1 %v7534_v24  ;;  %1360 = vmatpush1.msra.mxu0 %v7535_v25  ;;  %v5782_v24 = vld [vmem:[#allocation4 + $0x158] sm:$0xff]  ;;  %v5785_v25 = vld [vmem:[#allocation4 + $0x140] sm:$0xff] }
 0x43e   :  { %1290 = vmatprep.subr.mxu1 %v7536_v26  ;;  %1361 = vmatprep.subr.mxu0 %v7537_v27  ;;  %v5788_v26 = vld [vmem:[#allocation4 + $0x150] sm:$0xff]  ;;  %v5791_v27 = vld [vmem:[#allocation4 + $0x128] sm:$0xff] }
 0x43f   :  { %1291 = vmatpush1.msra.mxu1 %v7538_v28  ;;  %1362 = vmatpush1.msra.mxu0 %v7539_v29  ;;  %v5794_v28 = vld [vmem:[#allocation4 + $0x138] sm:$0xff]  ;;  %v5797_v29 = vld [vmem:[#allocation4 + $0x120] sm:$0xff] }
 0x440   :  { %1292 = vmatprep.subr.mxu1 %v7540_v30  ;;  %1363 = vmatprep.subr.mxu0 %v7541_v31  ;;  %v5800_v30 = vld [vmem:[#allocation4 + $0x130] sm:$0xff]  ;;  %v5803_v31 = vld [vmem:[#allocation4 + $0x108] sm:$0xff] }
 0x441   :  { %1293 = vmatpush1.msra.mxu1 %v7542_v32  ;;  %1326 = vmatprep.mubr.f32.mxu1 %v7543_v33  ;;  %v5806_v32 = vld [vmem:[#allocation4 + $0x118] sm:$0xff] }
 0x442   :  { %1364 = vmatpush1.msra.mxu0 %v7544_v34  ;;  %1397 = vmatprep.mubr.f32.mxu0 %v7543_v33  ;;  %v5809_v34 = vld [vmem:[#allocation4 + $0x100] sm:$0xff] }
 0x443   :  { %1435 = vmatprep.subr.mxu1 %v5711_v35  ;;  %1506 = vmatprep.subr.mxu0 %v5714_v36 }
 0x4e2   :  { %v1140_v37 = vpop.f32.mrf.mxu1  ;;  %v1211_v41 = vpop.f32.mrf.mxu0 }
 0x4e3   :  { %v1220_v38 = vrot.slane %v1140_v37, 2  ;;  %v1222_v49 = vrot.slane %v1211_v41, 2  ;;  %v5812_v37 = vld [vmem:[#allocation4 + $0x110] sm:$0xff] }
 0x4e4   :  { %v1142_v39 = vpop.f32.mrf.mxu1  ;;  %v1213_v46 = vpop.f32.mrf.mxu0  ;;  %v5824_v41 = vld [vmem:[#allocation4 + $0xf0] sm:$0xff] }
 0x4e5   :  { %v1228_v40 = vadd.f32 %v1220_v38, %v5484_v57  ;;  %v1221_v42 = vrot.slane %v1142_v39, 2  ;;  %v1223_v47 = vrot.slane %v1213_v46, 2  ;;  %v1230_v52 = vadd.f32 %v1222_v49, %v5493_v5  ;;  %v5815_v38 = vld [vmem:[#allocation4 + $0xe8] sm:$0xff]  ;;  %v5818_v39 = vld [vmem:[#allocation4 + $0xf8] sm:$0xff]  ;;  %v5848_v49 = vld [vmem:[#allocation4 + $0xb0] sm:$0xff] }
 0x4e6   :  { %v5839_v46 = vld [vmem:[#allocation4 + $0xa8] sm:$0xff] }
 0x4e7   :  { %v4336_v43 = vmul.f32 -1.442695, %v1228_v40  ;;  %v1229_v44 = vadd.f32 %v1221_v42, %v5486_v16  ;;  %v1231_v48 = vadd.f32 %v1223_v47, %v5490_v60  ;;  %v5821_v40 = vld [vmem:[#allocation4 + $0xe0] sm:$0xff]  ;;  %v5827_v42 = vld [vmem:[#allocation4 + $0xc8] sm:$0xff]  ;;  %v5842_v47 = vld [vmem:[#allocation4 + $0xb8] sm:$0xff] }
 0x4e9   :  { %4590 = vpow2.f32 %v4336_v43  ;;  %v4337_v45 = vmul.f32 -1.442695, %v1229_v44  ;;  %v4338_v50 = vmul.f32 -1.442695, %v1231_v48  ;;  %v5830_v43 = vld [vmem:[#allocation4 + $0xd8] sm:$0xff]  ;;  %v5833_v44 = vld [vmem:[#allocation4 + $0xc0] sm:$0xff] }
 0x4ea   :  { %v5845_v48 = vld [vmem:[#allocation4 + $0xa0] sm:$0xff] }
 0x4eb   :  { %4592 = vpow2.f32 %v4337_v45  ;;  %v5836_v45 = vld [vmem:[#allocation4 + $0xd0] sm:$0xff] }
 0x4ec   :  { %4594 = vpow2.f32 %v4338_v50  ;;  %v5851_v50 = vld [vmem:[#allocation4 + $0x88] sm:$0xff] }
 0x4ed   :  { %7547 = vst [vmem:[#allocation12_spill] sm:$0xff] %v5851_v50 }
 0x4f6   :  { %v4591_v51 = vpop.eup %4590 }
 0x4f7   :  { %v1235_v53 = vadd.f32 1.0, %v4591_v51  ;;  %v5854_v51 = vld [vmem:[#allocation4 + $0x98] sm:$0xff] }
 0x4f8   :  { %v4593_v61 = vpop.eup %4592  ;;  %7548 = vst [vmem:[#allocation13_spill] sm:$0xff] %v5854_v51 }
 0x4f9   :  { %4596 = vrcp.f32 %v1235_v53  ;;  %v1241_v57 = vadd.f32 1.0, %v4593_v61  ;;  %v4595_v16 = vpop.eup %4594  ;;  %v5860_v53 = vld [vmem:[#allocation4 + $0x90] sm:$0xff]  ;;  %v5863_v61 = vld [vmem:[#allocation4 + $0x68] sm:$0xff] }
 0x4fa   :  { %4598 = vtanh.f32 %v1230_v52  ;;  %v1248_v4 = vadd.f32 1.0, %v4595_v16  ;;  %v5857_v52 = vld [vmem:[#allocation4 + $0x80] sm:$0xff]  ;;  %7550 = vst [vmem:[#allocation17_spill] sm:$0xff] %v5860_v53  ;;  %7551 = vst [vmem:[#allocation18_spill] sm:$0xff] %v5863_v61 }
 0x4fb   :  { %4600 = vrcp.f32 %v1241_v57  ;;  %7549 = vst [vmem:[#allocation16_spill] sm:$0xff] %v5857_v52  ;;  %v5866_v57 = vld [vmem:[#allocation4 + $0x78] sm:$0xff]  ;;  %v5869_v16 = vld [vmem:[#allocation4 + $0x60] sm:$0xff] }
 0x4fc   :  { %4602 = vrcp.f32 %v1248_v4  ;;  %7552 = vst [vmem:[#allocation19_spill] sm:$0xff] %v5866_v57  ;;  %7553 = vst [vmem:[#allocation20_spill] sm:$0xff] %v5869_v16  ;;  %v5884_v4 = vld [vmem:[#allocation4 + $0x50] sm:$0xff] }
 0x4fd   :  { %7558 = vst [vmem:[#allocation25_spill] sm:$0xff] %v5884_v4 }
 0x506   :  { %v4597_v10 = vpop.eup %4596 }
 0x507   :  { %v4599_v63 = vpop.eup %4598 }
 0x508   :  { %v4601_v62 = vpop.eup %4600  ;;  %v1255_v60 = vmul.f32 %v4599_v63, %v4597_v10  ;;  %v5872_v10 = vld [vmem:[#allocation4 + $0x70] sm:$0xff]  ;;  %v5875_v63 = vld [vmem:[#allocation4 + $0x48] sm:$0xff] }
 0x509   :  { %v1254_v56 = vmul.f32 %v4601_v62, %v1252_v21  ;;  %v4603_v5 = vpop.eup %4602  ;;  %7554 = vst [vmem:[#allocation21_spill] sm:$0xff] %v5872_v10  ;;  %7555 = vst [vmem:[#allocation22_spill] sm:$0xff] %v5875_v63  ;;  %v5878_v21 = vld [vmem:[#allocation4 + $0x58] sm:$0xff]  ;;  %v5881_v62 = vld [vmem:[#allocation4 + $0x40] sm:$0xff] }
 0x50a   :  { %7556 = vst [vmem:[#allocation23_spill] sm:$0xff] %v5878_v21  ;;  %7557 = vst [vmem:[#allocation24_spill] sm:$0xff] %v5881_v62 }
 0x50b   :  { %v5722_v58 = vadd.f32 %v1255_v60, %v1254_v56  ;;  %v5887_v60 = vld [vmem:[#allocation4 + $0x28] sm:$0xff]  ;;  %v5890_v56 = vld [vmem:[#allocation4 + $0x38] sm:$0xff] }
 0x50c   :  { %7559 = vst [vmem:[#allocation26_spill] sm:$0xff] %v5887_v60  ;;  %7560 = vst [vmem:[#allocation27_spill] sm:$0xff] %v5890_v56 }
 0x50d   :  { %4604 = vtanh.f32 %v5722_v58 }
 0x51a   :  { %v4605_v3 = vpop.eup %4604 }
 0x51b   :  { %v1258_v2 = vmul.f32 %v4605_v3, %v4603_v5  ;;  %v5893_v5 = vld [vmem:[#allocation4 + $0x20] sm:$0xff]  ;;  %v5896_v3 = vld [vmem:[#allocation4 + $0x30] sm:$0xff] }
 0x51c   :  { %7561 = vst [vmem:[#allocation28_spill] sm:$0xff] %v5893_v5  ;;  %7562 = vst [vmem:[#allocation29_spill] sm:$0xff] %v5896_v3 }
 0x51d   :  { %v1260_v9 = vrot.slane %v1258_v2, 6  ;;  %v5899_v2 = vld [vmem:[#allocation4 + $0x8] sm:$0xff] }
 0x51e   :  { %7563 = vst [vmem:[#allocation30_spill] sm:$0xff] %v5899_v2 }
 0x51f   :  { %1327 = vmatmul.mubr.f32.vlgmr.msra.gmra.mxu1 %v1260_v9  ;;  %1398 = vmatmul.mubr.f32.vlgmr.msra.gmra.mxu0 %v1260_v9  ;;  %v5902_v9 = vld [vmem:[#allocation4 + $0x18] sm:$0xff] }
 0x520   :  { %1436 = vmatpush1.msra.mxu1 %v5725_v59  ;;  %1507 = vmatpush1.msra.mxu0 %v5728_v11  ;;  %7564 = vst [vmem:[#allocation31_spill] sm:$0xff] %v5902_v9 }
 0x521   :  { %1437 = vmatprep.subr.mxu1 %v5731_v55  ;;  %1508 = vmatprep.subr.mxu0 %v5734_v0 }
 0x522   :  { %1438 = vmatpush1.msra.mxu1 %v5737_v54  ;;  %1509 = vmatpush1.msra.mxu0 %v5740_v6 }
 0x523   :  { %1439 = vmatprep.subr.mxu1 %v5743_v1  ;;  %1510 = vmatprep.subr.mxu0 %v5746_v8 }
 0x524   :  { %1440 = vmatpush1.msra.mxu1 %v5749_v7  ;;  %1511 = vmatpush1.msra.mxu0 %v5752_v12 }
 0x525   :  { %1441 = vmatprep.subr.mxu1 %v5755_v13  ;;  %1512 = vmatprep.subr.mxu0 %v5758_v14 }
 0x526   :  { %1442 = vmatpush1.msra.mxu1 %v5761_v15  ;;  %1513 = vmatpush1.msra.mxu0 %v5764_v17 }
 0x527   :  { %1443 = vmatprep.subr.mxu1 %v5767_v18  ;;  %1514 = vmatprep.subr.mxu0 %v5770_v19 }
 0x528   :  { %1444 = vmatpush1.msra.mxu1 %v5773_v20  ;;  %1515 = vmatpush1.msra.mxu0 %v5776_v22 }
 0x529   :  { %1445 = vmatprep.subr.mxu1 %v5779_v23  ;;  %1516 = vmatprep.subr.mxu0 %v5782_v24 }
 0x52a   :  { %1446 = vmatpush1.msra.mxu1 %v5785_v25  ;;  %1517 = vmatpush1.msra.mxu0 %v5788_v26 }
 0x52b   :  { %1447 = vmatprep.subr.mxu1 %v5791_v27  ;;  %1518 = vmatprep.subr.mxu0 %v5794_v28 }
 0x52c   :  { %1448 = vmatpush1.msra.mxu1 %v5797_v29  ;;  %1519 = vmatpush1.msra.mxu0 %v5800_v30 }
 0x52d   :  { %1449 = vmatprep.subr.mxu1 %v5803_v31  ;;  %1520 = vmatprep.subr.mxu0 %v5806_v32 }
 0x52e   :  { %1450 = vmatpush1.msra.mxu1 %v5809_v34  ;;  %1521 = vmatpush1.msra.mxu0 %v5812_v37 }
 0x52f   :  { %1451 = vmatprep.subr.mxu1 %v5815_v38  ;;  %1522 = vmatprep.subr.mxu0 %v5818_v39 }
 0x530   :  { %1452 = vmatpush1.msra.mxu1 %v5821_v40  ;;  %1523 = vmatpush1.msra.mxu0 %v5824_v41 }
 0x531   :  { %1453 = vmatprep.subr.mxu1 %v5827_v42  ;;  %1524 = vmatprep.subr.mxu0 %v5830_v43 }
 0x532   :  { %1454 = vmatpush1.msra.mxu1 %v5833_v44  ;;  %1525 = vmatpush1.msra.mxu0 %v5836_v45 }
 0x533   :  { %1455 = vmatprep.subr.mxu1 %v5839_v46  ;;  %1526 = vmatprep.subr.mxu0 %v5842_v47 }
 0x534   :  { %1456 = vmatpush1.msra.mxu1 %v5845_v48  ;;  %1527 = vmatpush1.msra.mxu0 %v5848_v49 }
 0x535   :  { %1457 = vmatprep.subr.mxu1 %v5851_v50  ;;  %1528 = vmatprep.subr.mxu0 %v5854_v51 }
 0x536   :  { %1458 = vmatpush1.msra.mxu1 %v5857_v52  ;;  %1529 = vmatpush1.msra.mxu0 %v5860_v53 }
 0x537   :  { %1459 = vmatprep.subr.mxu1 %v5863_v61  ;;  %1530 = vmatprep.subr.mxu0 %v5866_v57  ;;  %v7570_v61 = vld [vmem:[#allocation41_spill] sm:$0xff] }
 0x538   :  { %1460 = vmatpush1.msra.mxu1 %v5869_v16  ;;  %1531 = vmatpush1.msra.mxu0 %v5872_v10  ;;  %v7569_v16 = vld [vmem:[#allocation43_spill] sm:$0xff] }
 0x539   :  { %1461 = vmatprep.subr.mxu1 %v5875_v63  ;;  %1532 = vmatprep.subr.mxu0 %v5878_v21 }
 0x53a   :  { %1462 = vmatpush1.msra.mxu1 %v5881_v62  ;;  %1533 = vmatpush1.msra.mxu0 %v5884_v4  ;;  %v7568_v62 = vld [vmem:[#allocation42_spill] sm:$0xff] }
 0x53b   :  { %1463 = vmatprep.subr.mxu1 %v5887_v60  ;;  %1534 = vmatprep.subr.mxu0 %v5890_v56  ;;  %v5905_v60 = vld [vmem:[#allocation4] sm:$0xff]  ;;  %v5909_v56 = vld [vmem:[#allocation4 + $0x10] sm:$0xff] }
 0x53c   :  { %1464 = vmatpush1.msra.mxu1 %v5893_v5  ;;  %1535 = vmatpush1.msra.mxu0 %v5896_v3  ;;  %7565 = vst [vmem:[#allocation32_spill] sm:$0xff] %v5905_v60  ;;  %7566 = vst [vmem:[#allocation33_spill] sm:$0xff] %v5909_v56  ;;  %v7567_v3 = vld [vmem:[#allocation40_spill] sm:$0xff] }
 0x53d   :  { %1465 = vmatprep.subr.mxu1 %v5899_v2  ;;  %1536 = vmatprep.subr.mxu0 %v5902_v9 }
 0x53e   :  { %1466 = vmatpush1.msra.mxu1 %v5905_v60  ;;  %1499 = vmatprep.mubr.f32.mxu1 %v7543_v33 }
 0x53f   :  { %1537 = vmatpush1.msra.mxu0 %v5909_v56  ;;  %1570 = vmatprep.mubr.f32.mxu0 %v7543_v33 }
 0x540   :  { %1623 = vmatprep.subr.mxu1 %v5711_v35  ;;  %1694 = vmatprep.subr.mxu0 %v5714_v36 }
 0x5df   :  { %v1328_v2 = vpop.f32.mrf.mxu1  ;;  %v1399_v60 = vpop.f32.mrf.mxu0 }
 0x5e0   :  { %v1404_v5 = vadd.f32 %v1328_v2, %v7567_v3  ;;  %v1406_v35 = vadd.f32 %v1399_v60, %v7570_v61  ;;  %v7575_v60 = vld [vmem:[#allocation21_spill] sm:$0xff] }
 0x5e1   :  { %v1330_v9 = vpop.f32.mrf.mxu1  ;;  %v1401_v10 = vpop.f32.mrf.mxu0 }
 0x5e2   :  { %v4339_v4 = vmul.f32 -1.442695, %v1404_v5  ;;  %v1405_v21 = vadd.f32 %v1330_v9, %v7568_v62  ;;  %v1407_v56 = vadd.f32 %v1401_v10, %v7569_v16 }
 0x5e4   :  { %4606 = vpow2.f32 %v4339_v4  ;;  %v4340_v63 = vmul.f32 -1.442695, %v1405_v21  ;;  %v4341_v57 = vmul.f32 -1.442695, %v1407_v56  ;;  %v1428_v21 = vrot.slane %v5722_v58, 6  ;;  %v7573_v58 = vld [vmem:[#allocation19_spill] sm:$0xff] }
 0x5e6   :  { %4608 = vpow2.f32 %v4340_v63 }
 0x5e7   :  { %4610 = vpow2.f32 %v4341_v57 }
 0x5f1   :  { %v4607_v33 = vpop.eup %4606 }
 0x5f2   :  { %v1411_v53 = vadd.f32 1.0, %v4607_v33 }
 0x5f3   :  { %v4609_v36 = vpop.eup %4608 }
 0x5f4   :  { %4612 = vrcp.f32 %v1411_v53  ;;  %v1417_v2 = vadd.f32 1.0, %v4609_v36  ;;  %v4611_v5 = vpop.eup %4610  ;;  %v7572_v36 = vld [vmem:[#allocation18_spill] sm:$0xff] }
 0x5f5   :  { %4614 = vtanh.f32 %v1406_v35  ;;  %v1424_v62 = vadd.f32 1.0, %v4611_v5  ;;  %v7571_v35 = vld [vmem:[#allocation17_spill] sm:$0xff]  ;;  %v7578_v5 = vld [vmem:[#allocation24_spill] sm:$0xff] }
 0x5f6   :  { %4616 = vrcp.f32 %v1417_v2  ;;  %v7577_v2 = vld [vmem:[#allocation23_spill] sm:$0xff] }
 0x5f7   :  { %4618 = vrcp.f32 %v1424_v62  ;;  %v7574_v62 = vld [vmem:[#allocation20_spill] sm:$0xff] }
 0x601   :  { %v4613_v9 = vpop.eup %4612 }
 0x602   :  { %v4615_v4 = vpop.eup %4614 }
 0x603   :  { %v4617_v63 = vpop.eup %4616  ;;  %v1431_v3 = vmul.f32 %v4615_v4, %v4613_v9  ;;  %v7579_v9 = vld [vmem:[#allocation25_spill] sm:$0xff]  ;;  %v7580_v4 = vld [vmem:[#allocation26_spill] sm:$0xff] }
 0x604   :  { %v1430_v10 = vmul.f32 %v4617_v63, %v1428_v21  ;;  %v4619_v33 = vpop.eup %4618  ;;  %v7581_v21 = vld [vmem:[#allocation27_spill] sm:$0xff]  ;;  %v7582_v63 = vld [vmem:[#allocation28_spill] sm:$0xff] }
 0x606   :  { %v5920_v56 = vadd.f32 %v1431_v3, %v1430_v10  ;;  %v7576_v3 = vld [vmem:[#allocation22_spill] sm:$0xff]  ;;  %v7583_v10 = vld [vmem:[#allocation29_spill] sm:$0xff] }
 0x608   :  { %4620 = vtanh.f32 %v5920_v56 }
 0x615   :  { %v4621_v57 = vpop.eup %4620 }
 0x616   :  { %v1434_v53 = vmul.f32 %v4621_v57, %v4619_v33  ;;  %v7584_v33 = vld [vmem:[#allocation30_spill] sm:$0xff]  ;;  %v7585_v57 = vld [vmem:[#allocation31_spill] sm:$0xff] }
 0x618   :  { %1500 = vmatmul.mubr.f32.vlgmr.msra.gmra.mxu1 %v1434_v53  ;;  %1571 = vmatmul.mubr.f32.vlgmr.msra.gmra.mxu0 %v1434_v53  ;;  %v7586_v53 = vld [vmem:[#allocation32_spill] sm:$0xff] }
 0x619   :  { %1624 = vmatpush1.msra.mxu1 %v5725_v59  ;;  %1695 = vmatpush1.msra.mxu0 %v5728_v11 }
 0x61a   :  { %1625 = vmatprep.subr.mxu1 %v5731_v55  ;;  %1696 = vmatprep.subr.mxu0 %v5734_v0 }
 0x61b   :  { %1626 = vmatpush1.msra.mxu1 %v5737_v54  ;;  %1697 = vmatpush1.msra.mxu0 %v5740_v6 }
 0x61c   :  { %1627 = vmatprep.subr.mxu1 %v5743_v1  ;;  %1698 = vmatprep.subr.mxu0 %v5746_v8 }
 0x61d   :  { %1628 = vmatpush1.msra.mxu1 %v5749_v7  ;;  %1699 = vmatpush1.msra.mxu0 %v5752_v12 }
 0x61e   :  { %1629 = vmatprep.subr.mxu1 %v5755_v13  ;;  %1700 = vmatprep.subr.mxu0 %v5758_v14 }
 0x61f   :  { %1630 = vmatpush1.msra.mxu1 %v5761_v15  ;;  %1701 = vmatpush1.msra.mxu0 %v5764_v17 }
 0x620   :  { %1631 = vmatprep.subr.mxu1 %v5767_v18  ;;  %1702 = vmatprep.subr.mxu0 %v5770_v19 }
 0x621   :  { %1632 = vmatpush1.msra.mxu1 %v5773_v20  ;;  %1703 = vmatpush1.msra.mxu0 %v5776_v22 }
 0x622   :  { %1633 = vmatprep.subr.mxu1 %v5779_v23  ;;  %1704 = vmatprep.subr.mxu0 %v5782_v24 }
 0x623   :  { %1634 = vmatpush1.msra.mxu1 %v5785_v25  ;;  %1705 = vmatpush1.msra.mxu0 %v5788_v26 }
 0x624   :  { %1635 = vmatprep.subr.mxu1 %v5791_v27  ;;  %1706 = vmatprep.subr.mxu0 %v5794_v28 }
 0x625   :  { %1636 = vmatpush1.msra.mxu1 %v5797_v29  ;;  %1707 = vmatpush1.msra.mxu0 %v5800_v30 }
 0x626   :  { %1637 = vmatprep.subr.mxu1 %v5803_v31  ;;  %1708 = vmatprep.subr.mxu0 %v5806_v32 }
 0x627   :  { %1638 = vmatpush1.msra.mxu1 %v5809_v34  ;;  %1709 = vmatpush1.msra.mxu0 %v5812_v37 }
 0x628   :  { %1639 = vmatprep.subr.mxu1 %v5815_v38  ;;  %1710 = vmatprep.subr.mxu0 %v5818_v39 }
 0x629   :  { %1640 = vmatpush1.msra.mxu1 %v5821_v40  ;;  %1711 = vmatpush1.msra.mxu0 %v5824_v41 }
 0x62a   :  { %1641 = vmatprep.subr.mxu1 %v5827_v42  ;;  %1712 = vmatprep.subr.mxu0 %v5830_v43 }
 0x62b   :  { %1642 = vmatpush1.msra.mxu1 %v5833_v44  ;;  %1713 = vmatpush1.msra.mxu0 %v5836_v45 }
 0x62c   :  { %1643 = vmatprep.subr.mxu1 %v5839_v46  ;;  %1714 = vmatprep.subr.mxu0 %v5842_v47 }
 0x62d   :  { %1644 = vmatpush1.msra.mxu1 %v5845_v48  ;;  %1715 = vmatpush1.msra.mxu0 %v5848_v49 }
 0x62e   :  { %1645 = vmatprep.subr.mxu1 %v5851_v50  ;;  %1716 = vmatprep.subr.mxu0 %v5854_v51 }
 0x62f   :  { %1646 = vmatpush1.msra.mxu1 %v5857_v52  ;;  %1717 = vmatpush1.msra.mxu0 %v7571_v35 }
 0x630   :  { %1647 = vmatprep.subr.mxu1 %v7572_v36  ;;  %1718 = vmatprep.subr.mxu0 %v7573_v58  ;;  %v7592_v58 = vld [vmem:[#allocation42_spill] sm:$0xff] }
 0x631   :  { %1648 = vmatpush1.msra.mxu1 %v7574_v62  ;;  %1719 = vmatpush1.msra.mxu0 %v7575_v60 }
 0x632   :  { %1649 = vmatprep.subr.mxu1 %v7576_v3  ;;  %1720 = vmatprep.subr.mxu0 %v7577_v2  ;;  %v7587_v3 = vmov 0.0   ;;  %v7588_v2 = vld [vmem:[#allocation33_spill] sm:$0xff] }
 0x633   :  { %1650 = vmatpush1.msra.mxu1 %v7578_v5  ;;  %1721 = vmatpush1.msra.mxu0 %v7579_v9  ;;  %v7589_v9 = vld [vmem:[#allocation14_spill] sm:$0xff] }
 0x634   :  { %1651 = vmatprep.subr.mxu1 %v7580_v4  ;;  %1722 = vmatprep.subr.mxu0 %v7581_v21  ;;  %v7590_v4 = vld [vmem:[#allocation15_spill] sm:$0xff] }
 0x635   :  { %1652 = vmatpush1.msra.mxu1 %v7582_v63  ;;  %1723 = vmatpush1.msra.mxu0 %v7583_v10  ;;  %v7591_v10 = vld [vmem:[#allocation40_spill] sm:$0xff] }
 0x636   :  { %1653 = vmatprep.subr.mxu1 %v7584_v33  ;;  %1724 = vmatprep.subr.mxu0 %v7585_v57 }
 0x637   :  { %1654 = vmatpush1.msra.mxu1 %v7586_v53  ;;  %1687 = vmatprep.mubr.f32.mxu1 %v7587_v3 }
 0x638   :  { %1725 = vmatpush1.msra.mxu0 %v7588_v2  ;;  %1758 = vmatprep.mubr.f32.mxu0 %v7587_v3 }
 0x639   :  { %1811 = vmatprep.subr.mxu1 %v7589_v9  ;;  %1882 = vmatprep.subr.mxu0 %v7590_v4 }
 0x6d8   :  { %v1501_v21 = vpop.f32.mrf.mxu1  ;;  %v1572_v33 = vpop.f32.mrf.mxu0 }
 0x6d9   :  { %v1581_v63 = vrot.slane %v1501_v21, 6  ;;  %v1583_v9 = vrot.slane %v1572_v33, 6 }
 0x6da   :  { %v1503_v5 = vpop.f32.mrf.mxu1  ;;  %v1574_v35 = vpop.f32.mrf.mxu0 }
 0x6db   :  { %v1589_v60 = vadd.f32 %v1581_v63, %v7591_v10  ;;  %v1582_v62 = vrot.slane %v1503_v5, 6  ;;  %v1584_v2 = vrot.slane %v1574_v35, 6  ;;  %v1591_v21 = vadd.f32 %v1583_v9, %v7570_v61 }
 0x6dd   :  { %v4342_v57 = vmul.f32 -1.442695, %v1589_v60  ;;  %v1590_v53 = vadd.f32 %v1582_v62, %v7592_v58  ;;  %v1592_v3 = vadd.f32 %v1584_v2, %v7569_v16 }
 0x6df   :  { %4622 = vpow2.f32 %v4342_v57  ;;  %v4343_v36 = vmul.f32 -1.442695, %v1590_v53  ;;  %v4344_v52 = vmul.f32 -1.442695, %v1592_v3 }
 0x6e1   :  { %4624 = vpow2.f32 %v4343_v36  ;;  %v1613_v36 = vrot.slane %v5920_v56, 6 }
 0x6e2   :  { %4626 = vpow2.f32 %v4344_v52 }
 0x6ec   :  { %v4623_v4 = vpop.eup %4622 }
 0x6ed   :  { %v1596_v51 = vadd.f32 1.0, %v4623_v4 }
 0x6ee   :  { %v4625_v50 = vpop.eup %4624 }
 0x6ef   :  { %4628 = vrcp.f32 %v1596_v51  ;;  %v1602_v5 = vadd.f32 1.0, %v4625_v50  ;;  %v4627_v62 = vpop.eup %4626 }
 0x6f0   :  { %4630 = vtanh.f32 %v1591_v21  ;;  %v1609_v57 = vadd.f32 1.0, %v4627_v62 }
 0x6f1   :  { %4632 = vrcp.f32 %v1602_v5 }
 0x6f2   :  { %4634 = vrcp.f32 %v1609_v57 }
 0x6fc   :  { %v4629_v60 = vpop.eup %4628 }
 0x6fd   :  { %v4631_v63 = vpop.eup %4630 }
 0x6fe   :  { %v4633_v35 = vpop.eup %4632  ;;  %v1616_v2 = vmul.f32 %v4631_v63, %v4629_v60 }
 0x6ff   :  { %v1615_v33 = vmul.f32 %v4633_v35, %v1613_v36  ;;  %v4635_v53 = vpop.eup %4634 }
 0x701   :  { %v5994_v3 = vadd.f32 %v1616_v2, %v1615_v33  ;;  %v2011_v2 = vld [vmem:[%s7204_s8 + $0x78] sm:$0xff]  ;;  %v2010_v33 = vld [vmem:[%s7204_s8 + $0x70] sm:$0xff] }
 0x703   :  { %4636 = vtanh.f32 %v5994_v3  ;;  %v1801_v9 = vrot.slane %v5994_v3, 6  ;;  %v2009_v3 = vld [vmem:[%s7204_s8 + $0x68] sm:$0xff] }
 0x710   :  { %v4637_v52 = vpop.eup %4636 }
 0x711   :  { %v1619_v51 = vmul.f32 %v4637_v52, %v4635_v53  ;;  %v2008_v53 = vld [vmem:[%s7204_s8 + $0x60] sm:$0xff]  ;;  %v2007_v52 = vld [vmem:[%s7204_s8 + $0x58] sm:$0xff] }
 0x713   :  { %v1621_v50 = vrot.slane %v1619_v51, 2  ;;  %v2006_v51 = vld [vmem:[%s7204_s8 + $0x50] sm:$0xff] }
 0x715   :  { %1688 = vmatmul.mubr.f32.vlgmr.msra.gmra.mxu1 %v1621_v50  ;;  %1759 = vmatmul.mubr.f32.vlgmr.msra.gmra.mxu0 %v1621_v50  ;;  %v2005_v50 = vld [vmem:[%s7204_s8 + $0x48] sm:$0xff] }
 0x716   :  { %1812 = vmatpush1.msra.mxu1 %v5725_v59  ;;  %1883 = vmatpush1.msra.mxu0 %v5728_v11  ;;  %v7593_v59 = vld [vmem:[#allocation12_spill] sm:$0xff]  ;;  %v7594_v11 = vld [vmem:[#allocation13_spill] sm:$0xff] }
 0x717   :  { %1813 = vmatprep.subr.mxu1 %v5731_v55  ;;  %1884 = vmatprep.subr.mxu0 %v5734_v0  ;;  %v7595_v55 = vld [vmem:[#allocation16_spill] sm:$0xff]  ;;  %v7596_v0 = vld [vmem:[#allocation17_spill] sm:$0xff] }
 0x718   :  { %1814 = vmatpush1.msra.mxu1 %v5737_v54  ;;  %1885 = vmatpush1.msra.mxu0 %v5740_v6  ;;  %v7597_v54 = vld [vmem:[#allocation18_spill] sm:$0xff]  ;;  %v7598_v6 = vld [vmem:[#allocation19_spill] sm:$0xff] }
 0x719   :  { %1815 = vmatprep.subr.mxu1 %v5743_v1  ;;  %1886 = vmatprep.subr.mxu0 %v5746_v8  ;;  %v7599_v1 = vld [vmem:[#allocation20_spill] sm:$0xff]  ;;  %v7600_v8 = vld [vmem:[#allocation21_spill] sm:$0xff] }
 0x71a   :  { %1816 = vmatpush1.msra.mxu1 %v5749_v7  ;;  %1887 = vmatpush1.msra.mxu0 %v5752_v12  ;;  %v7601_v7 = vld [vmem:[#allocation22_spill] sm:$0xff]  ;;  %v7602_v12 = vld [vmem:[#allocation23_spill] sm:$0xff] }
 0x71b   :  { %1817 = vmatprep.subr.mxu1 %v5755_v13  ;;  %1888 = vmatprep.subr.mxu0 %v5758_v14  ;;  %v7603_v13 = vld [vmem:[#allocation24_spill] sm:$0xff]  ;;  %v7604_v14 = vld [vmem:[#allocation25_spill] sm:$0xff] }
 0x71c   :  { %1818 = vmatpush1.msra.mxu1 %v5761_v15  ;;  %1889 = vmatpush1.msra.mxu0 %v5764_v17  ;;  %v7605_v15 = vld [vmem:[#allocation26_spill] sm:$0xff]  ;;  %v7606_v17 = vld [vmem:[#allocation27_spill] sm:$0xff] }
 0x71d   :  { %1819 = vmatprep.subr.mxu1 %v5767_v18  ;;  %1890 = vmatprep.subr.mxu0 %v5770_v19  ;;  %v7607_v18 = vld [vmem:[#allocation28_spill] sm:$0xff]  ;;  %v7608_v19 = vld [vmem:[#allocation29_spill] sm:$0xff] }
 0x71e   :  { %1820 = vmatpush1.msra.mxu1 %v5773_v20  ;;  %1891 = vmatpush1.msra.mxu0 %v5776_v22  ;;  %v7609_v20 = vld [vmem:[#allocation30_spill] sm:$0xff]  ;;  %v7610_v22 = vld [vmem:[#allocation31_spill] sm:$0xff] }
 0x71f   :  { %1821 = vmatprep.subr.mxu1 %v5779_v23  ;;  %1892 = vmatprep.subr.mxu0 %v5782_v24  ;;  %v7611_v23 = vld [vmem:[#allocation32_spill] sm:$0xff]  ;;  %v7612_v24 = vmov 0.0  }
 0x720   :  { %1822 = vmatpush1.msra.mxu1 %v5785_v25  ;;  %1893 = vmatpush1.msra.mxu0 %v5788_v26  ;;  %v7613_v25 = vld [vmem:[#allocation33_spill] sm:$0xff] }
 0x721   :  { %1823 = vmatprep.subr.mxu1 %v5791_v27  ;;  %1894 = vmatprep.subr.mxu0 %v5794_v28 }
 0x722   :  { %1824 = vmatpush1.msra.mxu1 %v5797_v29  ;;  %1895 = vmatpush1.msra.mxu0 %v5800_v30 }
 0x723   :  { %1825 = vmatprep.subr.mxu1 %v5803_v31  ;;  %1896 = vmatprep.subr.mxu0 %v5806_v32 }
 0x724   :  { %1826 = vmatpush1.msra.mxu1 %v5809_v34  ;;  %1897 = vmatpush1.msra.mxu0 %v5812_v37 }
 0x725   :  { %1827 = vmatprep.subr.mxu1 %v5815_v38  ;;  %1898 = vmatprep.subr.mxu0 %v5818_v39 }
 0x726   :  { %1828 = vmatpush1.msra.mxu1 %v5821_v40  ;;  %1899 = vmatpush1.msra.mxu0 %v5824_v41 }
 0x727   :  { %1829 = vmatprep.subr.mxu1 %v5827_v42  ;;  %1900 = vmatprep.subr.mxu0 %v5830_v43 }
 0x728   :  { %1830 = vmatpush1.msra.mxu1 %v5833_v44  ;;  %1901 = vmatpush1.msra.mxu0 %v5836_v45 }
 0x729   :  { %1831 = vmatprep.subr.mxu1 %v5839_v46  ;;  %1902 = vmatprep.subr.mxu0 %v5842_v47 }
 0x72a   :  { %1832 = vmatpush1.msra.mxu1 %v5845_v48  ;;  %1903 = vmatpush1.msra.mxu0 %v5848_v49 }
 0x72b   :  { %1833 = vmatprep.subr.mxu1 %v7593_v59  ;;  %1904 = vmatprep.subr.mxu0 %v7594_v11  ;;  %v2004_v59 = vld [vmem:[%s7204_s8 + $0x40] sm:$0xff]  ;;  %v2003_v11 = vld [vmem:[%s7204_s8 + $0x38] sm:$0xff] }
 0x72c   :  { %1834 = vmatpush1.msra.mxu1 %v7595_v55  ;;  %1905 = vmatpush1.msra.mxu0 %v7596_v0  ;;  %v2002_v55 = vld [vmem:[%s7204_s8 + $0x30] sm:$0xff]  ;;  %v2001_v0 = vld [vmem:[%s7204_s8 + $0x28] sm:$0xff] }
 0x72d   :  { %1835 = vmatprep.subr.mxu1 %v7597_v54  ;;  %1906 = vmatprep.subr.mxu0 %v7598_v6  ;;  %v2000_v54 = vld [vmem:[%s7204_s8 + $0x20] sm:$0xff]  ;;  %v1999_v6 = vld [vmem:[%s7204_s8 + $0x18] sm:$0xff] }
 0x72e   :  { %1836 = vmatpush1.msra.mxu1 %v7599_v1  ;;  %1907 = vmatpush1.msra.mxu0 %v7600_v8  ;;  %v1998_v1 = vld [vmem:[%s7204_s8 + $0x10] sm:$0xff]  ;;  %v1997_v8 = vld [vmem:[%s7204_s8 + $0x8] sm:$0xff] }
 0x72f   :  { %1837 = vmatprep.subr.mxu1 %v7601_v7  ;;  %1908 = vmatprep.subr.mxu0 %v7602_v12  ;;  %v1996_v7 = vld [vmem:[%s7204_s8] sm:$0xff] }
 0x730   :  { %1838 = vmatpush1.msra.mxu1 %v7603_v13  ;;  %1909 = vmatpush1.msra.mxu0 %v7604_v14 }
 0x731   :  { %1839 = vmatprep.subr.mxu1 %v7605_v15  ;;  %1910 = vmatprep.subr.mxu0 %v7606_v17 }
 0x732   :  { %1840 = vmatpush1.msra.mxu1 %v7607_v18  ;;  %1911 = vmatpush1.msra.mxu0 %v7608_v19 }
 0x733   :  { %1841 = vmatprep.subr.mxu1 %v7609_v20  ;;  %1912 = vmatprep.subr.mxu0 %v7610_v22 }
 0x734   :  { %1842 = vmatpush1.msra.mxu1 %v7611_v23  ;;  %1875 = vmatprep.mubr.f32.mxu1 %v7612_v24 }
 0x735   :  { %1913 = vmatpush1.msra.mxu0 %v7613_v25  ;;  %1946 = vmatprep.mubr.f32.mxu0 %v7612_v24 }
 0x736   :  { %4441 = vmatprep.subr.mxu1 %v7612_v24  ;;  %4476 = vmatprep.subr.mxu0 %v7612_v24 }
 0x7d5   :  { %v1689_v26 = vpop.f32.mrf.mxu1  ;;  %v1760_v30 = vpop.f32.mrf.mxu0 }
 0x7d6   :  { %v1769_v27 = vrot.slane %v1689_v26, 4  ;;  %v1771_v41 = vrot.slane %v1760_v30, 4 }
 0x7d7   :  { %v1691_v28 = vpop.f32.mrf.mxu1  ;;  %v1762_v38 = vpop.f32.mrf.mxu0 }
 0x7d8   :  { %v1777_v29 = vadd.f32 %v1769_v27, %v7591_v10  ;;  %v1770_v31 = vrot.slane %v1691_v28, 4  ;;  %v1772_v39 = vrot.slane %v1762_v38, 4  ;;  %v1779_v44 = vadd.f32 %v1771_v41, %v7570_v61 }
 0x7da   :  { %v4345_v32 = vmul.f32 -1.442695, %v1777_v29  ;;  %v1778_v34 = vadd.f32 %v1770_v31, %v7592_v58  ;;  %v1780_v40 = vadd.f32 %v1772_v39, %v7569_v16 }
 0x7dc   :  { %4638 = vpow2.f32 %v4345_v32  ;;  %v4346_v37 = vmul.f32 -1.442695, %v1778_v34  ;;  %v4347_v42 = vmul.f32 -1.442695, %v1780_v40 }
 0x7de   :  { %4640 = vpow2.f32 %v4346_v37 }
 0x7df   :  { %4642 = vpow2.f32 %v4347_v42 }
 0x7e9   :  { %v4639_v43 = vpop.eup %4638 }
 0x7ea   :  { %v1784_v45 = vadd.f32 1.0, %v4639_v43 }
 0x7eb   :  { %v4641_v46 = vpop.eup %4640 }
 0x7ec   :  { %4644 = vrcp.f32 %v1784_v45  ;;  %v1790_v47 = vadd.f32 1.0, %v4641_v46  ;;  %v4643_v48 = vpop.eup %4642  ;;  %v2094_v46 = vld [vmem:[%s7206_s10 + $0x8] sm:$0xff] }
 0x7ed   :  { %4646 = vtanh.f32 %v1779_v44  ;;  %v1797_v21 = vadd.f32 1.0, %v4643_v48  ;;  %v2180_v48 = vld [vmem:[%s7614_s16] sm:$0x3] }
 0x7ee   :  { %4648 = vrcp.f32 %v1790_v47  ;;  %v2093_v47 = vld [vmem:[%s7206_s10] sm:$0xff]  ;;  %2182 = vrot.lane.b32.xlu0 %v2180_v48, %s5032_s2  ;;  %v2289_v48 = vld [vmem:[#allocation6 + $0x58] sm:$0xff] }
 0x7ef   :  { %4650 = vrcp.f32 %v1797_v21 }
 0x7f9   :  { %v4645_v49 = vpop.eup %4644 }
 0x7fa   :  { %v4647_v56 = vpop.eup %4646 }
 0x7fb   :  { %v4649_v4 = vpop.eup %4648  ;;  %v1804_v5 = vmul.f32 %v4647_v56, %v4645_v49  ;;  %v2192_v49 = vld [vmem:[%s7208_s12 + $0x8] sm:$0x3f]  ;;  %v4351_v56 = vld [vmem:[%s7205_s9] ss:$0 sm:$0xff] }
 0x7fc   :  { %v1803_v62 = vmul.f32 %v4649_v4, %v1801_v9  ;;  %v4651_v63 = vpop.eup %4650 }
 0x7fe   :  { %v6068_v60 = vadd.f32 %v1804_v5, %v1803_v62  ;;  %v2191_v62 = vld [vmem:[%s7208_s12] sm:$0xff] }
 0x800   :  { %4652 = vtanh.f32 %v6068_v60  ;;  %v1989_v38 = vrot.slane %v6068_v60, 6  ;;  %v4872_v60 = vld [vmem:[%s7440_s28] sm:$0xff] }
 0x80d   :  { %v4653_v36 = vpop.eup %4652 }
 0x80e   :  { %v1807_v35 = vmul.f32 %v4653_v36, %v4651_v63  ;;  %v4873_v63 = vld [vmem:[%s7440_s28 + $0x8] sm:$0xff] }
 0x80f   :  { %v2339_v36 = vld [vmem:[#allocation6 + $0x1e8] sm:$0xff] }
 0x810   :  { %v1809_v57 = vrot.slane %v1807_v35, 4  ;;  %v2341_v35 = vld [vmem:[#allocation6 + $0x1f8] sm:$0xff] }
 0x812   :  { %1876 = vmatmul.mubr.f32.vlgmr.msra.gmra.mxu1 %v1809_v57  ;;  %1947 = vmatmul.mubr.f32.vlgmr.msra.gmra.mxu0 %v1809_v57  ;;  %v2338_v57 = vld [vmem:[#allocation6 + $0x1e0] sm:$0xff] }
 0x813   :  { %4442 = vmatpush3.msra.mxu1 %v2011_v2  ;;  %4473 = vmatprep.mubr.msk.f32.mxu1 %vm5031_vm2, %v7612_v24  ;;  %v2340_v2 = vld [vmem:[#allocation6 + $0x1f0] sm:$0xff] }
 0x814   :  { %4443 = vmatprep.subr.mxu1 %v7612_v24  ;;  %4480 = vmatprep.mubr.msk.f32.mxu0 %vm5031_vm2, %v7612_v24 }
 0x815   :  { %4444 = vmatpush3.msra.mxu1 %v2010_v33  ;;  %4477 = vmatpush3.msra.mxu0 %v2094_v46  ;;  %v2335_v33 = vld [vmem:[#allocation6 + $0x1c8] sm:$0xff]  ;;  %v2292_v46 = vld [vmem:[#allocation6 + $0x70] sm:$0xff] }
 0x816   :  { %4445 = vmatprep.subr.mxu1 %v7612_v24  ;;  %4478 = vmatprep.subr.mxu0 %v7612_v24 }
 0x817   :  { %4446 = vmatpush3.msra.mxu1 %v2009_v3  ;;  %4479 = vmatpush3.msra.mxu0 %v2093_v47  ;;  %v2337_v3 = vld [vmem:[#allocation6 + $0x1d8] sm:$0xff]  ;;  %v2287_v47 = vld [vmem:[#allocation6 + $0x48] sm:$0xff] }
 0x818   :  { %4447 = vmatprep.subr.mxu1 %v7612_v24  ;;  %4483 = vmatprep.subr.msk.mxu0 %vm143_vm0, %v2192_v49 }
 0x819   :  { %4448 = vmatpush3.msra.mxu1 %v2008_v53  ;;  %v2334_v53 = vld [vmem:[#allocation6 + $0x1c0] sm:$0xff] }
 0x81a   :  { %4449 = vmatprep.subr.mxu1 %v7612_v24 }
 0x81b   :  { %4450 = vmatpush3.msra.mxu1 %v2007_v52  ;;  %v2336_v52 = vld [vmem:[#allocation6 + $0x1d0] sm:$0xff] }
 0x81c   :  { %4451 = vmatprep.subr.mxu1 %v7612_v24 }
 0x81d   :  { %4452 = vmatpush3.msra.mxu1 %v2006_v51  ;;  %v2331_v51 = vld [vmem:[#allocation6 + $0x1a8] sm:$0xff] }
 0x81e   :  { %4453 = vmatprep.subr.mxu1 %v7612_v24 }
 0x81f   :  { %4454 = vmatpush3.msra.mxu1 %v2005_v50  ;;  %v2333_v50 = vld [vmem:[#allocation6 + $0x1b8] sm:$0xff] }
 0x820   :  { %4455 = vmatprep.subr.mxu1 %v7612_v24 }
 0x821   :  { %4456 = vmatpush3.msra.mxu1 %v2004_v59  ;;  %v2330_v59 = vld [vmem:[#allocation6 + $0x1a0] sm:$0xff] }
 0x822   :  { %4457 = vmatprep.subr.mxu1 %v7612_v24 }
 0x823   :  { %4458 = vmatpush3.msra.mxu1 %v2003_v11  ;;  %v2332_v11 = vld [vmem:[#allocation6 + $0x1b0] sm:$0xff] }
 0x824   :  { %4459 = vmatprep.subr.mxu1 %v7612_v24 }
 0x825   :  { %4460 = vmatpush3.msra.mxu1 %v2002_v55  ;;  %v2327_v55 = vld [vmem:[#allocation6 + $0x188] sm:$0xff] }
 0x826   :  { %4461 = vmatprep.subr.mxu1 %v7612_v24 }
 0x827   :  { %4462 = vmatpush3.msra.mxu1 %v2001_v0  ;;  %v2329_v0 = vld [vmem:[#allocation6 + $0x198] sm:$0xff] }
 0x828   :  { %4463 = vmatprep.subr.mxu1 %v7612_v24 }
 0x829   :  { %4464 = vmatpush3.msra.mxu1 %v2000_v54  ;;  %v2326_v54 = vld [vmem:[#allocation6 + $0x180] sm:$0xff] }
 0x82a   :  { %4465 = vmatprep.subr.mxu1 %v7612_v24 }
 0x82b   :  { %4466 = vmatpush3.msra.mxu1 %v1999_v6  ;;  %v2328_v6 = vld [vmem:[#allocation6 + $0x190] sm:$0xff] }
 0x82c   :  { %4467 = vmatprep.subr.mxu1 %v7612_v24 }
 0x82d   :  { %4468 = vmatpush3.msra.mxu1 %v1998_v1  ;;  %v2323_v1 = vld [vmem:[#allocation6 + $0x168] sm:$0xff] }
 0x82e   :  { %4469 = vmatprep.subr.mxu1 %v7612_v24 }
 0x82f   :  { %4470 = vmatpush3.msra.mxu1 %v1997_v8  ;;  %v2325_v8 = vld [vmem:[#allocation6 + $0x178] sm:$0xff] }
 0x830   :  { %4471 = vmatprep.subr.mxu1 %v7612_v24 }
 0x831   :  { %4472 = vmatpush3.msra.mxu1 %v1996_v7  ;;  %v2322_v7 = vld [vmem:[#allocation6 + $0x160] sm:$0xff] }
 0x832   :  { %2441 = vmatprep.subr.mxu1 %v2341_v35  ;;  %v4352_v35 = vld [vmem:[%s7207_s11] ss:$0 sm:$0xff] }
 0x8d2   :  { %v1877_v12 = vpop.f32.mrf.mxu1  ;;  %v1948_v17 = vpop.f32.mrf.mxu0 }
 0x8d3   :  { %v1957_v13 = vrot.slane %v1877_v12, 2  ;;  %v1959_v27 = vrot.slane %v1948_v17, 2  ;;  %v2324_v12 = vld [vmem:[#allocation6 + $0x170] sm:$0xff] }
 0x8d4   :  { %v1879_v14 = vpop.f32.mrf.mxu1  ;;  %v1950_v23 = vpop.f32.mrf.mxu0  ;;  %v2320_v17 = vld [vmem:[#allocation6 + $0x150] sm:$0xff] }
 0x8d5   :  { %v1965_v15 = vadd.f32 %v1957_v13, %v7591_v10  ;;  %v1958_v18 = vrot.slane %v1879_v14, 2  ;;  %v1960_v25 = vrot.slane %v1950_v23, 2  ;;  %v1967_v30 = vadd.f32 %v1959_v27, %v7570_v61  ;;  %v2319_v13 = vld [vmem:[#allocation6 + $0x148] sm:$0xff]  ;;  %v2321_v14 = vld [vmem:[#allocation6 + $0x158] sm:$0xff]  ;;  %v2312_v27 = vld [vmem:[#allocation6 + $0x110] sm:$0xff] }
 0x8d6   :  { %v2311_v23 = vld [vmem:[#allocation6 + $0x108] sm:$0xff] }
 0x8d7   :  { %v4348_v19 = vmul.f32 -1.442695, %v1965_v15  ;;  %v1966_v20 = vadd.f32 %v1958_v18, %v7592_v58  ;;  %v1968_v26 = vadd.f32 %v1960_v25, %v7569_v16  ;;  %v2318_v15 = vld [vmem:[#allocation6 + $0x140] sm:$0xff]  ;;  %v2315_v18 = vld [vmem:[#allocation6 + $0x128] sm:$0xff]  ;;  %v2313_v25 = vld [vmem:[#allocation6 + $0x118] sm:$0xff] }
 0x8d9   :  { %4654 = vpow2.f32 %v4348_v19  ;;  %v4349_v22 = vmul.f32 -1.442695, %v1966_v20  ;;  %v4350_v28 = vmul.f32 -1.442695, %v1968_v26  ;;  %v2317_v19 = vld [vmem:[#allocation6 + $0x138] sm:$0xff]  ;;  %v2314_v20 = vld [vmem:[#allocation6 + $0x120] sm:$0xff] }
 0x8da   :  { %v2310_v26 = vld [vmem:[#allocation6 + $0x100] sm:$0xff] }
 0x8db   :  { %4656 = vpow2.f32 %v4349_v22  ;;  %v2316_v22 = vld [vmem:[#allocation6 + $0x130] sm:$0xff] }
 0x8dc   :  { %4658 = vpow2.f32 %v4350_v28  ;;  %v2307_v28 = vld [vmem:[#allocation6 + $0xe8] sm:$0xff] }
 0x8e6   :  { %v4655_v29 = vpop.eup %4654 }
 0x8e7   :  { %v1972_v31 = vadd.f32 1.0, %v4655_v29  ;;  %v2309_v29 = vld [vmem:[#allocation6 + $0xf8] sm:$0xff] }
 0x8e8   :  { %v4657_v32 = vpop.eup %4656 }
 0x8e9   :  { %4660 = vrcp.f32 %v1972_v31  ;;  %v1978_v10 = vadd.f32 1.0, %v4657_v32  ;;  %v4659_v58 = vpop.eup %4658  ;;  %v2308_v31 = vld [vmem:[#allocation6 + $0xf0] sm:$0xff]  ;;  %v2303_v32 = vld [vmem:[#allocation6 + $0xc8] sm:$0xff] }
 0x8ea   :  { %4662 = vtanh.f32 %v1967_v30  ;;  %v1985_v40 = vadd.f32 1.0, %v4659_v58  ;;  %v2306_v30 = vld [vmem:[#allocation6 + $0xe0] sm:$0xff] }
 0x8eb   :  { %4664 = vrcp.f32 %v1978_v10  ;;  %v2305_v10 = vld [vmem:[#allocation6 + $0xd8] sm:$0xff]  ;;  %v2302_v58 = vld [vmem:[#allocation6 + $0xc0] sm:$0xff] }
 0x8ec   :  { %4666 = vrcp.f32 %v1985_v40  ;;  %v2300_v40 = vld [vmem:[#allocation6 + $0xb0] sm:$0xff] }
 0x8f6   :  { %v4661_v34 = vpop.eup %4660 }
 0x8f7   :  { %v4663_v37 = vpop.eup %4662 }
 0x8f8   :  { %v4665_v39 = vpop.eup %4664  ;;  %v1992_v16 = vmul.f32 %v4663_v37, %v4661_v34  ;;  %v2304_v34 = vld [vmem:[#allocation6 + $0xd0] sm:$0xff]  ;;  %v2299_v37 = vld [vmem:[#allocation6 + $0xa8] sm:$0xff] }
 0x8f9   :  { %v1991_v41 = vmul.f32 %v4665_v39, %v1989_v38  ;;  %v4667_v61 = vpop.eup %4666  ;;  %v2301_v38 = vld [vmem:[#allocation6 + $0xb8] sm:$0xff]  ;;  %v2298_v39 = vld [vmem:[#allocation6 + $0xa0] sm:$0xff] }
 0x8fb   :  { %v1993_v42 = vadd.f32 %v1992_v16, %v1991_v41  ;;  %v2295_v16 = vld [vmem:[#allocation6 + $0x88] sm:$0xff]  ;;  %v2297_v41 = vld [vmem:[#allocation6 + $0x98] sm:$0xff] }
 0x8fd   :  { %4668 = vtanh.f32 %v1993_v42  ;;  %v2294_v42 = vld [vmem:[#allocation6 + $0x80] sm:$0xff] }
 0x90a   :  { %v4669_v43 = vpop.eup %4668 }
 0x90b   :  { %v1995_v44 = vmul.f32 %v4669_v43, %v4667_v61  ;;  %v2296_v61 = vld [vmem:[#allocation6 + $0x90] sm:$0xff]  ;;  %v2291_v43 = vld [vmem:[#allocation6 + $0x68] sm:$0xff] }
 0x90d   :  { %v2020_v45 = vrot.slane %v1995_v44, 6  ;;  %v2293_v44 = vld [vmem:[#allocation6 + $0x78] sm:$0xff] }
 0x90f   :  { %4474 = vmatmul.mubr.f32.vlgmr.msra.gmra.mxu1 %v2020_v45  ;;  %v2290_v45 = vld [vmem:[#allocation6 + $0x60] sm:$0xff] }
 0x910   :  { %2505 = vmatprep.mubr.f32.mxu1 %v7612_v24  ;;  %2442 = vmatpush1.msra.mxu1 %v2340_v2 }
 0x911   :  { %2443 = vmatprep.subr.mxu1 %v2337_v3 }
 0x912   :  { %2444 = vmatpush1.msra.mxu1 %v2336_v52  ;;  %v4354_v52 = vld [vmem:[%s7209_s13] ss:$0 sm:$0xff]  ;;  %s5033_s13 = smov 112  }
 0x913   :  { %2445 = vmatprep.subr.mxu1 %v2333_v50 }
 0x914   :  { %2446 = vmatpush1.msra.mxu1 %v2332_v11  ;;  %v2584_v11 = vld [vmem:[%s7210_s14 + $0x8] sm:$0xff] }
 0x915   :  { %2447 = vmatprep.subr.mxu1 %v2329_v0  ;;  %v2583_v0 = vld [vmem:[%s7210_s14] sm:$0xff] }
 0x916   :  { %2448 = vmatpush1.msra.mxu1 %v2328_v6  ;;  %v6200_v6 = vld [vmem:[#allocation7 + $0x1f8] sm:$0xff] }
 0x917   :  { %2449 = vmatprep.subr.mxu1 %v2325_v8  ;;  %7616 = vst [vmem:[#allocation35_spill] sm:$0xff] %v6200_v6  ;;  %v6206_v8 = vld [vmem:[#allocation7 + $0x1c8] sm:$0xff] }
 0x918   :  { %2450 = vmatpush1.msra.mxu1 %v2324_v12  ;;  %v6213_v12 = vld [vmem:[#allocation7 + $0x1a8] sm:$0xff] }
 0x919   :  { %2451 = vmatprep.subr.mxu1 %v2321_v14  ;;  %v2183_v14 = vpop.permute.xlu0 %2182 }
 0x91a   :  { %2452 = vmatpush1.msra.mxu1 %v2320_v17  ;;  %v6223_v17 = vld [vmem:[#allocation7 + $0x180] sm:$0xff] }
 0x91b   :  { %2453 = vmatprep.subr.mxu1 %v2317_v19  ;;  %v6226_v19 = vld [vmem:[#allocation7 + $0x168] sm:$0xff] }
 0x91c   :  { %2454 = vmatpush1.msra.mxu1 %v2316_v22  ;;  %v6229_v22 = vld [vmem:[#allocation7 + $0x160] sm:$0xff] }
 0x91d   :  { %2455 = vmatprep.subr.mxu1 %v2313_v25  ;;  %v6235_v25 = vld [vmem:[#allocation7 + $0x140] sm:$0xff] }
 0x91e   :  { %2456 = vmatpush1.msra.mxu1 %v2312_v27  ;;  %v6243_v27 = vld [vmem:[#allocation7 + $0x120] sm:$0xff] }
 0x91f   :  { %2457 = vmatprep.subr.mxu1 %v2309_v29  ;;  %v6249_v29 = vld [vmem:[#allocation7 + $0x100] sm:$0xff] }
 0x920   :  { %2458 = vmatpush1.msra.mxu1 %v2308_v31  ;;  %v6255_v31 = vld [vmem:[#allocation7 + $0xe0] sm:$0xff] }
 0x921   :  { %2459 = vmatprep.subr.mxu1 %v2305_v10  ;;  %v6261_v10 = vld [vmem:[#allocation7 + $0xc0] sm:$0xff] }
 0x922   :  { %2460 = vmatpush1.msra.mxu1 %v2304_v34  ;;  %v6266_v34 = vld [vmem:[#allocation7 + $0xa0] sm:$0xff] }
 0x923   :  { %2461 = vmatprep.subr.mxu1 %v2301_v38  ;;  %v6271_v38 = vld [vmem:[#allocation7 + $0x80] sm:$0xff] }
 0x924   :  { %2462 = vmatpush1.msra.mxu1 %v2300_v40  ;;  %7618 = vst [vmem:[#allocation41_spill] sm:$0xff] %v6271_v38  ;;  %v6277_v40 = vld [vmem:[#allocation7 + $0x60] sm:$0xff] }
 0x925   :  { %2463 = vmatprep.subr.mxu1 %v2297_v41  ;;  %7620 = vst [vmem:[#allocation15_spill] sm:$0xff] %v6277_v40  ;;  %v6283_v41 = vld [vmem:[#allocation7 + $0x40] sm:$0xff] }
 0x926   :  { %2464 = vmatpush1.msra.mxu1 %v2296_v61  ;;  %7622 = vst [vmem:[#allocation42_spill] sm:$0xff] %v6283_v41 }
 0x927   :  { %2465 = vmatprep.subr.mxu1 %v2293_v44  ;;  %v6292_v44 = vld [vmem:[#allocation7 + $0x1f0] sm:$0xff] }
 0x928   :  { %2466 = vmatpush1.msra.mxu1 %v2292_v46  ;;  %v6297_v46 = vld [vmem:[#allocation7 + $0x1d0] sm:$0xff] }
 0x929   :  { %2467 = vmatprep.subr.mxu1 %v2289_v48  ;;  %v6304_v48 = vld [vmem:[#allocation7 + $0x1b0] sm:$0xff] }
 0x9cf   :  { %v2088_v9 = vpop.f32.mrf.mxu1 }
 0x9d0   :  { %v2089_v4 = vadd.f32 %v4351_v56, %v2088_v9  ;;  %v2288_v56 = vld [vmem:[#allocation6 + $0x50] sm:$0xff]  ;;  %v2283_v9 = vld [vmem:[#allocation6 + $0x28] sm:$0xff] }
 0x9d1   :  { %v4475_v21 = vpop.f32.mrf.mxu1  ;;  %2468 = vmatpush1.msra.mxu1 %v2288_v56  ;;  %v6310_v56 = vld [vmem:[#allocation7 + $0x190] sm:$0xff] }
 0x9d2   :  { %v2092_v5 = vmax.f32 %v2089_v4, 0.0  ;;  %v2285_v4 = vld [vmem:[#allocation6 + $0x38] sm:$0xff]  ;;  %v2282_v21 = vld [vmem:[#allocation6 + $0x20] sm:$0xff] }
 0x9d3   :  { %2469 = vmatprep.subr.mxu1 %v2285_v4  ;;  %v6316_v4 = vld [vmem:[#allocation7 + $0x170] sm:$0xff] }
 0x9d4   :  { %4481 = vmatmul.mubr.msk.f32.vlgmr.msra.gmra.mxu0 %vm2102_vm3, %v2092_v5  ;;  %v2284_v5 = vld [vmem:[#allocation6 + $0x30] sm:$0xff] }
 0x9d5   :  { %4484 = vmatpush3.msk.msra.mxu0 %vm143_vm0, %v2192_v49  ;;  %4487 = vmatprep.mubr.msk.f32.mxu0 %vm136_vm1, %v4872_v60  ;;  %v2286_v49 = vld [vmem:[#allocation6 + $0x40] sm:$0xff]  ;;  %v2281_v60 = vld [vmem:[#allocation6 + $0x18] sm:$0xff] }
 0x9d6   :  { %4485 = vmatprep.subr.mxu0 %v2191_v62  ;;  %2470 = vmatpush1.msra.mxu1 %v2284_v5  ;;  %v6322_v5 = vld [vmem:[#allocation7 + $0x150] sm:$0xff] }
 0x9d7   :  { %4486 = vmatpush3.msra.mxu0 %v2191_v62  ;;  %v2279_v62 = vld [vmem:[#allocation6 + $0x8] sm:$0xff]  ;;  %2471 = vmatprep.subr.mxu1 %v2281_v60  ;;  %v6328_v60 = vld [vmem:[#allocation7 + $0x130] sm:$0xff] }
 0x9d8   :  { %4488 = vmatmul.mubr.msk.f32.vlgmr.msra.gmra.mxu0 %vm136_vm1, %v4873_v63  ;;  %2364 = vmatprep.subr.mxu0 %v2339_v36  ;;  %v2278_v63 = vld [vmem:[#allocation6] sm:$0xff]  ;;  %v2280_v36 = vld [vmem:[#allocation6 + $0x10] sm:$0xff] }
 0x9d9   :  { %2428 = vmatprep.mubr.f32.mxu0 %v7612_v24  ;;  %2365 = vmatpush1.msra.mxu0 %v2338_v57 }
 0x9da   :  { %2366 = vmatprep.subr.mxu0 %v2335_v33  ;;  %2472 = vmatpush1.msra.mxu1 %v2280_v36  ;;  %v6334_v36 = vld [vmem:[#allocation7 + $0x110] sm:$0xff] }
 0x9db   :  { %2367 = vmatpush1.msra.mxu0 %v2334_v53  ;;  %4490 = vmatprep.subr.mxu1 %v7612_v24 }
 0x9dc   :  { %2368 = vmatprep.subr.mxu0 %v2331_v51 }
 0x9dd   :  { %2369 = vmatpush1.msra.mxu0 %v2330_v59 }
 0x9de   :  { %2370 = vmatprep.subr.mxu0 %v2327_v55 }
 0x9df   :  { %2371 = vmatpush1.msra.mxu0 %v2326_v54  ;;  %v6198_v54 = vld [vmem:[#allocation7 + $0x1e8] sm:$0xff] }
 0x9e0   :  { %2372 = vmatprep.subr.mxu0 %v2323_v1  ;;  %7615 = vst [vmem:[#allocation34_spill] sm:$0xff] %v6198_v54  ;;  %v6202_v1 = vld [vmem:[#allocation7 + $0x1e0] sm:$0xff] }
 0x9e1   :  { %2373 = vmatpush1.msra.mxu0 %v2322_v7  ;;  %v6210_v7 = vld [vmem:[#allocation7 + $0x1c0] sm:$0xff] }
 0x9e2   :  { %2374 = vmatprep.subr.mxu0 %v2319_v13  ;;  %v6217_v13 = vld [vmem:[#allocation7 + $0x1a0] sm:$0xff] }
 0x9e3   :  { %2375 = vmatpush1.msra.mxu0 %v2318_v15  ;;  %v6220_v15 = vld [vmem:[#allocation7 + $0x188] sm:$0xff] }
 0x9e4   :  { %2376 = vmatprep.subr.mxu0 %v2315_v18 }
 0x9e5   :  { %2377 = vmatpush1.msra.mxu0 %v2314_v20 }
 0x9e6   :  { %2378 = vmatprep.subr.mxu0 %v2311_v23  ;;  %v6232_v23 = vld [vmem:[#allocation7 + $0x148] sm:$0xff] }
 0x9e7   :  { %2379 = vmatpush1.msra.mxu0 %v2310_v26  ;;  %v6238_v26 = vld [vmem:[#allocation7 + $0x128] sm:$0xff] }
 0x9e8   :  { %2380 = vmatprep.subr.mxu0 %v2307_v28  ;;  %v6245_v28 = vld [vmem:[#allocation7 + $0x108] sm:$0xff] }
 0x9e9   :  { %2381 = vmatpush1.msra.mxu0 %v2306_v30  ;;  %v6251_v30 = vld [vmem:[#allocation7 + $0xe8] sm:$0xff] }
 0x9ea   :  { %2382 = vmatprep.subr.mxu0 %v2303_v32  ;;  %v6257_v32 = vld [vmem:[#allocation7 + $0xc8] sm:$0xff] }
 0x9eb   :  { %2383 = vmatpush1.msra.mxu0 %v2302_v58  ;;  %v6263_v58 = vld [vmem:[#allocation7 + $0xa8] sm:$0xff] }
 0x9ec   :  { %2384 = vmatprep.subr.mxu0 %v2299_v37  ;;  %v6269_v37 = vld [vmem:[#allocation7 + $0x88] sm:$0xff] }
 0x9ed   :  { %2385 = vmatpush1.msra.mxu0 %v2298_v39  ;;  %7617 = vst [vmem:[#allocation43_spill] sm:$0xff] %v6269_v37  ;;  %v6274_v39 = vld [vmem:[#allocation7 + $0x68] sm:$0xff] }
 0x9ee   :  { %2386 = vmatprep.subr.mxu0 %v2295_v16  ;;  %7619 = vst [vmem:[#allocation14_spill] sm:$0xff] %v6274_v39  ;;  %v6280_v16 = vld [vmem:[#allocation7 + $0x48] sm:$0xff] }
 0x9ef   :  { %2387 = vmatpush1.msra.mxu0 %v2294_v42  ;;  %7621 = vst [vmem:[#allocation40_spill] sm:$0xff] %v6280_v16  ;;  %v6286_v42 = vld [vmem:[#allocation7 + $0x28] sm:$0xff] }
 0x9f0   :  { %2388 = vmatprep.subr.mxu0 %v2291_v43  ;;  %7623 = vst [vmem:[#allocation12_spill] sm:$0xff] %v6286_v42 }
 0x9f1   :  { %2389 = vmatpush1.msra.mxu0 %v2290_v45  ;;  %v6294_v45 = vld [vmem:[#allocation7 + $0x1d8] sm:$0xff] }
 0x9f2   :  { %2390 = vmatprep.subr.mxu0 %v2287_v47  ;;  %v6300_v47 = vld [vmem:[#allocation7 + $0x1b8] sm:$0xff] }
 0x9f3   :  { %2391 = vmatpush1.msra.mxu0 %v2286_v49  ;;  %v6307_v49 = vld [vmem:[#allocation7 + $0x198] sm:$0xff] }
 0x9f4   :  { %2392 = vmatprep.subr.mxu0 %v2283_v9  ;;  %v6313_v9 = vld [vmem:[#allocation7 + $0x178] sm:$0xff] }
 0x9f5   :  { %2393 = vmatpush1.msra.mxu0 %v2282_v21  ;;  %v6319_v21 = vld [vmem:[#allocation7 + $0x158] sm:$0xff] }
 0x9f6   :  { %2394 = vmatprep.subr.mxu0 %v2279_v62  ;;  %v6325_v62 = vld [vmem:[#allocation7 + $0x138] sm:$0xff] }
 0x9f7   :  { %2395 = vmatpush1.msra.mxu0 %v2278_v63  ;;  %v6331_v63 = vld [vmem:[#allocation7 + $0x118] sm:$0xff] }
 0x9f8   :  { %2665 = vmatprep.subr.mxu0 %v6198_v54 }
 0xa94   :  { %v2172_v57 = vpop.f32.mrf.mxu0 }
 0xa95   :  { %v6179_v2 = vadd.f32 %v4352_v35, %v2172_v57  ;;  %v6337_v35 = vld [vmem:[#allocation7 + $0xf8] sm:$0xff]  ;;  %v6340_v57 = vld [vmem:[#allocation7 + $0xf0] sm:$0xff] }
 0xa96   :  { %v4482_v33 = vpop.f32.mrf.mxu0 }
 0xa97   :  { %2176 = vst [vmem:[%s7217_s21] sm:$0x3] %v6179_v2  ;;  %v2177_v3 = vmul.f32 0.5, %v6179_v2  ;;  %v6346_v33 = vld [vmem:[#allocation7 + $0xd0] sm:$0xff] }
 0xa98   :  { %v4489_v53 = vpop.f32.mrf.mxu0 }
 0xa99   :  { %v2178_v51 = vmul.f32 1.442695, %v2177_v3  ;;  %v2275_v55 = vadd.f32 %v4489_v53, %v4354_v52  ;;  %v6349_v3 = vld [vmem:[#allocation7 + $0xb8] sm:$0xff]  ;;  %v6352_v53 = vld [vmem:[#allocation7 + $0xb0] sm:$0xff] }
 0xa9a   :  { %v2269_v50 = vpop.f32.mrf.mxu0 }
 0xa9b   :  { %4670 = vpow2.f32 %v2178_v51  ;;  %v2270_v59 = vadd.f32 %v4354_v52, %v2269_v50  ;;  %v6355_v52 = vld [vmem:[#allocation7 + $0x98] sm:$0xff]  ;;  %v6358_v51 = vld [vmem:[#allocation7 + $0x90] sm:$0xff] }
 0xa9c   :  { %7624 = vst [vmem:[#allocation13_spill] sm:$0xff] %v6355_v52  ;;  %7625 = vst [vmem:[#allocation16_spill] sm:$0xff] %v6358_v51  ;;  %v6361_v50 = vld [vmem:[#allocation7 + $0x78] sm:$0xff] }
 0xa9d   :  { %2429 = vmatmul.mubr.f32.vlgmr.msra.gmra.mxu0 %v2270_v59  ;;  %2506 = vmatmul.mubr.f32.vlgmr.msra.gmra.mxu1 %v2270_v59  ;;  %7626 = vst [vmem:[#allocation17_spill] sm:$0xff] %v6361_v50  ;;  %v6364_v59 = vld [vmem:[#allocation7 + $0x70] sm:$0xff] }
 0xa9e   :  { %2434 = vmatprep.mubr.f32.mxu0 %v7612_v24  ;;  %2511 = vmatprep.mubr.f32.mxu1 %v7612_v24  ;;  %7627 = vst [vmem:[#allocation18_spill] sm:$0xff] %v6364_v59 }
 0xa9f   :  { %4491 = vmatpush3.msra.mxu1 %v2584_v11  ;;  %2666 = vmatpush1.msra.mxu0 %v6202_v1  ;;  %v6367_v11 = vld [vmem:[#allocation7 + $0x58] sm:$0xff] }
 0xaa0   :  { %4492 = vmatprep.subr.mxu1 %v7612_v24  ;;  %2667 = vmatprep.subr.mxu0 %v6206_v8  ;;  %7628 = vst [vmem:[#allocation19_spill] sm:$0xff] %v6367_v11 }
 0xaa1   :  { %2435 = vmatmul.mubr.f32.gmra.mxu0 %v2275_v55  ;;  %2512 = vmatmul.mubr.f32.gmra.mxu1 %v2275_v55  ;;  %v6370_v55 = vld [vmem:[#allocation7 + $0x50] sm:$0xff] }
 0xaa2   :  { %4493 = vmatpush3.msra.mxu1 %v2583_v0  ;;  %4494 = vmatprep.mubr.msk.f32.mxu1 %vm5031_vm2, %v7612_v24  ;;  %7629 = vst [vmem:[#allocation20_spill] sm:$0xff] %v6370_v55  ;;  %v6373_v0 = vld [vmem:[#allocation7 + $0x38] sm:$0xff] }
 0xaa3   :  { %2736 = vmatprep.subr.mxu1 %v6200_v6  ;;  %2729 = vmatprep.mubr.f32.mxu0 %v7612_v24  ;;  %7630 = vst [vmem:[#allocation21_spill] sm:$0xff] %v6373_v0 }
 0xaa4   :  { %2668 = vmatpush1.msra.mxu0 %v6210_v7 }
 0xaa5   :  { %2669 = vmatprep.subr.mxu0 %v6213_v12 }
 0xaa6   :  { %2670 = vmatpush1.msra.mxu0 %v6217_v13 }
 0xaa7   :  { %2671 = vmatprep.subr.mxu0 %v6220_v15 }
 0xaa8   :  { %v4671_v18 = vpop.eup %4670  ;;  %2672 = vmatpush1.msra.mxu0 %v6223_v17 }
 0xaa9   :  { %v2185_v20 = vmul.f32 %v4671_v18, %v2183_v14  ;;  %2673 = vmatprep.subr.mxu0 %v6226_v19  ;;  %v2342_v14 = vld [vmem:[%s7214_s18] sm:$0xf] }
 0xaaa   :  { %2674 = vmatpush1.msra.mxu0 %v6229_v22  ;;  %v7631_v18 = vld [vmem:[#allocation36_spill] sm:$0xff] }
 0xaab   :  { %2187 = vrot.lane.b32.xlu0 %v2185_v20, %s5033_s13  ;;  %2675 = vmatprep.subr.mxu0 %v6232_v23  ;;  %v6382_v20 = vrot.slane %v2342_v14, %v7631_v18 }
 0xaac   :  { %2676 = vmatpush1.msra.mxu0 %v6235_v25 }
 0xaad   :  { %2677 = vmatprep.subr.mxu0 %v6238_v26  ;;  %7632 = vst [vmem:[#allocation22_spill] sm:$0xff] %v6382_v20 }
 0xaae   :  { %2678 = vmatpush1.msra.mxu0 %v6243_v27 }
 0xaaf   :  { %2679 = vmatprep.subr.mxu0 %v6245_v28 }
 0xab0   :  { %2680 = vmatpush1.msra.mxu0 %v6249_v29 }
 0xab1   :  { %2681 = vmatprep.subr.mxu0 %v6251_v30 }
 0xab2   :  { %2682 = vmatpush1.msra.mxu0 %v6255_v31 }
 0xab3   :  { %2683 = vmatprep.subr.mxu0 %v6257_v32 }
 0xab4   :  { %2684 = vmatpush1.msra.mxu0 %v6261_v10 }
 0xab5   :  { %2685 = vmatprep.subr.mxu0 %v6263_v58 }
 0xab6   :  { %2686 = vmatpush1.msra.mxu0 %v6266_v34 }
 0xab7   :  { %2687 = vmatprep.subr.mxu0 %v6269_v37 }
 0xab8   :  { %2688 = vmatpush1.msra.mxu0 %v6271_v38 }
 0xab9   :  { %2689 = vmatprep.subr.mxu0 %v6274_v39 }
 0xaba   :  { %2690 = vmatpush1.msra.mxu0 %v6277_v40 }
 0xabb   :  { %2691 = vmatprep.subr.mxu0 %v6280_v16 }
 0xabc   :  { %2692 = vmatpush1.msra.mxu0 %v6283_v41  ;;  %v7637_v41 = vld [vmem:[#allocation39_spill] sm:$0xff] }
 0xabd   :  { %2693 = vmatprep.subr.mxu0 %v6286_v42  ;;  %v6391_v16 = vrot.slane %v2342_v14, %v7637_v41 }
 0xabf   :  { %7638 = vst [vmem:[#allocation25_spill] sm:$0xff] %v6391_v16 }
 0xb1d   :  { %v2188_v61 = vpop.permute.xlu0 %2187 }
 0xb1e   :  { %v2190_v43 = vadd.f32 %v2188_v61, %v6179_v2  ;;  %v6343_v2 = vld [vmem:[#allocation7 + $0xd8] sm:$0xff]  ;;  %v7633_v61 = vld [vmem:[#allocation37_spill] sm:$0xff] }
 0xb20   :  { %4495 = vmatmul.mubr.msk.f32.vlgmr.msra.gmra.mxu1 %vm2102_vm3, %v2190_v43  ;;  %v6385_v43 = vrot.slane %v2342_v14, %v7633_v61 }
 0xb21   :  { %2737 = vmatpush1.msra.mxu1 %v6292_v44  ;;  %2800 = vmatprep.mubr.f32.mxu1 %v7612_v24  ;;  %v7635_v24 = vld [vmem:[#allocation38_spill] sm:$0xff] }
 0xb22   :  { %2738 = vmatprep.subr.mxu1 %v6294_v45  ;;  %7634 = vst [vmem:[#allocation23_spill] sm:$0xff] %v6385_v43  ;;  %v6388_v42 = vrot.slane %v2342_v14, %v7635_v24  ;;  %v6405_v24 = vld [vmem:[#allocation7 + $0x20] sm:$0xff]  ;;  %v6407_v14 = vld [vmem:[#allocation7 + $0x30] sm:$0xff] }
 0xb23   :  { %2739 = vmatpush1.msra.mxu1 %v6297_v46  ;;  %7643 = vst [vmem:[#allocation30_spill] sm:$0xff] %v6405_v24  ;;  %7644 = vst [vmem:[#allocation31_spill] sm:$0xff] %v6407_v14  ;;  %2694 = vmatpush1.msra.mxu0 %v6405_v24 }
 0xb24   :  { %2740 = vmatprep.subr.mxu1 %v6300_v47  ;;  %7636 = vst [vmem:[#allocation24_spill] sm:$0xff] %v6388_v42 }
 0xb25   :  { %2741 = vmatpush1.msra.mxu1 %v6304_v48 }
 0xb26   :  { %2742 = vmatprep.subr.mxu1 %v6307_v49 }
 0xb27   :  { %2743 = vmatpush1.msra.mxu1 %v6310_v56 }
 0xb28   :  { %2744 = vmatprep.subr.mxu1 %v6313_v9 }
 0xb29   :  { %2745 = vmatpush1.msra.mxu1 %v6316_v4 }
 0xb2a   :  { %2746 = vmatprep.subr.mxu1 %v6319_v21 }
 0xb2b   :  { %2747 = vmatpush1.msra.mxu1 %v6322_v5 }
 0xb2c   :  { %2748 = vmatprep.subr.mxu1 %v6325_v62 }
 0xb2d   :  { %2749 = vmatpush1.msra.mxu1 %v6328_v60 }
 0xb2e   :  { %2750 = vmatprep.subr.mxu1 %v6331_v63 }
 0xb2f   :  { %2751 = vmatpush1.msra.mxu1 %v6334_v36 }
 0xb30   :  { %2752 = vmatprep.subr.mxu1 %v6337_v35 }
 0xb31   :  { %2753 = vmatpush1.msra.mxu1 %v6340_v57 }
 0xb32   :  { %2754 = vmatprep.subr.mxu1 %v6343_v2 }
 0xb33   :  { %2755 = vmatpush1.msra.mxu1 %v6346_v33 }
 0xb34   :  { %2756 = vmatprep.subr.mxu1 %v6349_v3 }
 0xb35   :  { %2757 = vmatpush1.msra.mxu1 %v6352_v53 }
 0xb36   :  { %2758 = vmatprep.subr.mxu1 %v6355_v52 }
 0xb37   :  { %2759 = vmatpush1.msra.mxu1 %v6358_v51 }
 0xb38   :  { %2760 = vmatprep.subr.mxu1 %v6361_v50 }
 0xb39   :  { %2761 = vmatpush1.msra.mxu1 %v6364_v59 }
 0xb3a   :  { %2762 = vmatprep.subr.mxu1 %v6367_v11 }
 0xb3b   :  { %2763 = vmatpush1.msra.mxu1 %v6370_v55 }
 0xb3c   :  { %2764 = vmatprep.subr.mxu1 %v6373_v0 }
 0xb3d   :  { %2765 = vmatpush1.msra.mxu1 %v6407_v14 }
 0xb5d   :  { %v2430_v11 = vpop.f32.mrf.mxu0  ;;  %v2507_v55 = vpop.f32.mrf.mxu1 }
 0xb5e   :  { %v6394_v0 = vadd.f32 %v2430_v11, %v6382_v20  ;;  %v6397_v59 = vadd.f32 %v2507_v55, %v6385_v43  ;;  %v6411_v11 = vld [vmem:[#allocation7 + $0x8] sm:$0xff]  ;;  %v6413_v55 = vld [vmem:[#allocation7 + $0x18] sm:$0xff]  ;;  %v7658_v20 = vld [vmem:[#allocation12_spill] sm:$0xff] }
 0xb5f   :  { %v2432_v40 = vpop.f32.mrf.mxu0  ;;  %v2509_v18 = vpop.f32.mrf.mxu1  ;;  %7645 = vst [vmem:[#allocation32_spill] sm:$0xff] %v6411_v11  ;;  %7646 = vst [vmem:[#allocation33_spill] sm:$0xff] %v6413_v55  ;;  %2695 = vmatprep.subr.mxu0 %v6411_v11  ;;  %2766 = vmatprep.subr.mxu1 %v6413_v55 }
 0xb60   :  { %7639 = vst [vmem:[#allocation26_spill] sm:$0xff] %v6394_v0  ;;  %7640 = vst [vmem:[#allocation27_spill] sm:$0xff] %v6397_v59  ;;  %v6400_v50 = vadd.f32 %v2432_v40, %v6388_v42  ;;  %v6403_v61 = vadd.f32 %v2509_v18, %v6391_v16  ;;  %v6417_v40 = vld [vmem:[#allocation7] sm:$0xff]  ;;  %v6419_v18 = vld [vmem:[#allocation7 + $0x10] sm:$0xff] }
 0xb61   :  { %7647 = vst [vmem:[#allocation39_spill] sm:$0xff] %v6417_v40  ;;  %7648 = vst [vmem:[#allocation44_spill] sm:$0xff] %v6419_v18  ;;  %2696 = vmatpush1.msra.mxu0 %v6417_v40  ;;  %2767 = vmatpush1.msra.mxu1 %v6419_v18  ;;  %v6425_v59 = vpop.f32.mrf.mxu1  ;;  %v7657_v42 = vld [vmem:[#allocation20_spill] sm:$0xff] }
 0xb62   :  { %7641 = vst [vmem:[#allocation28_spill] sm:$0xff] %v6400_v50  ;;  %7642 = vst [vmem:[#allocation29_spill] sm:$0xff] %v6403_v61  ;;  %2856 = vmatprep.subr.mxu0 %v6198_v54  ;;  %2927 = vmatprep.subr.mxu1 %v6200_v6  ;;  %v4358_v50 = vld [vmem:[%s7211_s15] ss:$0 sm:$0xff] }
 0xb63   :  { %7649 = vst [vmem:[#allocation45_spill] sm:$0xff] %v6425_v59  ;;  %v6427_v61 = vpop.f32.mrf.mxu1  ;;  %v7655_v59 = vld [vmem:[#allocation19_spill] sm:$0xff] }
 0xb64   :  { %7650 = vst [vmem:[#allocation46_spill] sm:$0xff] %v6427_v61  ;;  %v7656_v61 = vld [vmem:[#allocation42_spill] sm:$0xff] }
 0xbe0   :  { %v2661_v0 = vpop.f32.mrf.mxu1 }
 0xbe1   :  { %v2662_v43 = vadd.f32 %v4358_v50, %v2661_v0  ;;  %v7652_v50 = vld [vmem:[#allocation15_spill] sm:$0xff]  ;;  %v7653_v0 = vld [vmem:[#allocation18_spill] sm:$0xff] }
 0xbe2   :  { %v4496_v16 = vpop.f32.mrf.mxu1 }
 0xbe3   :  { %2730 = vmatmul.mubr.f32.vlgmr.msra.gmra.mxu0 %v2662_v43  ;;  %2801 = vmatmul.mubr.f32.vlgmr.msra.gmra.mxu1 %v2662_v43  ;;  %v7651_v16 = vld [vmem:[#allocation17_spill] sm:$0xff]  ;;  %v7654_v43 = vld [vmem:[#allocation40_spill] sm:$0xff] }
 0xbe4   :  { %2857 = vmatpush1.msra.mxu0 %v6202_v1  ;;  %2928 = vmatpush1.msra.mxu1 %v6292_v44 }
 0xbe5   :  { %2858 = vmatprep.subr.mxu0 %v6206_v8  ;;  %2929 = vmatprep.subr.mxu1 %v6294_v45 }
 0xbe6   :  { %2859 = vmatpush1.msra.mxu0 %v6210_v7  ;;  %2930 = vmatpush1.msra.mxu1 %v6297_v46 }
 0xbe7   :  { %2860 = vmatprep.subr.mxu0 %v6213_v12  ;;  %2931 = vmatprep.subr.mxu1 %v6300_v47 }
 0xbe8   :  { %2861 = vmatpush1.msra.mxu0 %v6217_v13  ;;  %2932 = vmatpush1.msra.mxu1 %v6304_v48 }
 0xbe9   :  { %2862 = vmatprep.subr.mxu0 %v6220_v15  ;;  %2933 = vmatprep.subr.mxu1 %v6307_v49 }
 0xbea   :  { %2863 = vmatpush1.msra.mxu0 %v6223_v17  ;;  %2934 = vmatpush1.msra.mxu1 %v6310_v56 }
 0xbeb   :  { %2864 = vmatprep.subr.mxu0 %v6226_v19  ;;  %2935 = vmatprep.subr.mxu1 %v6313_v9 }
 0xbec   :  { %2865 = vmatpush1.msra.mxu0 %v6229_v22  ;;  %2936 = vmatpush1.msra.mxu1 %v6316_v4 }
 0xbed   :  { %2866 = vmatprep.subr.mxu0 %v6232_v23  ;;  %2937 = vmatprep.subr.mxu1 %v6319_v21 }
 0xbee   :  { %2867 = vmatpush1.msra.mxu0 %v6235_v25  ;;  %2938 = vmatpush1.msra.mxu1 %v6322_v5 }
 0xbef   :  { %2868 = vmatprep.subr.mxu0 %v6238_v26  ;;  %2939 = vmatprep.subr.mxu1 %v6325_v62 }
 0xbf0   :  { %2869 = vmatpush1.msra.mxu0 %v6243_v27  ;;  %2940 = vmatpush1.msra.mxu1 %v6328_v60 }
 0xbf1   :  { %2870 = vmatprep.subr.mxu0 %v6245_v28  ;;  %2941 = vmatprep.subr.mxu1 %v6331_v63 }
 0xbf2   :  { %2871 = vmatpush1.msra.mxu0 %v6249_v29  ;;  %2942 = vmatpush1.msra.mxu1 %v6334_v36 }
 0xbf3   :  { %2872 = vmatprep.subr.mxu0 %v6251_v30  ;;  %2943 = vmatprep.subr.mxu1 %v6337_v35 }
 0xbf4   :  { %2873 = vmatpush1.msra.mxu0 %v6255_v31  ;;  %2944 = vmatpush1.msra.mxu1 %v6340_v57 }
 0xbf5   :  { %2874 = vmatprep.subr.mxu0 %v6257_v32  ;;  %2945 = vmatprep.subr.mxu1 %v6343_v2 }
 0xbf6   :  { %2875 = vmatpush1.msra.mxu0 %v6261_v10  ;;  %2946 = vmatpush1.msra.mxu1 %v6346_v33 }
 0xbf7   :  { %2876 = vmatprep.subr.mxu0 %v6263_v58  ;;  %2947 = vmatprep.subr.mxu1 %v6349_v3 }
 0xbf8   :  { %2877 = vmatpush1.msra.mxu0 %v6266_v34  ;;  %2948 = vmatpush1.msra.mxu1 %v6352_v53 }
 0xbf9   :  { %2878 = vmatprep.subr.mxu0 %v6269_v37  ;;  %2949 = vmatprep.subr.mxu1 %v6355_v52 }
 0xbfa   :  { %2879 = vmatpush1.msra.mxu0 %v6271_v38  ;;  %2950 = vmatpush1.msra.mxu1 %v6358_v51  ;;  %v7659_v38 = vld [vmem:[#allocation21_spill] sm:$0xff] }
 0xbfb   :  { %2880 = vmatprep.subr.mxu0 %v6274_v39  ;;  %2951 = vmatprep.subr.mxu1 %v7651_v16  ;;  %v7666_v16 = vld [vmem:[#allocation37_spill] sm:$0xff] }
 0xbfc   :  { %2881 = vmatpush1.msra.mxu0 %v7652_v50  ;;  %2952 = vmatpush1.msra.mxu1 %v7653_v0 }
 0xbfd   :  { %2882 = vmatprep.subr.mxu0 %v7654_v43  ;;  %2953 = vmatprep.subr.mxu1 %v7655_v59  ;;  %v7660_v43 = vmov 0.0  }
 0xbfe   :  { %2883 = vmatpush1.msra.mxu0 %v7656_v61  ;;  %2954 = vmatpush1.msra.mxu1 %v7657_v42 }
 0xbff   :  { %2884 = vmatprep.subr.mxu0 %v7658_v20  ;;  %2955 = vmatprep.subr.mxu1 %v7659_v38  ;;  %v6498_v38 = vpop.f32.mrf.mxu0 }
 0xc00   :  { %2885 = vmatpush1.msra.mxu0 %v6405_v24  ;;  %2956 = vmatpush1.msra.mxu1 %v6407_v14  ;;  %7661 = vst [vmem:[#allocation47_spill] sm:$0xff] %v6498_v38  ;;  %v7663_v14 = vld [vmem:[#allocation36_spill] sm:$0xff] }
 0xc01   :  { %2886 = vmatprep.subr.mxu0 %v6411_v11  ;;  %2957 = vmatprep.subr.mxu1 %v6413_v55  ;;  %v2582_v11 = vld [vmem:[%s7662_s25] sm:$0xf]  ;;  %v6504_v24 = vpop.f32.mrf.mxu0 }
 0xc02   :  { %2887 = vmatpush1.msra.mxu0 %v6417_v40  ;;  %2920 = vmatprep.mubr.f32.mxu0 %v7660_v43  ;;  %v2811_v55 = vrot.slane %v2582_v11, %v7663_v14  ;;  %7664 = vst [vmem:[#allocation36_spill] sm:$0xff] %v6504_v24  ;;  %v7665_v40 = vld [vmem:[#allocation38_spill] sm:$0xff]  ;;  %v2823_v38 = vrot.slane %v2582_v11, %v7637_v41 }
 0xc03   :  { %2958 = vmatpush1.msra.mxu1 %v6419_v18  ;;  %2991 = vmatprep.mubr.f32.mxu1 %v7660_v43  ;;  %v2815_v20 = vrot.slane %v2582_v11, %v7665_v40  ;;  %v2819_v39 = vrot.slane %v2582_v11, %v7666_v16  ;;  %v7670_v11 = vld [vmem:[#allocation16_spill] sm:$0xff]  ;;  %v7671_v16 = vld [vmem:[#allocation14_spill] sm:$0xff] }
 0xc04   :  { %3044 = vmatprep.subr.mxu0 %v6198_v54  ;;  %3115 = vmatprep.subr.mxu1 %v6200_v6 }
 0xca3   :  { %v2731_v42 = vpop.f32.mrf.mxu0  ;;  %v2802_v54 = vpop.f32.mrf.mxu1 }
 0xca4   :  { %v2828_v18 = vadd.f32 %v2811_v55, %v2731_v42  ;;  %v2830_v24 = vadd.f32 %v2819_v39, %v2802_v54 }
 0xca5   :  { %v2733_v61 = vpop.f32.mrf.mxu0  ;;  %v2804_v0 = vpop.f32.mrf.mxu1 }
 0xca6   :  { %v4360_v43 = vmul.f32 -1.442695, %v2828_v18  ;;  %v2829_v59 = vadd.f32 %v2815_v20, %v2733_v61  ;;  %v2831_v50 = vadd.f32 %v2823_v38, %v2804_v0  ;;  %v7673_v0 = vld [vmem:[#allocation15_spill] sm:$0xff] }
 0xca8   :  { %4672 = vpow2.f32 %v4360_v43  ;;  %v4361_v6 = vmul.f32 -1.442695, %v2829_v59  ;;  %v4362_v14 = vmul.f32 -1.442695, %v2831_v50  ;;  %v7672_v50 = vld [vmem:[#allocation17_spill] sm:$0xff]  ;;  %v7674_v43 = vld [vmem:[#allocation18_spill] sm:$0xff] }
 0xcaa   :  { %4674 = vpow2.f32 %v4361_v6 }
 0xcab   :  { %4676 = vpow2.f32 %v4362_v14  ;;  %v7675_v14 = vld [vmem:[#allocation40_spill] sm:$0xff] }
 0xcb5   :  { %v4673_v51 = vpop.eup %4672 }
 0xcb6   :  { %v2835_v52 = vadd.f32 1.0, %v4673_v51 }
 0xcb7   :  { %v4675_v40 = vpop.eup %4674 }
 0xcb8   :  { %4678 = vrcp.f32 %v2835_v52  ;;  %v2841_v42 = vadd.f32 1.0, %v4675_v40  ;;  %v4677_v20 = vpop.eup %4676  ;;  %v7669_v52 = vld [vmem:[#allocation41_spill] sm:$0xff]  ;;  %v7676_v40 = vld [vmem:[#allocation19_spill] sm:$0xff] }
 0xcb9   :  { %4680 = vtanh.f32 %v2830_v24  ;;  %v2848_v55 = vadd.f32 1.0, %v4677_v20  ;;  %v7668_v24 = vld [vmem:[#allocation13_spill] sm:$0xff]  ;;  %v7678_v20 = vld [vmem:[#allocation20_spill] sm:$0xff] }
 0xcba   :  { %4682 = vrcp.f32 %v2841_v42  ;;  %v7677_v42 = vld [vmem:[#allocation42_spill] sm:$0xff] }
 0xcbb   :  { %4684 = vrcp.f32 %v2848_v55  ;;  %v7682_v55 = vld [vmem:[#allocation31_spill] sm:$0xff] }
 0xcc5   :  { %v4679_v61 = vpop.eup %4678 }
 0xcc6   :  { %v4681_v59 = vpop.eup %4680 }
 0xcc7   :  { %v4683_v6 = vpop.eup %4682  ;;  %v2852_v18 = vmul.f32 %v4681_v59, %v4679_v61  ;;  %v7679_v61 = vld [vmem:[#allocation12_spill] sm:$0xff]  ;;  %v7680_v59 = vld [vmem:[#allocation21_spill] sm:$0xff] }
 0xcc8   :  { %v2851_v41 = vmul.f32 0.0, %v4683_v6  ;;  %v4685_v54 = vpop.eup %4684  ;;  %v7681_v6 = vld [vmem:[#allocation30_spill] sm:$0xff] }
 0xcca   :  { %v6509_v38 = vadd.f32 %v2852_v18, %v2851_v41  ;;  %v7683_v41 = vld [vmem:[#allocation32_spill] sm:$0xff]  ;;  %v7684_v18 = vld [vmem:[#allocation33_spill] sm:$0xff] }
 0xccc   :  { %4686 = vtanh.f32 %v6509_v38 }
 0xcd9   :  { %v4687_v39 = vpop.eup %4686 }
 0xcda   :  { %v6512_v51 = vmul.f32 %v4687_v39, %v4685_v54  ;;  %v7685_v54 = vld [vmem:[#allocation39_spill] sm:$0xff]  ;;  %v7686_v39 = vmov 0.0  }
 0xcdc   :  { %7667 = vst [vmem:[#allocation38_spill] sm:$0xff] %v6512_v51  ;;  %2921 = vmatmul.mubr.f32.vlgmr.msra.gmra.mxu0 %v6512_v51  ;;  %2992 = vmatmul.mubr.f32.vlgmr.msra.gmra.mxu1 %v6512_v51  ;;  %v7687_v51 = vld [vmem:[#allocation44_spill] sm:$0xff] }
 0xcdd   :  { %3045 = vmatpush1.msra.mxu0 %v6202_v1  ;;  %3116 = vmatpush1.msra.mxu1 %v6292_v44 }
 0xcde   :  { %3046 = vmatprep.subr.mxu0 %v6206_v8  ;;  %3117 = vmatprep.subr.mxu1 %v6294_v45 }
 0xcdf   :  { %3047 = vmatpush1.msra.mxu0 %v6210_v7  ;;  %3118 = vmatpush1.msra.mxu1 %v6297_v46 }
 0xce0   :  { %3048 = vmatprep.subr.mxu0 %v6213_v12  ;;  %3119 = vmatprep.subr.mxu1 %v6300_v47 }
 0xce1   :  { %3049 = vmatpush1.msra.mxu0 %v6217_v13  ;;  %3120 = vmatpush1.msra.mxu1 %v6304_v48 }
 0xce2   :  { %3050 = vmatprep.subr.mxu0 %v6220_v15  ;;  %3121 = vmatprep.subr.mxu1 %v6307_v49 }
 0xce3   :  { %3051 = vmatpush1.msra.mxu0 %v6223_v17  ;;  %3122 = vmatpush1.msra.mxu1 %v6310_v56 }
 0xce4   :  { %3052 = vmatprep.subr.mxu0 %v6226_v19  ;;  %3123 = vmatprep.subr.mxu1 %v6313_v9 }
 0xce5   :  { %3053 = vmatpush1.msra.mxu0 %v6229_v22  ;;  %3124 = vmatpush1.msra.mxu1 %v6316_v4 }
 0xce6   :  { %3054 = vmatprep.subr.mxu0 %v6232_v23  ;;  %3125 = vmatprep.subr.mxu1 %v6319_v21 }
 0xce7   :  { %3055 = vmatpush1.msra.mxu0 %v6235_v25  ;;  %3126 = vmatpush1.msra.mxu1 %v6322_v5 }
 0xce8   :  { %3056 = vmatprep.subr.mxu0 %v6238_v26  ;;  %3127 = vmatprep.subr.mxu1 %v6325_v62 }
 0xce9   :  { %3057 = vmatpush1.msra.mxu0 %v6243_v27  ;;  %3128 = vmatpush1.msra.mxu1 %v6328_v60 }
 0xcea   :  { %3058 = vmatprep.subr.mxu0 %v6245_v28  ;;  %3129 = vmatprep.subr.mxu1 %v6331_v63 }
 0xceb   :  { %3059 = vmatpush1.msra.mxu0 %v6249_v29  ;;  %3130 = vmatpush1.msra.mxu1 %v6334_v36 }
 0xcec   :  { %3060 = vmatprep.subr.mxu0 %v6251_v30  ;;  %3131 = vmatprep.subr.mxu1 %v6337_v35 }
 0xced   :  { %3061 = vmatpush1.msra.mxu0 %v6255_v31  ;;  %3132 = vmatpush1.msra.mxu1 %v6340_v57 }
 0xcee   :  { %3062 = vmatprep.subr.mxu0 %v6257_v32  ;;  %3133 = vmatprep.subr.mxu1 %v6343_v2 }
 0xcef   :  { %3063 = vmatpush1.msra.mxu0 %v6261_v10  ;;  %3134 = vmatpush1.msra.mxu1 %v6346_v33 }
 0xcf0   :  { %3064 = vmatprep.subr.mxu0 %v6263_v58  ;;  %3135 = vmatprep.subr.mxu1 %v6349_v3 }
 0xcf1   :  { %3065 = vmatpush1.msra.mxu0 %v6266_v34  ;;  %3136 = vmatpush1.msra.mxu1 %v6352_v53 }
 0xcf2   :  { %3066 = vmatprep.subr.mxu0 %v6269_v37  ;;  %3137 = vmatprep.subr.mxu1 %v7668_v24 }
 0xcf3   :  { %3067 = vmatpush1.msra.mxu0 %v7669_v52  ;;  %3138 = vmatpush1.msra.mxu1 %v7670_v11  ;;  %v7698_v52 = vld [vmem:[#allocation45_spill] sm:$0xff] }
 0xcf4   :  { %3068 = vmatprep.subr.mxu0 %v7671_v16  ;;  %3139 = vmatprep.subr.mxu1 %v7672_v50 }
 0xcf5   :  { %3069 = vmatpush1.msra.mxu0 %v7673_v0  ;;  %3140 = vmatpush1.msra.mxu1 %v7674_v43 }
 0xcf6   :  { %3070 = vmatprep.subr.mxu0 %v7675_v14  ;;  %3141 = vmatprep.subr.mxu1 %v7676_v40  ;;  %v7693_v14 = vld [vmem:[#allocation36_spill] sm:$0xff] }
 0xcf7   :  { %3071 = vmatpush1.msra.mxu0 %v7677_v42  ;;  %3142 = vmatpush1.msra.mxu1 %v7678_v20  ;;  %v7688_v20 = vld [vmem:[#allocation34_spill] sm:$0xff]  ;;  %v7691_v42 = vld [vmem:[#allocation47_spill] sm:$0xff] }
 0xcf8   :  { %3072 = vmatprep.subr.mxu0 %v7679_v61  ;;  %3143 = vmatprep.subr.mxu1 %v7680_v59  ;;  %v7689_v61 = vld [vmem:[#allocation35_spill] sm:$0xff] }
 0xcf9   :  { %3073 = vmatpush1.msra.mxu0 %v7681_v6  ;;  %3144 = vmatpush1.msra.mxu1 %v7682_v55  ;;  %v7690_v6 = vld [vmem:[#allocation22_spill] sm:$0xff] }
 0xcfa   :  { %3074 = vmatprep.subr.mxu0 %v7683_v41  ;;  %3145 = vmatprep.subr.mxu1 %v7684_v18  ;;  %v6584_v55 = vadd.f32 %v7691_v42, %v7690_v6  ;;  %v7692_v18 = vld [vmem:[#allocation24_spill] sm:$0xff]  ;;  %v7694_v42 = vld [vmem:[#allocation25_spill] sm:$0xff]  ;;  %v7695_v6 = vld [vmem:[#allocation46_spill] sm:$0xff] }
 0xcfb   :  { %3075 = vmatpush1.msra.mxu0 %v7685_v54  ;;  %3108 = vmatprep.mubr.f32.mxu0 %v7686_v39  ;;  %v6588_v54 = vadd.f32 %v7693_v14, %v7692_v18  ;;  %v7697_v18 = vld [vmem:[#allocation23_spill] sm:$0xff] }
 0xcfc   :  { %3146 = vmatpush1.msra.mxu1 %v7687_v51  ;;  %3179 = vmatprep.mubr.f32.mxu1 %v7686_v39 }
 0xcfd   :  { %3232 = vmatprep.subr.mxu0 %v7688_v20  ;;  %3303 = vmatprep.subr.mxu1 %v7689_v61 }
 0xd9c   :  { %v2922_v59 = vpop.f32.mrf.mxu0  ;;  %v2993_v51 = vpop.f32.mrf.mxu1 }
 0xd9d   :  { %v3002_v41 = vrot.slane %v2922_v59, 2  ;;  %v6594_v59 = vadd.f32 %v7695_v6, %v7694_v42  ;;  %v3004_v14 = vrot.slane %v2993_v51, 2  ;;  %v3034_v51 = vrot.slane %v6509_v38, 2  ;;  %v7700_v38 = vld [vmem:[#allocation41_spill] sm:$0xff] }
 0xd9e   :  { %v2924_v40 = vpop.f32.mrf.mxu0  ;;  %v2995_v50 = vpop.f32.mrf.mxu1 }
 0xd9f   :  { %v3010_v43 = vadd.f32 %v3002_v41, %v6584_v55  ;;  %v3003_v0 = vrot.slane %v2924_v40, 2  ;;  %v3005_v16 = vrot.slane %v2995_v50, 2  ;;  %7696 = vst [vmem:[#allocation37_spill] sm:$0xff] %v6594_v59  ;;  %v6599_v41 = vadd.f32 %v7698_v52, %v7697_v18 }
 0xda1   :  { %v4363_v39 = vmul.f32 -1.442695, %v3010_v43  ;;  %v3011_v20 = vadd.f32 %v3003_v0, %v6588_v54  ;;  %v3013_v11 = vadd.f32 %v3005_v16, %v6594_v59  ;;  %v3012_v0 = vadd.f32 %v3004_v14, %v6599_v41 }
 0xda3   :  { %4688 = vpow2.f32 %v4363_v39  ;;  %v4364_v61 = vmul.f32 -1.442695, %v3011_v20  ;;  %v4365_v40 = vmul.f32 -1.442695, %v3013_v11 }
 0xda5   :  { %4690 = vpow2.f32 %v4364_v61 }
 0xda6   :  { %4692 = vpow2.f32 %v4365_v40 }
 0xdb0   :  { %v4689_v43 = vpop.eup %4688 }
 0xdb1   :  { %v3017_v39 = vadd.f32 1.0, %v4689_v43 }
 0xdb2   :  { %v4691_v20 = vpop.eup %4690 }
 0xdb3   :  { %4694 = vrcp.f32 %v3017_v39  ;;  %v3023_v50 = vadd.f32 1.0, %v4691_v20  ;;  %v4693_v61 = vpop.eup %4692  ;;  %v7702_v39 = vld [vmem:[#allocation14_spill] sm:$0xff]  ;;  %v7703_v20 = vld [vmem:[#allocation17_spill] sm:$0xff] }
 0xdb4   :  { %4696 = vtanh.f32 %v3012_v0  ;;  %v3030_v59 = vadd.f32 1.0, %v4693_v61  ;;  %v7705_v61 = vld [vmem:[#allocation18_spill] sm:$0xff] }
 0xdb5   :  { %4698 = vrcp.f32 %v3023_v50  ;;  %v7704_v50 = vld [vmem:[#allocation15_spill] sm:$0xff] }
 0xdb6   :  { %4700 = vrcp.f32 %v3030_v59  ;;  %v7701_v59 = vld [vmem:[#allocation16_spill] sm:$0xff] }
 0xdc0   :  { %v4695_v42 = vpop.eup %4694 }
 0xdc1   :  { %v4697_v6 = vpop.eup %4696 }
 0xdc2   :  { %v4699_v16 = vpop.eup %4698  ;;  %v3037_v52 = vmul.f32 %v4697_v6, %v4695_v42  ;;  %v7706_v42 = vld [vmem:[#allocation40_spill] sm:$0xff]  ;;  %v7707_v6 = vld [vmem:[#allocation19_spill] sm:$0xff] }
 0xdc3   :  { %v3036_v18 = vmul.f32 %v4699_v16, %v3034_v51  ;;  %v4701_v14 = vpop.eup %4700  ;;  %v7708_v51 = vld [vmem:[#allocation42_spill] sm:$0xff]  ;;  %v7709_v16 = vld [vmem:[#allocation20_spill] sm:$0xff] }
 0xdc5   :  { %v6603_v11 = vadd.f32 %v3037_v52, %v3036_v18  ;;  %v7710_v52 = vld [vmem:[#allocation12_spill] sm:$0xff]  ;;  %v7711_v18 = vld [vmem:[#allocation21_spill] sm:$0xff] }
 0xdc7   :  { %4702 = vtanh.f32 %v6603_v11 }
 0xdd4   :  { %v4703_v40 = vpop.eup %4702 }
 0xdd5   :  { %v6606_v43 = vmul.f32 %v4703_v40, %v4701_v14  ;;  %v7712_v14 = vld [vmem:[#allocation30_spill] sm:$0xff]  ;;  %v7713_v40 = vld [vmem:[#allocation31_spill] sm:$0xff] }
 0xdd7   :  { %7699 = vst [vmem:[#allocation22_spill] sm:$0xff] %v6606_v43  ;;  %v3042_v0 = vrot.slane %v6606_v43, 6  ;;  %v7715_v43 = vld [vmem:[#allocation33_spill] sm:$0xff] }
 0xdd9   :  { %3109 = vmatmul.mubr.f32.vlgmr.msra.gmra.mxu0 %v3042_v0  ;;  %3180 = vmatmul.mubr.f32.vlgmr.msra.gmra.mxu1 %v3042_v0  ;;  %v7714_v0 = vld [vmem:[#allocation32_spill] sm:$0xff] }
 0xdda   :  { %3233 = vmatpush1.msra.mxu0 %v6202_v1  ;;  %3304 = vmatpush1.msra.mxu1 %v6292_v44 }
 0xddb   :  { %3234 = vmatprep.subr.mxu0 %v6206_v8  ;;  %3305 = vmatprep.subr.mxu1 %v6294_v45 }
 0xddc   :  { %3235 = vmatpush1.msra.mxu0 %v6210_v7  ;;  %3306 = vmatpush1.msra.mxu1 %v6297_v46 }
 0xddd   :  { %3236 = vmatprep.subr.mxu0 %v6213_v12  ;;  %3307 = vmatprep.subr.mxu1 %v6300_v47 }
 0xdde   :  { %3237 = vmatpush1.msra.mxu0 %v6217_v13  ;;  %3308 = vmatpush1.msra.mxu1 %v6304_v48 }
 0xddf   :  { %3238 = vmatprep.subr.mxu0 %v6220_v15  ;;  %3309 = vmatprep.subr.mxu1 %v6307_v49 }
 0xde0   :  { %3239 = vmatpush1.msra.mxu0 %v6223_v17  ;;  %3310 = vmatpush1.msra.mxu1 %v6310_v56 }
 0xde1   :  { %3240 = vmatprep.subr.mxu0 %v6226_v19  ;;  %3311 = vmatprep.subr.mxu1 %v6313_v9 }
 0xde2   :  { %3241 = vmatpush1.msra.mxu0 %v6229_v22  ;;  %3312 = vmatpush1.msra.mxu1 %v6316_v4 }
 0xde3   :  { %3242 = vmatprep.subr.mxu0 %v6232_v23  ;;  %3313 = vmatprep.subr.mxu1 %v6319_v21 }
 0xde4   :  { %3243 = vmatpush1.msra.mxu0 %v6235_v25  ;;  %3314 = vmatpush1.msra.mxu1 %v6322_v5 }
 0xde5   :  { %3244 = vmatprep.subr.mxu0 %v6238_v26  ;;  %3315 = vmatprep.subr.mxu1 %v6325_v62 }
 0xde6   :  { %3245 = vmatpush1.msra.mxu0 %v6243_v27  ;;  %3316 = vmatpush1.msra.mxu1 %v6328_v60 }
 0xde7   :  { %3246 = vmatprep.subr.mxu0 %v6245_v28  ;;  %3317 = vmatprep.subr.mxu1 %v6331_v63 }
 0xde8   :  { %3247 = vmatpush1.msra.mxu0 %v6249_v29  ;;  %3318 = vmatpush1.msra.mxu1 %v6334_v36 }
 0xde9   :  { %3248 = vmatprep.subr.mxu0 %v6251_v30  ;;  %3319 = vmatprep.subr.mxu1 %v6337_v35 }
 0xdea   :  { %3249 = vmatpush1.msra.mxu0 %v6255_v31  ;;  %3320 = vmatpush1.msra.mxu1 %v6340_v57 }
 0xdeb   :  { %3250 = vmatprep.subr.mxu0 %v6257_v32  ;;  %3321 = vmatprep.subr.mxu1 %v6343_v2 }
 0xdec   :  { %3251 = vmatpush1.msra.mxu0 %v6261_v10  ;;  %3322 = vmatpush1.msra.mxu1 %v6346_v33 }
 0xded   :  { %3252 = vmatprep.subr.mxu0 %v6263_v58  ;;  %3323 = vmatprep.subr.mxu1 %v6349_v3 }
 0xdee   :  { %3253 = vmatpush1.msra.mxu0 %v6266_v34  ;;  %3324 = vmatpush1.msra.mxu1 %v6352_v53 }
 0xdef   :  { %3254 = vmatprep.subr.mxu0 %v6269_v37  ;;  %3325 = vmatprep.subr.mxu1 %v7668_v24 }
 0xdf0   :  { %3255 = vmatpush1.msra.mxu0 %v7700_v38  ;;  %3326 = vmatpush1.msra.mxu1 %v7701_v59 }
 0xdf1   :  { %3256 = vmatprep.subr.mxu0 %v7702_v39  ;;  %3327 = vmatprep.subr.mxu1 %v7703_v20 }
 0xdf2   :  { %3257 = vmatpush1.msra.mxu0 %v7704_v50  ;;  %3328 = vmatpush1.msra.mxu1 %v7705_v61  ;;  %v7716_v61 = vld [vmem:[#allocation39_spill] sm:$0xff] }
 0xdf3   :  { %3258 = vmatprep.subr.mxu0 %v7706_v42  ;;  %3329 = vmatprep.subr.mxu1 %v7707_v6  ;;  %v7717_v42 = vmov 0.0   ;;  %v7718_v6 = vld [vmem:[#allocation44_spill] sm:$0xff] }
 0xdf4   :  { %3259 = vmatpush1.msra.mxu0 %v7708_v51  ;;  %3330 = vmatpush1.msra.mxu1 %v7709_v16  ;;  %v7719_v16 = vld [vmem:[#allocation34_spill] sm:$0xff] }
 0xdf5   :  { %3260 = vmatprep.subr.mxu0 %v7710_v52  ;;  %3331 = vmatprep.subr.mxu1 %v7711_v18  ;;  %v7720_v52 = vld [vmem:[#allocation35_spill] sm:$0xff] }
 0xdf6   :  { %3261 = vmatpush1.msra.mxu0 %v7712_v14  ;;  %3332 = vmatpush1.msra.mxu1 %v7713_v40 }
 0xdf7   :  { %3262 = vmatprep.subr.mxu0 %v7714_v0  ;;  %3333 = vmatprep.subr.mxu1 %v7715_v43 }
 0xdf8   :  { %3263 = vmatpush1.msra.mxu0 %v7716_v61  ;;  %3296 = vmatprep.mubr.f32.mxu0 %v7717_v42 }
 0xdf9   :  { %3334 = vmatpush1.msra.mxu1 %v7718_v6  ;;  %3367 = vmatprep.mubr.f32.mxu1 %v7717_v42  ;;  %v7721_v42 = vld [vmem:[#allocation37_spill] sm:$0xff] }
 0xdfa   :  { %3420 = vmatprep.subr.mxu0 %v7719_v16  ;;  %3491 = vmatprep.subr.mxu1 %v7720_v52 }
 0xe99   :  { %v3110_v18 = vpop.f32.mrf.mxu0  ;;  %v3181_v0 = vpop.f32.mrf.mxu1 }
 0xe9a   :  { %v3190_v14 = vrot.slane %v3110_v18, 4  ;;  %v3192_v16 = vrot.slane %v3181_v0, 4 }
 0xe9b   :  { %v3112_v51 = vpop.f32.mrf.mxu0  ;;  %v3183_v39 = vpop.f32.mrf.mxu1 }
 0xe9c   :  { %v3198_v40 = vadd.f32 %v3190_v14, %v6584_v55  ;;  %v3191_v50 = vrot.slane %v3112_v51, 4  ;;  %v3193_v6 = vrot.slane %v3183_v39, 4  ;;  %v3200_v18 = vadd.f32 %v3192_v16, %v6599_v41 }
 0xe9e   :  { %v4366_v43 = vmul.f32 -1.442695, %v3198_v40  ;;  %v3199_v61 = vadd.f32 %v3191_v50, %v6588_v54  ;;  %v3201_v59 = vadd.f32 %v3193_v6, %v7721_v42 }
 0xea0   :  { %4704 = vpow2.f32 %v4366_v43  ;;  %v4367_v20 = vmul.f32 -1.442695, %v3199_v61  ;;  %v4368_v38 = vmul.f32 -1.442695, %v3201_v59 }
 0xea2   :  { %4706 = vpow2.f32 %v4367_v20  ;;  %v3222_v20 = vrot.slane %v6603_v11, 2 }
 0xea3   :  { %4708 = vpow2.f32 %v4368_v38 }
 0xead   :  { %v4705_v52 = vpop.eup %4704 }
 0xeae   :  { %v3205_v24 = vadd.f32 1.0, %v4705_v52 }
 0xeaf   :  { %v4707_v37 = vpop.eup %4706 }
 0xeb0   :  { %4710 = vrcp.f32 %v3205_v24  ;;  %v3211_v51 = vadd.f32 1.0, %v4707_v37  ;;  %v4709_v50 = vpop.eup %4708 }
 0xeb1   :  { %4712 = vtanh.f32 %v3200_v18  ;;  %v3218_v14 = vadd.f32 1.0, %v4709_v50 }
 0xeb2   :  { %4714 = vrcp.f32 %v3211_v51 }
 0xeb3   :  { %4716 = vrcp.f32 %v3218_v14 }
 0xebd   :  { %v4711_v43 = vpop.eup %4710 }
 0xebe   :  { %v4713_v61 = vpop.eup %4712 }
 0xebf   :  { %v4715_v39 = vpop.eup %4714  ;;  %v3225_v6 = vmul.f32 %v4713_v61, %v4711_v43 }
 0xec0   :  { %v3224_v40 = vmul.f32 %v4715_v39, %v3222_v20  ;;  %v4717_v0 = vpop.eup %4716 }
 0xec2   :  { %v6680_v59 = vadd.f32 %v3225_v6, %v3224_v40 }
 0xec4   :  { %4718 = vtanh.f32 %v6680_v59  ;;  %v3410_v18 = vrot.slane %v6680_v59, 2  ;;  %v7746_v59 = vld [vmem:[#allocation38_spill] sm:$0xff] }
 0xed1   :  { %v4719_v38 = vpop.eup %4718 }
 0xed2   :  { %v6683_v24 = vmul.f32 %v4719_v38, %v4717_v0  ;;  %v7745_v38 = vld [vmem:[#allocation22_spill] sm:$0xff] }
 0xed4   :  { %v3230_v37 = vrot.slane %v6683_v24, 4  ;;  %v4164_v40 = vrot.slane %v6683_v24, 2 }
 0xed6   :  { %3297 = vmatmul.mubr.f32.vlgmr.msra.gmra.mxu0 %v3230_v37  ;;  %3368 = vmatmul.mubr.f32.vlgmr.msra.gmra.mxu1 %v3230_v37  ;;  %v4166_v37 = vrot.slane %v7745_v38, 2  ;;  %v6919_v38 = vld [vmem:[#allocation7 + $0x70] sm:$0xff] }
 0xed7   :  { %3421 = vmatpush1.msra.mxu0 %v6202_v1  ;;  %3492 = vmatpush1.msra.mxu1 %v6292_v44  ;;  %v7722_v1 = vld [vmem:[#allocation43_spill] sm:$0xff]  ;;  %v6750_v44 = vld [vmem:[#allocation7 + $0x1e8] sm:$0xff] }
 0xed8   :  { %3422 = vmatprep.subr.mxu0 %v6206_v8  ;;  %3493 = vmatprep.subr.mxu1 %v6294_v45  ;;  %v7723_v8 = vld [vmem:[#allocation13_spill] sm:$0xff]  ;;  %7743 = vst [vmem:[#allocation47_spill] sm:$0xff] %v6750_v44  ;;  %v6753_v45 = vld [vmem:[#allocation7 + $0x1f8] sm:$0xff]  ;;  %7755 = vst [vmem:[#allocation43_spill] sm:$0xff] %v6919_v38 }
 0xed9   :  { %3423 = vmatpush1.msra.mxu0 %v6210_v7  ;;  %3494 = vmatpush1.msra.mxu1 %v6297_v46  ;;  %v7724_v7 = vld [vmem:[#allocation41_spill] sm:$0xff]  ;;  %7744 = vst [vmem:[#allocation24_spill] sm:$0xff] %v6753_v45 }
 0xeda   :  { %3424 = vmatprep.subr.mxu0 %v6213_v12  ;;  %3495 = vmatprep.subr.mxu1 %v6300_v47  ;;  %v7725_v12 = vld [vmem:[#allocation16_spill] sm:$0xff] }
 0xedb   :  { %3425 = vmatpush1.msra.mxu0 %v6217_v13  ;;  %3496 = vmatpush1.msra.mxu1 %v6304_v48  ;;  %v7726_v13 = vld [vmem:[#allocation14_spill] sm:$0xff] }
 0xedc   :  { %3426 = vmatprep.subr.mxu0 %v6220_v15  ;;  %3497 = vmatprep.subr.mxu1 %v6307_v49  ;;  %v7727_v15 = vld [vmem:[#allocation17_spill] sm:$0xff] }
 0xedd   :  { %3427 = vmatpush1.msra.mxu0 %v6223_v17  ;;  %3498 = vmatpush1.msra.mxu1 %v6310_v56  ;;  %v7728_v17 = vld [vmem:[#allocation15_spill] sm:$0xff] }
 0xede   :  { %3428 = vmatprep.subr.mxu0 %v6226_v19  ;;  %3499 = vmatprep.subr.mxu1 %v6313_v9  ;;  %v7729_v19 = vld [vmem:[#allocation18_spill] sm:$0xff] }
 0xedf   :  { %3429 = vmatpush1.msra.mxu0 %v6229_v22  ;;  %3500 = vmatpush1.msra.mxu1 %v6316_v4  ;;  %v7730_v22 = vld [vmem:[#allocation40_spill] sm:$0xff] }
 0xee0   :  { %3430 = vmatprep.subr.mxu0 %v6232_v23  ;;  %3501 = vmatprep.subr.mxu1 %v6319_v21  ;;  %v7731_v23 = vld [vmem:[#allocation19_spill] sm:$0xff] }
 0xee1   :  { %3431 = vmatpush1.msra.mxu0 %v6235_v25  ;;  %3502 = vmatpush1.msra.mxu1 %v6322_v5  ;;  %v7732_v25 = vld [vmem:[#allocation42_spill] sm:$0xff] }
 0xee2   :  { %3432 = vmatprep.subr.mxu0 %v6238_v26  ;;  %3503 = vmatprep.subr.mxu1 %v6325_v62  ;;  %v7733_v26 = vld [vmem:[#allocation20_spill] sm:$0xff] }
 0xee3   :  { %3433 = vmatpush1.msra.mxu0 %v6243_v27  ;;  %3504 = vmatpush1.msra.mxu1 %v6328_v60  ;;  %v7734_v27 = vld [vmem:[#allocation12_spill] sm:$0xff] }
 0xee4   :  { %3434 = vmatprep.subr.mxu0 %v6245_v28  ;;  %3505 = vmatprep.subr.mxu1 %v6331_v63  ;;  %v7735_v28 = vld [vmem:[#allocation21_spill] sm:$0xff] }
 0xee5   :  { %3435 = vmatpush1.msra.mxu0 %v6249_v29  ;;  %3506 = vmatpush1.msra.mxu1 %v6334_v36  ;;  %v7736_v29 = vld [vmem:[#allocation30_spill] sm:$0xff] }
 0xee6   :  { %3436 = vmatprep.subr.mxu0 %v6251_v30  ;;  %3507 = vmatprep.subr.mxu1 %v6337_v35  ;;  %v7737_v30 = vld [vmem:[#allocation31_spill] sm:$0xff] }
 0xee7   :  { %3437 = vmatpush1.msra.mxu0 %v6255_v31  ;;  %3508 = vmatpush1.msra.mxu1 %v6340_v57  ;;  %v7738_v31 = vld [vmem:[#allocation32_spill] sm:$0xff] }
 0xee8   :  { %3438 = vmatprep.subr.mxu0 %v6257_v32  ;;  %3509 = vmatprep.subr.mxu1 %v6343_v2  ;;  %v7739_v32 = vld [vmem:[#allocation33_spill] sm:$0xff] }
 0xee9   :  { %3439 = vmatpush1.msra.mxu0 %v6261_v10  ;;  %3510 = vmatpush1.msra.mxu1 %v6346_v33  ;;  %v7740_v10 = vld [vmem:[#allocation39_spill] sm:$0xff] }
 0xeea   :  { %3440 = vmatprep.subr.mxu0 %v6263_v58  ;;  %3511 = vmatprep.subr.mxu1 %v6349_v3  ;;  %v7741_v58 = vmov 0.0  }
 0xeeb   :  { %3441 = vmatpush1.msra.mxu0 %v6266_v34  ;;  %3512 = vmatpush1.msra.mxu1 %v6352_v53  ;;  %v7742_v34 = vld [vmem:[#allocation44_spill] sm:$0xff] }
 0xeec   :  { %3442 = vmatprep.subr.mxu0 %v7722_v1  ;;  %3513 = vmatprep.subr.mxu1 %v7723_v8  ;;  %v4169_v1 = vrot.slane %v7746_v59, 2  ;;  %v6925_v59 = vld [vmem:[#allocation7 + $0x58] sm:$0xff] }
 0xeed   :  { %3443 = vmatpush1.msra.mxu0 %v7724_v7  ;;  %3514 = vmatpush1.msra.mxu1 %v7725_v12  ;;  %v6768_v7 = vld [vmem:[#allocation7 + $0x1e0] sm:$0xff]  ;;  %v6771_v12 = vld [vmem:[#allocation7 + $0x1f0] sm:$0xff]  ;;  %7757 = vst [vmem:[#allocation41_spill] sm:$0xff] %v6925_v59 }
 0xeee   :  { %3444 = vmatprep.subr.mxu0 %v7726_v13  ;;  %3515 = vmatprep.subr.mxu1 %v7727_v15  ;;  %v6775_v13 = vld [vmem:[#allocation7 + $0x1c8] sm:$0xff]  ;;  %v6778_v15 = vld [vmem:[#allocation7 + $0x1d8] sm:$0xff] }
 0xeef   :  { %3445 = vmatpush1.msra.mxu0 %v7728_v17  ;;  %3516 = vmatpush1.msra.mxu1 %v7729_v19  ;;  %v6784_v19 = vld [vmem:[#allocation7 + $0x1c0] sm:$0xff] }
 0xef0   :  { %3446 = vmatprep.subr.mxu0 %v7730_v22  ;;  %3517 = vmatprep.subr.mxu1 %v7731_v23  ;;  %v6787_v22 = vld [vmem:[#allocation7 + $0x1d0] sm:$0xff]  ;;  %v6790_v23 = vld [vmem:[#allocation7 + $0x1a8] sm:$0xff] }
 0xef1   :  { %3447 = vmatpush1.msra.mxu0 %v7732_v25  ;;  %3518 = vmatpush1.msra.mxu1 %v7733_v26  ;;  %v6793_v25 = vld [vmem:[#allocation7 + $0x1b8] sm:$0xff]  ;;  %v6796_v26 = vld [vmem:[#allocation7 + $0x1a0] sm:$0xff] }
 0xef2   :  { %3448 = vmatprep.subr.mxu0 %v7734_v27  ;;  %3519 = vmatprep.subr.mxu1 %v7735_v28  ;;  %v6799_v27 = vld [vmem:[#allocation7 + $0x1b0] sm:$0xff]  ;;  %v6802_v28 = vld [vmem:[#allocation7 + $0x188] sm:$0xff] }
 0xef3   :  { %3449 = vmatpush1.msra.mxu0 %v7736_v29  ;;  %3520 = vmatpush1.msra.mxu1 %v7737_v30  ;;  %v6805_v29 = vld [vmem:[#allocation7 + $0x198] sm:$0xff]  ;;  %v6808_v30 = vld [vmem:[#allocation7 + $0x180] sm:$0xff] }
 0xef4   :  { %3450 = vmatprep.subr.mxu0 %v7738_v31  ;;  %3521 = vmatprep.subr.mxu1 %v7739_v32  ;;  %v6811_v31 = vld [vmem:[#allocation7 + $0x190] sm:$0xff]  ;;  %v6814_v32 = vld [vmem:[#allocation7 + $0x168] sm:$0xff] }
 0xef5   :  { %3451 = vmatpush1.msra.mxu0 %v7740_v10  ;;  %3484 = vmatprep.mubr.f32.mxu0 %v7741_v58  ;;  %v6817_v10 = vld [vmem:[#allocation7 + $0x178] sm:$0xff] }
 0xef6   :  { %3522 = vmatpush1.msra.mxu1 %v7742_v34  ;;  %3555 = vmatprep.mubr.f32.mxu1 %v7741_v58  ;;  %v6820_v34 = vld [vmem:[#allocation7 + $0x160] sm:$0xff] }
 0xef7   :  { %3593 = vmatprep.subr.mxu0 %v6750_v44  ;;  %3664 = vmatprep.subr.mxu1 %v6753_v45 }
 0xf96   :  { %v3298_v46 = vpop.f32.mrf.mxu0  ;;  %v3369_v56 = vpop.f32.mrf.mxu1 }
 0xf97   :  { %v3378_v47 = vrot.slane %v3298_v46, 6  ;;  %v3380_v36 = vrot.slane %v3369_v56, 6  ;;  %v6823_v46 = vld [vmem:[#allocation7 + $0x170] sm:$0xff] }
 0xf98   :  { %v3300_v48 = vpop.f32.mrf.mxu0  ;;  %v3371_v62 = vpop.f32.mrf.mxu1  ;;  %v6835_v56 = vld [vmem:[#allocation7 + $0x150] sm:$0xff] }
 0xf99   :  { %v3386_v49 = vadd.f32 %v3378_v47, %v6584_v55  ;;  %v3379_v9 = vrot.slane %v3300_v48, 6  ;;  %v3381_v60 = vrot.slane %v3371_v62, 6  ;;  %v3388_v2 = vadd.f32 %v3380_v36, %v6599_v41  ;;  %v6826_v47 = vld [vmem:[#allocation7 + $0x148] sm:$0xff]  ;;  %v6829_v48 = vld [vmem:[#allocation7 + $0x158] sm:$0xff]  ;;  %v6859_v36 = vld [vmem:[#allocation7 + $0x110] sm:$0xff] }
 0xf9a   :  { %v6850_v62 = vld [vmem:[#allocation7 + $0x108] sm:$0xff] }
 0xf9b   :  { %v4369_v4 = vmul.f32 -1.442695, %v3386_v49  ;;  %v3387_v21 = vadd.f32 %v3379_v9, %v6588_v54  ;;  %v3389_v63 = vadd.f32 %v3381_v60, %v7721_v42  ;;  %v6832_v49 = vld [vmem:[#allocation7 + $0x140] sm:$0xff]  ;;  %v6838_v9 = vld [vmem:[#allocation7 + $0x128] sm:$0xff]  ;;  %v6853_v60 = vld [vmem:[#allocation7 + $0x118] sm:$0xff] }
 0xf9d   :  { %4720 = vpow2.f32 %v4369_v4  ;;  %v4370_v5 = vmul.f32 -1.442695, %v3387_v21  ;;  %v4371_v35 = vmul.f32 -1.442695, %v3389_v63  ;;  %v6841_v4 = vld [vmem:[#allocation7 + $0x138] sm:$0xff]  ;;  %v6844_v21 = vld [vmem:[#allocation7 + $0x120] sm:$0xff] }
 0xf9e   :  { %v6856_v63 = vld [vmem:[#allocation7 + $0x100] sm:$0xff] }
 0xf9f   :  { %4722 = vpow2.f32 %v4370_v5  ;;  %v6847_v5 = vld [vmem:[#allocation7 + $0x130] sm:$0xff] }
 0xfa0   :  { %4724 = vpow2.f32 %v4371_v35  ;;  %v6862_v35 = vld [vmem:[#allocation7 + $0xe8] sm:$0xff] }
 0xfaa   :  { %v4721_v57 = vpop.eup %4720 }
 0xfab   :  { %v3393_v33 = vadd.f32 1.0, %v4721_v57  ;;  %v6865_v57 = vld [vmem:[#allocation7 + $0xf8] sm:$0xff] }
 0xfac   :  { %v4723_v3 = vpop.eup %4722 }
 0xfad   :  { %4726 = vrcp.f32 %v3393_v33  ;;  %v3399_v53 = vadd.f32 1.0, %v4723_v3  ;;  %v4725_v11 = vpop.eup %4724  ;;  %v6871_v33 = vld [vmem:[#allocation7 + $0xf0] sm:$0xff]  ;;  %v6874_v3 = vld [vmem:[#allocation7 + $0xc8] sm:$0xff] }
 0xfae   :  { %4728 = vtanh.f32 %v3388_v2  ;;  %v3406_v50 = vadd.f32 1.0, %v4725_v11  ;;  %v6868_v2 = vld [vmem:[#allocation7 + $0xe0] sm:$0xff] }
 0xfaf   :  { %4730 = vrcp.f32 %v3399_v53  ;;  %v6877_v53 = vld [vmem:[#allocation7 + $0xd8] sm:$0xff]  ;;  %v6880_v11 = vld [vmem:[#allocation7 + $0xc0] sm:$0xff] }
 0xfb0   :  { %4732 = vrcp.f32 %v3406_v50  ;;  %v6895_v50 = vld [vmem:[#allocation7 + $0xb0] sm:$0xff] }
 0xfba   :  { %v4727_v16 = vpop.eup %4726 }
 0xfbb   :  { %v4729_v52 = vpop.eup %4728 }
 0xfbc   :  { %v4731_v51 = vpop.eup %4730  ;;  %v3413_v43 = vmul.f32 %v4729_v52, %v4727_v16  ;;  %v6883_v16 = vld [vmem:[#allocation7 + $0xd0] sm:$0xff]  ;;  %v6886_v52 = vld [vmem:[#allocation7 + $0xa8] sm:$0xff] }
 0xfbd   :  { %v3412_v61 = vmul.f32 %v4731_v51, %v3410_v18  ;;  %v4733_v39 = vpop.eup %4732  ;;  %v6889_v18 = vld [vmem:[#allocation7 + $0xb8] sm:$0xff]  ;;  %v6892_v51 = vld [vmem:[#allocation7 + $0xa0] sm:$0xff] }
 0xfbf   :  { %v6761_v20 = vadd.f32 %v3413_v43, %v3412_v61  ;;  %v6898_v43 = vld [vmem:[#allocation7 + $0x88] sm:$0xff]  ;;  %v6901_v61 = vld [vmem:[#allocation7 + $0x98] sm:$0xff] }
 0xfc0   :  { %7748 = vst [vmem:[#allocation25_spill] sm:$0xff] %v6898_v43  ;;  %7749 = vst [vmem:[#allocation46_spill] sm:$0xff] %v6901_v61 }
 0xfc1   :  { %4734 = vtanh.f32 %v6761_v20 }
 0xfce   :  { %v4735_v14 = vpop.eup %4734 }
 0xfcf   :  { %v3416_v6 = vmul.f32 %v4735_v14, %v4733_v39  ;;  %v6904_v39 = vld [vmem:[#allocation7 + $0x80] sm:$0xff]  ;;  %v6907_v14 = vld [vmem:[#allocation7 + $0x90] sm:$0xff] }
 0xfd0   :  { %7750 = vst [vmem:[#allocation23_spill] sm:$0xff] %v6904_v39  ;;  %7751 = vst [vmem:[#allocation45_spill] sm:$0xff] %v6907_v14 }
 0xfd1   :  { %v3418_v0 = vrot.slane %v3416_v6, 2  ;;  %v6910_v6 = vld [vmem:[#allocation7 + $0x68] sm:$0xff] }
 0xfd2   :  { %7752 = vst [vmem:[#allocation34_spill] sm:$0xff] %v6910_v6 }
 0xfd3   :  { %3485 = vmatmul.mubr.f32.vlgmr.msra.gmra.mxu0 %v3418_v0  ;;  %3556 = vmatmul.mubr.f32.vlgmr.msra.gmra.mxu1 %v3418_v0  ;;  %v4176_v8 = vsel %vm4171_vm4, %v3418_v0, %v4164_v40  ;;  %v6913_v40 = vld [vmem:[#allocation7 + $0x78] sm:$0xff]  ;;  %v6916_v0 = vld [vmem:[#allocation7 + $0x60] sm:$0xff] }
 0xfd4   :  { %3594 = vmatpush1.msra.mxu0 %v6768_v7  ;;  %3665 = vmatpush1.msra.mxu1 %v6771_v12  ;;  %v4177_v24 = vsel %vm4173_vm5, %v4176_v8, %v4166_v37  ;;  %7753 = vst [vmem:[#allocation35_spill] sm:$0xff] %v6913_v40  ;;  %7754 = vst [vmem:[#allocation37_spill] sm:$0xff] %v6916_v0  ;;  %v6922_v37 = vld [vmem:[#allocation7 + $0x48] sm:$0xff]  ;;  %v6931_v8 = vld [vmem:[#allocation7 + $0x50] sm:$0xff] }
 0xfd5   :  { %3595 = vmatprep.subr.mxu0 %v6775_v13  ;;  %3666 = vmatprep.subr.mxu1 %v6778_v15  ;;  %v6782_v17 = vsel %vm143_vm0, %v4177_v24, %v4169_v1  ;;  %7756 = vst [vmem:[#allocation13_spill] sm:$0xff] %v6922_v37  ;;  %v6928_v1 = vld [vmem:[#allocation7 + $0x40] sm:$0xff]  ;;  %7759 = vst [vmem:[#allocation14_spill] sm:$0xff] %v6931_v8  ;;  %v6934_v24 = vld [vmem:[#allocation7 + $0x28] sm:$0xff] }
 0xfd6   :  { %7747 = vst [vmem:[#allocation36_spill] sm:$0xff] %v6782_v17  ;;  %3596 = vmatpush1.msra.mxu0 %v6784_v19  ;;  %3667 = vmatpush1.msra.mxu1 %v6787_v22  ;;  %7758 = vst [vmem:[#allocation16_spill] sm:$0xff] %v6928_v1  ;;  %v6937_v17 = vld [vmem:[#allocation7 + $0x38] sm:$0xff] }
 0xfd7   :  { %3597 = vmatprep.subr.mxu0 %v6790_v23  ;;  %3668 = vmatprep.subr.mxu1 %v6793_v25  ;;  %7760 = vst [vmem:[#allocation17_spill] sm:$0xff] %v6934_v24  ;;  %7761 = vst [vmem:[#allocation15_spill] sm:$0xff] %v6937_v17 }
 0xfd8   :  { %3598 = vmatpush1.msra.mxu0 %v6796_v26  ;;  %3669 = vmatpush1.msra.mxu1 %v6799_v27 }
 0xfd9   :  { %3599 = vmatprep.subr.mxu0 %v6802_v28  ;;  %3670 = vmatprep.subr.mxu1 %v6805_v29 }
 0xfda   :  { %3600 = vmatpush1.msra.mxu0 %v6808_v30  ;;  %3671 = vmatpush1.msra.mxu1 %v6811_v31 }
 0xfdb   :  { %3601 = vmatprep.subr.mxu0 %v6814_v32  ;;  %3672 = vmatprep.subr.mxu1 %v6817_v10 }
 0xfdc   :  { %3602 = vmatpush1.msra.mxu0 %v6820_v34  ;;  %3673 = vmatpush1.msra.mxu1 %v6823_v46 }
 0xfdd   :  { %3603 = vmatprep.subr.mxu0 %v6826_v47  ;;  %3674 = vmatprep.subr.mxu1 %v6829_v48 }
 0xfde   :  { %3604 = vmatpush1.msra.mxu0 %v6832_v49  ;;  %3675 = vmatpush1.msra.mxu1 %v6835_v56 }
 0xfdf   :  { %3605 = vmatprep.subr.mxu0 %v6838_v9  ;;  %3676 = vmatprep.subr.mxu1 %v6841_v4 }
 0xfe0   :  { %3606 = vmatpush1.msra.mxu0 %v6844_v21  ;;  %3677 = vmatpush1.msra.mxu1 %v6847_v5 }
 0xfe1   :  { %3607 = vmatprep.subr.mxu0 %v6850_v62  ;;  %3678 = vmatprep.subr.mxu1 %v6853_v60 }
 0xfe2   :  { %3608 = vmatpush1.msra.mxu0 %v6856_v63  ;;  %3679 = vmatpush1.msra.mxu1 %v6859_v36 }
 0xfe3   :  { %3609 = vmatprep.subr.mxu0 %v6862_v35  ;;  %3680 = vmatprep.subr.mxu1 %v6865_v57 }
 0xfe4   :  { %3610 = vmatpush1.msra.mxu0 %v6868_v2  ;;  %3681 = vmatpush1.msra.mxu1 %v6871_v33 }
 0xfe5   :  { %3611 = vmatprep.subr.mxu0 %v6874_v3  ;;  %3682 = vmatprep.subr.mxu1 %v6877_v53 }
 0xfe6   :  { %3612 = vmatpush1.msra.mxu0 %v6880_v11  ;;  %3683 = vmatpush1.msra.mxu1 %v6883_v16 }
 0xfe7   :  { %3613 = vmatprep.subr.mxu0 %v6886_v52  ;;  %3684 = vmatprep.subr.mxu1 %v6889_v18 }
 0xfe8   :  { %3614 = vmatpush1.msra.mxu0 %v6892_v51  ;;  %3685 = vmatpush1.msra.mxu1 %v6895_v50 }
 0xfe9   :  { %3615 = vmatprep.subr.mxu0 %v6898_v43  ;;  %3686 = vmatprep.subr.mxu1 %v6901_v61 }
 0xfea   :  { %3616 = vmatpush1.msra.mxu0 %v6904_v39  ;;  %3687 = vmatpush1.msra.mxu1 %v6907_v14 }
 0xfeb   :  { %3617 = vmatprep.subr.mxu0 %v6910_v6  ;;  %3688 = vmatprep.subr.mxu1 %v6913_v40 }
 0xfec   :  { %3618 = vmatpush1.msra.mxu0 %v6916_v0  ;;  %3689 = vmatpush1.msra.mxu1 %v6919_v38 }
 0xfed   :  { %3619 = vmatprep.subr.mxu0 %v6922_v37  ;;  %3690 = vmatprep.subr.mxu1 %v6925_v59  ;;  %v6940_v37 = vld [vmem:[#allocation7 + $0x20] sm:$0xff]  ;;  %v6943_v59 = vld [vmem:[#allocation7 + $0x30] sm:$0xff] }
 0xfee   :  { %3620 = vmatpush1.msra.mxu0 %v6928_v1  ;;  %3691 = vmatpush1.msra.mxu1 %v6931_v8  ;;  %7762 = vst [vmem:[#allocation18_spill] sm:$0xff] %v6940_v37  ;;  %7763 = vst [vmem:[#allocation40_spill] sm:$0xff] %v6943_v59  ;;  %v6946_v1 = vld [vmem:[#allocation7 + $0x8] sm:$0xff]  ;;  %v6949_v8 = vld [vmem:[#allocation7 + $0x18] sm:$0xff] }
 0xfef   :  { %3621 = vmatprep.subr.mxu0 %v6934_v24  ;;  %3692 = vmatprep.subr.mxu1 %v6937_v17  ;;  %7764 = vst [vmem:[#allocation19_spill] sm:$0xff] %v6946_v1  ;;  %7765 = vst [vmem:[#allocation42_spill] sm:$0xff] %v6949_v8  ;;  %v6952_v24 = vld [vmem:[#allocation7] sm:$0xff]  ;;  %v6956_v17 = vld [vmem:[#allocation7 + $0x10] sm:$0xff] }
 0xff0   :  { %3622 = vmatpush1.msra.mxu0 %v6940_v37  ;;  %3693 = vmatpush1.msra.mxu1 %v6943_v59  ;;  %7766 = vst [vmem:[#allocation20_spill] sm:$0xff] %v6952_v24  ;;  %7767 = vst [vmem:[#allocation12_spill] sm:$0xff] %v6956_v17 }
 0xff1   :  { %3623 = vmatprep.subr.mxu0 %v6946_v1  ;;  %3694 = vmatprep.subr.mxu1 %v6949_v8 }
 0xff2   :  { %3624 = vmatpush1.msra.mxu0 %v6952_v24  ;;  %3657 = vmatprep.mubr.f32.mxu0 %v7741_v58 }
 0xff3   :  { %3695 = vmatpush1.msra.mxu1 %v6956_v17  ;;  %3728 = vmatprep.mubr.f32.mxu1 %v7741_v58 }
 0xff4   :  { %3781 = vmatprep.subr.mxu0 %v6750_v44  ;;  %3852 = vmatprep.subr.mxu1 %v6753_v45 }
0x1093   :  { %v3486_v1 = vpop.f32.mrf.mxu0  ;;  %v3557_v24 = vpop.f32.mrf.mxu1 }
0x1094   :  { %v3562_v59 = vadd.f32 %v3486_v1, %v6584_v55  ;;  %v3564_v44 = vadd.f32 %v3557_v24, %v6599_v41  ;;  %v7774_v24 = vld [vmem:[#allocation13_spill] sm:$0xff] }
0x1095   :  { %v3488_v8 = vpop.f32.mrf.mxu0  ;;  %v3559_v40 = vpop.f32.mrf.mxu1 }
0x1096   :  { %v4372_v37 = vmul.f32 -1.442695, %v3562_v59  ;;  %v3563_v38 = vadd.f32 %v3488_v8, %v6588_v54  ;;  %v3565_v17 = vadd.f32 %v3559_v40, %v7721_v42  ;;  %v7773_v40 = vld [vmem:[#allocation43_spill] sm:$0xff] }
0x1098   :  { %4736 = vpow2.f32 %v4372_v37  ;;  %v4373_v0 = vmul.f32 -1.442695, %v3563_v38  ;;  %v4374_v6 = vmul.f32 -1.442695, %v3565_v17  ;;  %v3586_v38 = vrot.slane %v6761_v20, 2  ;;  %v7771_v20 = vld [vmem:[#allocation35_spill] sm:$0xff] }
0x109a   :  { %4738 = vpow2.f32 %v4373_v0 }
0x109b   :  { %4740 = vpow2.f32 %v4374_v6  ;;  %v7772_v6 = vld [vmem:[#allocation37_spill] sm:$0xff] }
0x10a5   :  { %v4737_v58 = vpop.eup %4736 }
0x10a6   :  { %v3569_v14 = vadd.f32 1.0, %v4737_v58 }
0x10a7   :  { %v4739_v45 = vpop.eup %4738 }
0x10a8   :  { %4742 = vrcp.f32 %v3569_v14  ;;  %v3575_v55 = vadd.f32 1.0, %v4739_v45  ;;  %v4741_v59 = vpop.eup %4740  ;;  %v7770_v45 = vld [vmem:[#allocation34_spill] sm:$0xff] }
0x10a9   :  { %4744 = vtanh.f32 %v3564_v44  ;;  %v3582_v1 = vadd.f32 1.0, %v4741_v59  ;;  %v7769_v44 = vld [vmem:[#allocation45_spill] sm:$0xff]  ;;  %v7776_v59 = vld [vmem:[#allocation16_spill] sm:$0xff] }
0x10aa   :  { %4746 = vrcp.f32 %v3575_v55  ;;  %v7775_v55 = vld [vmem:[#allocation41_spill] sm:$0xff] }
0x10ab   :  { %4748 = vrcp.f32 %v3582_v1  ;;  %v7781_v1 = vld [vmem:[#allocation40_spill] sm:$0xff] }
0x10b5   :  { %v4743_v54 = vpop.eup %4742 }
0x10b6   :  { %v4745_v37 = vpop.eup %4744 }
0x10b7   :  { %v4747_v0 = vpop.eup %4746  ;;  %v3589_v8 = vmul.f32 %v4745_v37, %v4743_v54  ;;  %v7777_v54 = vld [vmem:[#allocation14_spill] sm:$0xff]  ;;  %v7778_v37 = vld [vmem:[#allocation17_spill] sm:$0xff] }
0x10b8   :  { %v3588_v42 = vmul.f32 %v4747_v0, %v3586_v38  ;;  %v4749_v41 = vpop.eup %4748  ;;  %v7779_v38 = vld [vmem:[#allocation15_spill] sm:$0xff]  ;;  %v7780_v0 = vld [vmem:[#allocation18_spill] sm:$0xff] }
0x10ba   :  { %v6967_v17 = vadd.f32 %v3589_v8, %v3588_v42  ;;  %v7782_v8 = vld [vmem:[#allocation19_spill] sm:$0xff]  ;;  %v7783_v42 = vld [vmem:[#allocation42_spill] sm:$0xff] }
0x10bc   :  { %4750 = vtanh.f32 %v6967_v17 }
0x10c9   :  { %v4751_v58 = vpop.eup %4750 }
0x10ca   :  { %v6970_v14 = vmul.f32 %v4751_v58, %v4749_v41  ;;  %v7784_v41 = vld [vmem:[#allocation20_spill] sm:$0xff]  ;;  %v7785_v58 = vmov 0.0  }
0x10cc   :  { %7768 = vst [vmem:[#allocation21_spill] sm:$0xff] %v6970_v14  ;;  %3658 = vmatmul.mubr.f32.vlgmr.msra.gmra.mxu0 %v6970_v14  ;;  %3729 = vmatmul.mubr.f32.vlgmr.msra.gmra.mxu1 %v6970_v14  ;;  %v7786_v14 = vld [vmem:[#allocation12_spill] sm:$0xff] }
0x10cd   :  { %3782 = vmatpush1.msra.mxu0 %v6768_v7  ;;  %3853 = vmatpush1.msra.mxu1 %v6771_v12 }
0x10ce   :  { %3783 = vmatprep.subr.mxu0 %v6775_v13  ;;  %3854 = vmatprep.subr.mxu1 %v6778_v15 }
0x10cf   :  { %3784 = vmatpush1.msra.mxu0 %v6784_v19  ;;  %3855 = vmatpush1.msra.mxu1 %v6787_v22 }
0x10d0   :  { %3785 = vmatprep.subr.mxu0 %v6790_v23  ;;  %3856 = vmatprep.subr.mxu1 %v6793_v25 }
0x10d1   :  { %3786 = vmatpush1.msra.mxu0 %v6796_v26  ;;  %3857 = vmatpush1.msra.mxu1 %v6799_v27 }
0x10d2   :  { %3787 = vmatprep.subr.mxu0 %v6802_v28  ;;  %3858 = vmatprep.subr.mxu1 %v6805_v29 }
0x10d3   :  { %3788 = vmatpush1.msra.mxu0 %v6808_v30  ;;  %3859 = vmatpush1.msra.mxu1 %v6811_v31 }
0x10d4   :  { %3789 = vmatprep.subr.mxu0 %v6814_v32  ;;  %3860 = vmatprep.subr.mxu1 %v6817_v10 }
0x10d5   :  { %3790 = vmatpush1.msra.mxu0 %v6820_v34  ;;  %3861 = vmatpush1.msra.mxu1 %v6823_v46 }
0x10d6   :  { %3791 = vmatprep.subr.mxu0 %v6826_v47  ;;  %3862 = vmatprep.subr.mxu1 %v6829_v48 }
0x10d7   :  { %3792 = vmatpush1.msra.mxu0 %v6832_v49  ;;  %3863 = vmatpush1.msra.mxu1 %v6835_v56 }
0x10d8   :  { %3793 = vmatprep.subr.mxu0 %v6838_v9  ;;  %3864 = vmatprep.subr.mxu1 %v6841_v4 }
0x10d9   :  { %3794 = vmatpush1.msra.mxu0 %v6844_v21  ;;  %3865 = vmatpush1.msra.mxu1 %v6847_v5 }
0x10da   :  { %3795 = vmatprep.subr.mxu0 %v6850_v62  ;;  %3866 = vmatprep.subr.mxu1 %v6853_v60 }
0x10db   :  { %3796 = vmatpush1.msra.mxu0 %v6856_v63  ;;  %3867 = vmatpush1.msra.mxu1 %v6859_v36 }
0x10dc   :  { %3797 = vmatprep.subr.mxu0 %v6862_v35  ;;  %3868 = vmatprep.subr.mxu1 %v6865_v57 }
0x10dd   :  { %3798 = vmatpush1.msra.mxu0 %v6868_v2  ;;  %3869 = vmatpush1.msra.mxu1 %v6871_v33 }
0x10de   :  { %3799 = vmatprep.subr.mxu0 %v6874_v3  ;;  %3870 = vmatprep.subr.mxu1 %v6877_v53 }
0x10df   :  { %3800 = vmatpush1.msra.mxu0 %v6880_v11  ;;  %3871 = vmatpush1.msra.mxu1 %v6883_v16 }
0x10e0   :  { %3801 = vmatprep.subr.mxu0 %v6886_v52  ;;  %3872 = vmatprep.subr.mxu1 %v6889_v18 }
0x10e1   :  { %3802 = vmatpush1.msra.mxu0 %v6892_v51  ;;  %3873 = vmatpush1.msra.mxu1 %v6895_v50 }
0x10e2   :  { %3803 = vmatprep.subr.mxu0 %v6898_v43  ;;  %3874 = vmatprep.subr.mxu1 %v6901_v61 }
0x10e3   :  { %3804 = vmatpush1.msra.mxu0 %v6904_v39  ;;  %3875 = vmatpush1.msra.mxu1 %v7769_v44  ;;  %v7792_v39 = vld [vmem:[#allocation27_spill] sm:$0xff] }
0x10e4   :  { %3805 = vmatprep.subr.mxu0 %v7770_v45  ;;  %3876 = vmatprep.subr.mxu1 %v7771_v20 }
0x10e5   :  { %3806 = vmatpush1.msra.mxu0 %v7772_v6  ;;  %3877 = vmatpush1.msra.mxu1 %v7773_v40  ;;  %v7790_v40 = vld [vmem:[#allocation28_spill] sm:$0xff] }
0x10e6   :  { %3807 = vmatprep.subr.mxu0 %v7774_v24  ;;  %3878 = vmatprep.subr.mxu1 %v7775_v55 }
0x10e7   :  { %3808 = vmatpush1.msra.mxu0 %v7776_v59  ;;  %3879 = vmatpush1.msra.mxu1 %v7777_v54  ;;  %v7787_v54 = vld [vmem:[#allocation47_spill] sm:$0xff] }
0x10e8   :  { %3809 = vmatprep.subr.mxu0 %v7778_v37  ;;  %3880 = vmatprep.subr.mxu1 %v7779_v38  ;;  %v7788_v37 = vld [vmem:[#allocation24_spill] sm:$0xff] }
0x10e9   :  { %3810 = vmatpush1.msra.mxu0 %v7780_v0  ;;  %3881 = vmatpush1.msra.mxu1 %v7781_v1  ;;  %v7789_v1 = vld [vmem:[#allocation26_spill] sm:$0xff] }
0x10ea   :  { %3811 = vmatprep.subr.mxu0 %v7782_v8  ;;  %3882 = vmatprep.subr.mxu1 %v7783_v42 }
0x10eb   :  { %3812 = vmatpush1.msra.mxu0 %v7784_v41  ;;  %3845 = vmatprep.mubr.f32.mxu0 %v7785_v58 }
0x10ec   :  { %3883 = vmatpush1.msra.mxu1 %v7786_v14  ;;  %3916 = vmatprep.mubr.f32.mxu1 %v7785_v58  ;;  %v7791_v58 = vld [vmem:[#allocation29_spill] sm:$0xff] }
0x10ed   :  { %3969 = vmatprep.subr.mxu0 %v7787_v54  ;;  %4040 = vmatprep.subr.mxu1 %v7788_v37 }
0x118c   :  { %v3659_v38 = vpop.f32.mrf.mxu0  ;;  %v3730_v8 = vpop.f32.mrf.mxu1 }
0x118d   :  { %v3739_v0 = vrot.slane %v3659_v38, 2  ;;  %v3741_v54 = vrot.slane %v3730_v8, 2 }
0x118e   :  { %v3661_v59 = vpop.f32.mrf.mxu0  ;;  %v3732_v20 = vpop.f32.mrf.mxu1 }
0x118f   :  { %v3747_v55 = vadd.f32 %v3739_v0, %v7789_v1  ;;  %v3740_v24 = vrot.slane %v3661_v59, 2  ;;  %v3742_v14 = vrot.slane %v3732_v20, 2  ;;  %v3749_v38 = vadd.f32 %v3741_v54, %v7792_v39 }
0x1191   :  { %v4375_v42 = vmul.f32 -1.442695, %v3747_v55  ;;  %v3748_v41 = vadd.f32 %v3740_v24, %v7790_v40  ;;  %v3750_v45 = vadd.f32 %v3742_v14, %v7791_v58 }
0x1193   :  { %4752 = vpow2.f32 %v4375_v42  ;;  %v4376_v6 = vmul.f32 -1.442695, %v3748_v41  ;;  %v4377_v44 = vmul.f32 -1.442695, %v3750_v45 }
0x1195   :  { %4754 = vpow2.f32 %v4376_v6  ;;  %v3771_v6 = vrot.slane %v6967_v17, 2 }
0x1196   :  { %4756 = vpow2.f32 %v4377_v44 }
0x11a0   :  { %v4753_v37 = vpop.eup %4752 }
0x11a1   :  { %v3754_v61 = vadd.f32 1.0, %v4753_v37 }
0x11a2   :  { %v4755_v43 = vpop.eup %4754 }
0x11a3   :  { %4758 = vrcp.f32 %v3754_v61  ;;  %v3760_v59 = vadd.f32 1.0, %v4755_v43  ;;  %v4757_v24 = vpop.eup %4756 }
0x11a4   :  { %4760 = vtanh.f32 %v3749_v38  ;;  %v3767_v42 = vadd.f32 1.0, %v4757_v24 }
0x11a5   :  { %4762 = vrcp.f32 %v3760_v59 }
0x11a6   :  { %4764 = vrcp.f32 %v3767_v42 }
0x11b0   :  { %v4759_v55 = vpop.eup %4758 }
0x11b1   :  { %v4761_v0 = vpop.eup %4760 }
0x11b2   :  { %v4763_v20 = vpop.eup %4762  ;;  %v3774_v14 = vmul.f32 %v4761_v0, %v4759_v55 }
0x11b3   :  { %v3773_v8 = vmul.f32 %v4763_v20, %v3771_v6  ;;  %v4765_v41 = vpop.eup %4764 }
0x11b5   :  { %v7045_v45 = vadd.f32 %v3774_v14, %v3773_v8  ;;  %v4194_v14 = vld [vmem:[%s7215_s19 + $0x78] sm:$0xff]  ;;  %v4193_v8 = vld [vmem:[%s7215_s19 + $0x70] sm:$0xff] }
0x11b7   :  { %4766 = vtanh.f32 %v7045_v45  ;;  %v3959_v54 = vrot.slane %v7045_v45, 2  ;;  %v4192_v45 = vld [vmem:[%s7215_s19 + $0x68] sm:$0xff] }
0x11c4   :  { %v4767_v44 = vpop.eup %4766 }
0x11c5   :  { %v7048_v61 = vmul.f32 %v4767_v44, %v4765_v41  ;;  %v4191_v41 = vld [vmem:[%s7215_s19 + $0x60] sm:$0xff]  ;;  %v4190_v44 = vld [vmem:[%s7215_s19 + $0x58] sm:$0xff] }
0x11c7   :  { %v3779_v43 = vrot.slane %v7048_v61, 6 }
0x11c9   :  { %3846 = vmatmul.mubr.f32.vlgmr.msra.gmra.mxu0 %v3779_v43  ;;  %3917 = vmatmul.mubr.f32.vlgmr.msra.gmra.mxu1 %v3779_v43  ;;  %v4189_v43 = vld [vmem:[%s7215_s19 + $0x50] sm:$0xff] }
0x11ca   :  { %3970 = vmatpush1.msra.mxu0 %v6768_v7  ;;  %4041 = vmatpush1.msra.mxu1 %v6771_v12  ;;  %v7793_v7 = vld [vmem:[#allocation25_spill] sm:$0xff]  ;;  %v7794_v12 = vld [vmem:[#allocation46_spill] sm:$0xff] }
0x11cb   :  { %3971 = vmatprep.subr.mxu0 %v6775_v13  ;;  %4042 = vmatprep.subr.mxu1 %v6778_v15  ;;  %v7795_v13 = vld [vmem:[#allocation23_spill] sm:$0xff]  ;;  %v7796_v15 = vld [vmem:[#allocation45_spill] sm:$0xff] }
0x11cc   :  { %3972 = vmatpush1.msra.mxu0 %v6784_v19  ;;  %4043 = vmatpush1.msra.mxu1 %v6787_v22  ;;  %v7797_v19 = vld [vmem:[#allocation34_spill] sm:$0xff]  ;;  %v7798_v22 = vld [vmem:[#allocation35_spill] sm:$0xff] }
0x11cd   :  { %3973 = vmatprep.subr.mxu0 %v6790_v23  ;;  %4044 = vmatprep.subr.mxu1 %v6793_v25  ;;  %v7799_v23 = vld [vmem:[#allocation37_spill] sm:$0xff]  ;;  %v7800_v25 = vld [vmem:[#allocation43_spill] sm:$0xff] }
0x11ce   :  { %3974 = vmatpush1.msra.mxu0 %v6796_v26  ;;  %4045 = vmatpush1.msra.mxu1 %v6799_v27  ;;  %v7801_v26 = vld [vmem:[#allocation13_spill] sm:$0xff] }
0x11cf   :  { %3975 = vmatprep.subr.mxu0 %v6802_v28  ;;  %4046 = vmatprep.subr.mxu1 %v6805_v29  ;;  %v7802_v27 = vld [vmem:[#allocation41_spill] sm:$0xff]  ;;  %v7803_v28 = vld [vmem:[#allocation16_spill] sm:$0xff]  ;;  %v7804_v29 = vld [vmem:[#allocation14_spill] sm:$0xff] }
0x11d0   :  { %3976 = vmatpush1.msra.mxu0 %v6808_v30  ;;  %4047 = vmatpush1.msra.mxu1 %v6811_v31  ;;  %v7805_v30 = vld [vmem:[#allocation17_spill] sm:$0xff]  ;;  %v7806_v31 = vld [vmem:[#allocation15_spill] sm:$0xff] }
0x11d1   :  { %3977 = vmatprep.subr.mxu0 %v6814_v32  ;;  %4048 = vmatprep.subr.mxu1 %v6817_v10  ;;  %v7807_v32 = vld [vmem:[#allocation18_spill] sm:$0xff]  ;;  %v7808_v10 = vld [vmem:[#allocation40_spill] sm:$0xff] }
0x11d2   :  { %3978 = vmatpush1.msra.mxu0 %v6820_v34  ;;  %4049 = vmatpush1.msra.mxu1 %v6823_v46  ;;  %v7809_v34 = vld [vmem:[#allocation19_spill] sm:$0xff]  ;;  %v7810_v46 = vld [vmem:[#allocation42_spill] sm:$0xff] }
0x11d3   :  { %3979 = vmatprep.subr.mxu0 %v6826_v47  ;;  %4050 = vmatprep.subr.mxu1 %v6829_v48  ;;  %v7811_v47 = vld [vmem:[#allocation20_spill] sm:$0xff]  ;;  %v7812_v48 = vmov 0.0  }
0x11d4   :  { %3980 = vmatpush1.msra.mxu0 %v6832_v49  ;;  %4051 = vmatpush1.msra.mxu1 %v6835_v56  ;;  %v7813_v49 = vld [vmem:[#allocation12_spill] sm:$0xff] }
0x11d5   :  { %3981 = vmatprep.subr.mxu0 %v6838_v9  ;;  %4052 = vmatprep.subr.mxu1 %v6841_v4 }
0x11d6   :  { %3982 = vmatpush1.msra.mxu0 %v6844_v21  ;;  %4053 = vmatpush1.msra.mxu1 %v6847_v5 }
0x11d7   :  { %3983 = vmatprep.subr.mxu0 %v6850_v62  ;;  %4054 = vmatprep.subr.mxu1 %v6853_v60 }
0x11d8   :  { %3984 = vmatpush1.msra.mxu0 %v6856_v63  ;;  %4055 = vmatpush1.msra.mxu1 %v6859_v36 }
0x11d9   :  { %3985 = vmatprep.subr.mxu0 %v6862_v35  ;;  %4056 = vmatprep.subr.mxu1 %v6865_v57 }
0x11da   :  { %3986 = vmatpush1.msra.mxu0 %v6868_v2  ;;  %4057 = vmatpush1.msra.mxu1 %v6871_v33 }
0x11db   :  { %3987 = vmatprep.subr.mxu0 %v6874_v3  ;;  %4058 = vmatprep.subr.mxu1 %v6877_v53 }
0x11dc   :  { %3988 = vmatpush1.msra.mxu0 %v6880_v11  ;;  %4059 = vmatpush1.msra.mxu1 %v6883_v16 }
0x11dd   :  { %3989 = vmatprep.subr.mxu0 %v6886_v52  ;;  %4060 = vmatprep.subr.mxu1 %v6889_v18 }
0x11de   :  { %3990 = vmatpush1.msra.mxu0 %v6892_v51  ;;  %4061 = vmatpush1.msra.mxu1 %v6895_v50 }
0x11df   :  { %3991 = vmatprep.subr.mxu0 %v7793_v7  ;;  %4062 = vmatprep.subr.mxu1 %v7794_v12  ;;  %v4188_v7 = vld [vmem:[%s7215_s19 + $0x48] sm:$0xff]  ;;  %v4187_v12 = vld [vmem:[%s7215_s19 + $0x40] sm:$0xff] }
0x11e0   :  { %3992 = vmatpush1.msra.mxu0 %v7795_v13  ;;  %4063 = vmatpush1.msra.mxu1 %v7796_v15  ;;  %v4186_v13 = vld [vmem:[%s7215_s19 + $0x38] sm:$0xff]  ;;  %v4185_v15 = vld [vmem:[%s7215_s19 + $0x30] sm:$0xff] }
0x11e1   :  { %3993 = vmatprep.subr.mxu0 %v7797_v19  ;;  %4064 = vmatprep.subr.mxu1 %v7798_v22  ;;  %v4184_v19 = vld [vmem:[%s7215_s19 + $0x28] sm:$0xff]  ;;  %v4183_v22 = vld [vmem:[%s7215_s19 + $0x20] sm:$0xff] }
0x11e2   :  { %3994 = vmatpush1.msra.mxu0 %v7799_v23  ;;  %4065 = vmatpush1.msra.mxu1 %v7800_v25  ;;  %v4182_v23 = vld [vmem:[%s7215_s19 + $0x18] sm:$0xff]  ;;  %v4181_v25 = vld [vmem:[%s7215_s19 + $0x10] sm:$0xff] }
0x11e3   :  { %3995 = vmatprep.subr.mxu0 %v7801_v26  ;;  %4066 = vmatprep.subr.mxu1 %v7802_v27  ;;  %v4180_v26 = vld [vmem:[%s7215_s19 + $0x8] sm:$0xff]  ;;  %v4179_v27 = vld [vmem:[%s7215_s19] sm:$0xff] }
0x11e4   :  { %3996 = vmatpush1.msra.mxu0 %v7803_v28  ;;  %4067 = vmatpush1.msra.mxu1 %v7804_v29 }
0x11e5   :  { %3997 = vmatprep.subr.mxu0 %v7805_v30  ;;  %4068 = vmatprep.subr.mxu1 %v7806_v31 }
0x11e6   :  { %3998 = vmatpush1.msra.mxu0 %v7807_v32  ;;  %4069 = vmatpush1.msra.mxu1 %v7808_v10 }
0x11e7   :  { %3999 = vmatprep.subr.mxu0 %v7809_v34  ;;  %4070 = vmatprep.subr.mxu1 %v7810_v46 }
0x11e8   :  { %4000 = vmatpush1.msra.mxu0 %v7811_v47  ;;  %4033 = vmatprep.mubr.f32.mxu0 %v7812_v48 }
0x11e9   :  { %4071 = vmatpush1.msra.mxu1 %v7813_v49  ;;  %4104 = vmatprep.mubr.f32.mxu1 %v7812_v48 }
0x11ea   :  { %4497 = vmatprep.subr.mxu0 %v4194_v14 }
0x1289   :  { %v3847_v56 = vpop.f32.mrf.mxu0  ;;  %v3918_v5 = vpop.f32.mrf.mxu1 }
0x128a   :  { %v3927_v9 = vrot.slane %v3847_v56, 4  ;;  %v3929_v33 = vrot.slane %v3918_v5, 4 }
0x128b   :  { %v3849_v4 = vpop.f32.mrf.mxu0  ;;  %v3920_v35 = vpop.f32.mrf.mxu1 }
0x128c   :  { %v3935_v21 = vadd.f32 %v3927_v9, %v7789_v1  ;;  %v3928_v62 = vrot.slane %v3849_v4, 4  ;;  %v3930_v57 = vrot.slane %v3920_v35, 4  ;;  %v3937_v11 = vadd.f32 %v3929_v33, %v7792_v39 }
0x128e   :  { %v4378_v60 = vmul.f32 -1.442695, %v3935_v21  ;;  %v3936_v63 = vadd.f32 %v3928_v62, %v7790_v40  ;;  %v3938_v2 = vadd.f32 %v3930_v57, %v7791_v58 }
0x1290   :  { %4768 = vpow2.f32 %v4378_v60  ;;  %v4379_v36 = vmul.f32 -1.442695, %v3936_v63  ;;  %v4380_v3 = vmul.f32 -1.442695, %v3938_v2 }
0x1292   :  { %4770 = vpow2.f32 %v4379_v36 }
0x1293   :  { %4772 = vpow2.f32 %v4380_v3 }
0x129d   :  { %v4769_v53 = vpop.eup %4768 }
0x129e   :  { %v3942_v16 = vadd.f32 1.0, %v4769_v53 }
0x129f   :  { %v4771_v52 = vpop.eup %4770 }
0x12a0   :  { %4774 = vrcp.f32 %v3942_v16  ;;  %v3948_v18 = vadd.f32 1.0, %v4771_v52  ;;  %v4773_v51 = vpop.eup %4772 }
0x12a1   :  { %4776 = vtanh.f32 %v3937_v11  ;;  %v3955_v38 = vadd.f32 1.0, %v4773_v51  ;;  %v7814_v51 = vld [vmem:[#allocation21_spill] sm:$0xff] }
0x12a2   :  { %4778 = vrcp.f32 %v3948_v18  ;;  %v4159_v18 = vrot.slane %v7048_v61, 2 }
0x12a3   :  { %4780 = vrcp.f32 %v3955_v38  ;;  %v7815_v38 = vld [vmem:[#allocation36_spill] sm:$0xff] }
0x12ad   :  { %v4775_v50 = vpop.eup %4774 }
0x12ae   :  { %v4777_v17 = vpop.eup %4776 }
0x12af   :  { %v4779_v37 = vpop.eup %4778  ;;  %v3962_v59 = vmul.f32 %v4777_v17, %v4775_v50  ;;  %v4162_v50 = vrot.slane %v7814_v51, 2 }
0x12b0   :  { %v3961_v24 = vmul.f32 %v4779_v37, %v3959_v54  ;;  %v4781_v0 = vpop.eup %4780 }
0x12b2   :  { %v7120_v55 = vadd.f32 %v3962_v59, %v3961_v24  ;;  %v4384_v59 = vld [vmem:[%s7216_s20] ss:$0 sm:$0xff] }
0x12b4   :  { %4782 = vtanh.f32 %v7120_v55  ;;  %v4147_v35 = vrot.slane %v7120_v55, 2 }
0x12c1   :  { %v4783_v6 = vpop.eup %4782 }
0x12c2   :  { %v7123_v20 = vmul.f32 %v4783_v6, %v4781_v0 }
0x12c4   :  { %v3967_v42 = vrot.slane %v7123_v20, 4  ;;  %v4157_v52 = vrot.slane %v7123_v20, 2 }
0x12c6   :  { %4034 = vmatmul.mubr.f32.vlgmr.msra.gmra.mxu0 %v3967_v42  ;;  %4105 = vmatmul.mubr.f32.vlgmr.msra.gmra.mxu1 %v3967_v42 }
0x12c7   :  { %4498 = vmatpush3.msra.mxu0 %v4194_v14 }
0x12c8   :  { %4499 = vmatprep.subr.mxu0 %v4193_v8 }
0x12c9   :  { %4500 = vmatpush3.msra.mxu0 %v4193_v8 }
0x12ca   :  { %4501 = vmatprep.subr.mxu0 %v4192_v45 }
0x12cb   :  { %4502 = vmatpush3.msra.mxu0 %v4192_v45 }
0x12cc   :  { %4503 = vmatprep.subr.mxu0 %v4191_v41 }
0x12cd   :  { %4504 = vmatpush3.msra.mxu0 %v4191_v41 }
0x12ce   :  { %4505 = vmatprep.subr.mxu0 %v4190_v44 }
0x12cf   :  { %4506 = vmatpush3.msra.mxu0 %v4190_v44 }
0x12d0   :  { %4507 = vmatprep.subr.mxu0 %v4189_v43 }
0x12d1   :  { %4508 = vmatpush3.msra.mxu0 %v4189_v43 }
0x12d2   :  { %4509 = vmatprep.subr.mxu0 %v4188_v7 }
0x12d3   :  { %4510 = vmatpush3.msra.mxu0 %v4188_v7 }
0x12d4   :  { %4511 = vmatprep.subr.mxu0 %v4187_v12 }
0x12d5   :  { %4512 = vmatpush3.msra.mxu0 %v4187_v12 }
0x12d6   :  { %4513 = vmatprep.subr.mxu0 %v4186_v13 }
0x12d7   :  { %4514 = vmatpush3.msra.mxu0 %v4186_v13  ;;  %v7816_v13 = vlaneseq }
0x12d8   :  { %4515 = vmatprep.subr.mxu0 %v4185_v15 }
0x12d9   :  { %4516 = vmatpush3.msra.mxu0 %v4185_v15  ;;  %v4278_v15 = vand.u32 127, %v7816_v13 }
0x12da   :  { %4517 = vmatprep.subr.mxu0 %v4184_v19 }
0x12db   :  { %4518 = vmatpush3.msra.mxu0 %v4184_v19  ;;  %vm4279_vm6 = vcmp.lt.s32.totalorder %v4278_v15, 8 }
0x12dc   :  { %4519 = vmatprep.subr.mxu0 %v4183_v22 }
0x12dd   :  { %4520 = vmatpush3.msra.mxu0 %v4183_v22 }
0x12de   :  { %4521 = vmatprep.subr.mxu0 %v4182_v23 }
0x12df   :  { %4522 = vmatpush3.msra.mxu0 %v4182_v23 }
0x12e0   :  { %4523 = vmatprep.subr.mxu0 %v4181_v25 }
0x12e1   :  { %4524 = vmatpush3.msra.mxu0 %v4181_v25 }
0x12e2   :  { %4525 = vmatprep.subr.mxu0 %v4180_v26 }
0x12e3   :  { %4526 = vmatpush3.msra.mxu0 %v4180_v26 }
0x12e4   :  { %4527 = vmatprep.subr.mxu0 %v4179_v27 }
0x12e5   :  { %4528 = vmatpush3.msra.mxu0 %v4179_v27 }
0x1386   :  { %v4035_v28 = vpop.f32.mrf.mxu0  ;;  %v4106_v32 = vpop.f32.mrf.mxu1 }
0x1387   :  { %v4115_v29 = vrot.slane %v4035_v28, 6  ;;  %v4117_v9 = vrot.slane %v4106_v32, 6 }
0x1388   :  { %v4037_v30 = vpop.f32.mrf.mxu0  ;;  %v4108_v48 = vpop.f32.mrf.mxu1 }
0x1389   :  { %v4123_v31 = vadd.f32 %v4115_v29, %v7789_v1  ;;  %v4116_v10 = vrot.slane %v4037_v30, 6  ;;  %v4118_v49 = vrot.slane %v4108_v48, 6  ;;  %v4125_v5 = vadd.f32 %v4117_v9, %v7792_v39 }
0x138b   :  { %v4381_v34 = vmul.f32 -1.442695, %v4123_v31  ;;  %v4124_v46 = vadd.f32 %v4116_v10, %v7790_v40  ;;  %v4126_v56 = vadd.f32 %v4118_v49, %v7791_v58 }
0x138d   :  { %4784 = vpow2.f32 %v4381_v34  ;;  %v4382_v47 = vmul.f32 -1.442695, %v4124_v46  ;;  %v4383_v4 = vmul.f32 -1.442695, %v4126_v56 }
0x138f   :  { %4786 = vpow2.f32 %v4382_v47 }
0x1390   :  { %4788 = vpow2.f32 %v4383_v4 }
0x139a   :  { %v4785_v21 = vpop.eup %4784 }
0x139b   :  { %v4130_v62 = vadd.f32 1.0, %v4785_v21 }
0x139c   :  { %v4787_v60 = vpop.eup %4786 }
0x139d   :  { %4790 = vrcp.f32 %v4130_v62  ;;  %v4136_v1 = vadd.f32 1.0, %v4787_v60  ;;  %v4789_v40 = vpop.eup %4788 }
0x139e   :  { %4792 = vtanh.f32 %v4125_v5  ;;  %v4143_v2 = vadd.f32 1.0, %v4789_v40 }
0x139f   :  { %4794 = vrcp.f32 %v4136_v1 }
0x13a0   :  { %4796 = vrcp.f32 %v4143_v2 }
0x13aa   :  { %v4791_v63 = vpop.eup %4790 }
0x13ab   :  { %v4793_v36 = vpop.eup %4792 }
0x13ac   :  { %v4795_v57 = vpop.eup %4794  ;;  %v4150_v58 = vmul.f32 %v4793_v36, %v4791_v63 }
0x13ad   :  { %v4149_v33 = vmul.f32 %v4795_v57, %v4147_v35  ;;  %v4797_v39 = vpop.eup %4796 }
0x13af   :  { %v4151_v3 = vadd.f32 %v4150_v58, %v4149_v33 }
0x13b1   :  { %4798 = vtanh.f32 %v4151_v3 }
0x13be   :  { %v4799_v53 = vpop.eup %4798 }
0x13bf   :  { %v4153_v11 = vmul.f32 %v4799_v53, %v4797_v39 }
0x13c1   :  { %v4155_v16 = vrot.slane %v4153_v11, 2 }
0x13c3   :  { %v4172_v17 = vsel %vm4171_vm4, %v4155_v16, %v4157_v52 }
0x13c4   :  { %v4174_v54 = vsel %vm4173_vm5, %v4172_v17, %v4159_v18 }
0x13c5   :  { %v4175_v37 = vsel %vm143_vm0, %v4174_v54, %v4162_v50 }
0x13c6   :  { %4529 = vmatprep.mubr.f32.mxu0 %v4175_v37 }
0x13c7   :  { %4530 = vmatmul.mubr.f32.vlgmr.msra.gmra.mxu0 %v7815_v38 }
0x1487   :  { %v4531_v24 = vpop.f32.mrf.mxu0 }
0x1488   :  { %v4274_v55 = vadd.f32 %v4531_v24, %v4384_v59 }
0x1489   :  { %v4268_v0 = vpop.f32.mrf.mxu0 }
0x148a   :  { %v4283_v6 = vmin.f32 %v4274_v55, 20.0  ;;  %v4269_v61 = vadd.f32 %v4384_v59, %v4268_v0  ;;  %vm4281_vm8 = vcmp.gt.f32.partialorder %v4274_v55, 20.0 }
0x148c   :  { %v4286_v20 = vmul.f32 1.442695, %v4283_v6  ;;  %v4282_v42 = vmin.f32 %v4269_v61, 20.0  ;;  %vm4280_vm10 = vcmp.gt.f32.partialorder %v4269_v61, 20.0 }
0x148e   :  { %4800 = vpow2.f32 %v4286_v20  ;;  %v4284_v14 = vmul.f32 1.442695, %v4282_v42 }
0x1490   :  { %4802 = vpow2.f32 %v4284_v14 }
0x149b   :  { %v4801_v8 = vpop.eup %4800 }
0x149c   :  { %v4297_v45 = vadd.f32 1.0, %v4801_v8  ;;  %v4300_v43 = vmul.f32 -0.5, %v4801_v8  ;;  %v4303_v19 = vand.u32 2147483647, %v4801_v8 }
0x149d   :  { %v4803_v41 = vpop.eup %4802 }
0x149e   :  { %4804 = vlog2.f32 %v4297_v45  ;;  %v4288_v44 = vadd.f32 1.0, %v4803_v41  ;;  %v4291_v7 = vmul.f32 -0.5, %v4803_v41  ;;  %v4301_v12 = vadd.f32 1.0, %v4300_v43 }
0x149f   :  { %v4294_v25 = vand.u32 2147483647, %v4803_v41  ;;  %vm4304_vm7 = vcmp.lt.f32.partialorder %v4303_v19, 0.0004427343 }
0x14a0   :  { %4806 = vlog2.f32 %v4288_v44  ;;  %v4292_v22 = vadd.f32 1.0, %v4291_v7  ;;  %v4302_v27 = vmul.f32 %v4801_v8, %v4301_v12 }
0x14a1   :  { %vm4295_vm9 = vcmp.lt.f32.partialorder %v4294_v25, 0.0004427343 }
0x14a2   :  { %v4293_v31 = vmul.f32 %v4803_v41, %v4292_v22 }
0x14ab   :  { %v4805_v23 = vpop.eup %4804 }
0x14ac   :  { %v4299_v26 = vmul.f32 0.6931472, %v4805_v23 }
0x14ad   :  { %v4807_v28 = vpop.eup %4806 }
0x14ae   :  { %v4305_v29 = vsel %vm4304_vm7, %v4302_v27, %v4299_v26  ;;  %v4290_v30 = vmul.f32 0.6931472, %v4807_v28 }
0x14af   :  { %v4307_v32 = vsel %vm4281_vm8, %v4274_v55, %v4305_v29 }
0x14b0   :  { %v4309_v10 = vsel %vm4279_vm6, %v4307_v32, %v4274_v55  ;;  %v4296_v34 = vsel %vm4295_vm9, %v4293_v31, %v4290_v30 }
0x14b1   :  { %4311 = vst [vmem:[%s7218_s22 + $0x8] sm:$0xff] %v4309_v10  ;;  %v4306_v46 = vsel %vm4280_vm10, %v4269_v61, %v4296_v34 }
0x14b2   :  { %v4308_v47 = vsel %vm4279_vm6, %v4306_v46, %v4269_v61 }
0x14b3   :  { %4310 = vst [vmem:[%s7218_s22] sm:$0xff] %v4308_v47 }
0x14b4   :  { %4320 = vsyncpa [#allocation3], 1 }
0x14b5   :  { %4321 = vsyncpa [#allocation5], 1 }
0x14b6   :  { %4322 = vsyncpa [#allocation8], 1 }

</bundles_post_ra>
